<compile_context>
chip_gen: v6e
topology: v6e:2x2x1
jax: 0.10.0
libtpu: 0.0.40
codegen_flags: <defaults>
</compile_context>

<pallas_src>
import functools
import math

import jax
import jax.numpy as jnp
from jax import lax
from jax.experimental import pallas as pl
from jax.experimental.pallas import tpu as pltpu


# ----------------------------------------------------------------------------
# small helpers
# ----------------------------------------------------------------------------
def _pair(v):
    return (v, v) if isinstance(v, int) else tuple(v)


def _pick_row_tile(ho, wo, target_rows=512):
    """Largest divisor t of ho with (t*wo) a sublane multiple and t*wo <= target."""
    best = None
    for t in range(1, ho + 1):
        if ho % t == 0 and (t * wo) % 8 == 0 and t * wo <= target_rows:
            best = t
    if best is None:
        best = ho  # single full-extent block (block == full dim is always legal)
    return best


def _pick_cout_tile(cout):
    """Lane-dense Cout tile when possible, otherwise one full-extent block."""
    for t in (512, 256, 128):
        if cout % t == 0:
            return t
    return cout


# ----------------------------------------------------------------------------
# Pallas kernel: fused conv (any stride, via phase decomposition) + BN bias + ReLU
# ----------------------------------------------------------------------------
def _conv_bn_relu_kernel(x_ref, w_ref, b_ref, o_ref, *, kh, kw, sh, sw, th, wo, relu):
    """x_ref : (sh*sw, Hph, Wph, Cin)  bf16  -- phase-decomposed padded image (one batch elem)
       w_ref : (kh*kw, Cin, TN)        bf16  -- BN scale already folded in
       b_ref : (1, TN)                 f32   -- folded BN bias
       o_ref : (TH*Wo, TN)             f32
    """
    hb = pl.program_id(1)
    row0 = hb * th
    cin = x_ref.shape[-1]
    mt, tn = o_ref.shape

    acc = jnp.zeros((mt, tn), jnp.float32)
    # In-kernel im2col: kh*kw contiguous VMEM reads (phase decomposition already
    # absorbed the stride), each feeding one MXU matmul, accumulated in registers.
    # TODO(synk): for small Cin a single concatenated K=kh*kw*Cin matmul would use
    # the MXU contraction rows better; kept as per-tap matmuls for robust lowering.
    for i in range(kh):
        for j in range(kw):
            pi = (i % sh) * sw + (j % sw)                       # static phase index
            patch = x_ref[pi, pl.ds(row0 + i // sh, th), pl.ds(j // sw, wo), :]
            a = patch.reshape(mt, cin)                          # (mt, cin) bf16
            acc = acc + jnp.dot(a, w_ref[i * kw + j],
                                preferred_element_type=jnp.float32)

    y = acc + b_ref[...]
    if relu:
        y = jnp.maximum(y, 0.0)
    o_ref[...] = y.astype(o_ref.dtype)


def _fused_conv_bn_relu(xph, w3, bias, *, kh, kw, sh, sw, ho, wo, relu):
    # TODO(synk): for very large feature maps, tile H with a halo instead of staging
    # the whole (phase-decomposed) padded image in VMEM per batch element.
    n, nph, hph, wph, cin = xph.shape
    cout = w3.shape[-1]
    th = _pick_row_tile(ho, wo)
    tn = _pick_cout_tile(cout)
    mt = th * wo

    kernel = functools.partial(_conv_bn_relu_kernel,
                               kh=kh, kw=kw, sh=sh, sw=sw, th=th, wo=wo, relu=relu)
    out = pl.pallas_call(
        kernel,
        out_shape=jax.ShapeDtypeStruct((n, ho * wo, cout), jnp.float32),
        grid_spec=pltpu.PrefetchScalarGridSpec(
            num_scalar_prefetch=0,
            grid=(n, ho // th, cout // tn),
            in_specs=[
                pl.BlockSpec((None, nph, hph, wph, cin),
                             lambda b, hb, cb: (b, 0, 0, 0, 0)),
                pl.BlockSpec((kh * kw, cin, tn), lambda b, hb, cb: (0, 0, cb)),
                pl.BlockSpec((1, tn), lambda b, hb, cb: (0, cb)),
            ],
            out_specs=pl.BlockSpec((None, mt, tn), lambda b, hb, cb: (b, hb, cb)),
        ),
        compiler_params=pltpu.CompilerParams(
            dimension_semantics=("parallel", "parallel", "parallel"),
            vmem_limit_bytes=48 * 1024 * 1024,
        ),
    )(xph, w3, bias)
    return out.reshape(n, ho, wo, cout)


@functools.partial(jax.jit, static_argnames=("kh", "kw", "sh", "sw", "ph", "pw", "relu"))
def basic_conv2d_forward(x_nchw, w3, bias, *, kh, kw, sh, sw, ph, pw, relu=True):
    """Full BasicConv2d forward (NCHW in, NCHW out), everything under one jit."""
    x = jnp.transpose(x_nchw, (0, 2, 3, 1)).astype(jnp.bfloat16)     # NHWC bf16 operands
    xp = jnp.pad(x, ((0, 0), (ph, ph), (pw, pw), (0, 0)))
    n, hp, wp, cin = xp.shape
    ho = (hp - kh) // sh + 1
    wo = (wp - kw) // sw + 1

    # Phase decomposition: xph[b, p*sw+q, r, c, :] == xp[b, r*sh+p, c*sw+q, :]
    # so every in-kernel tap read is contiguous regardless of stride.
    hph = ho + (kh - 1) // sh
    wph = wo + (kw - 1) // sw
    if sh == 1 and sw == 1:
        xph = xp[:, None]                                            # (n,1,Hp,Wp,Cin)
    else:
        hp2, wp2 = hph * sh, wph * sw
        if hp2 != hp or wp2 != wp:
            xp = jnp.pad(xp, ((0, 0), (0, max(hp2 - hp, 0)),
                              (0, max(wp2 - wp, 0)), (0, 0)))[:, :hp2, :wp2, :]
        xph = xp.reshape(n, hph, sh, wph, sw, cin)
        xph = jnp.transpose(xph, (0, 2, 4, 1, 3, 5)).reshape(n, sh * sw, hph, wph, cin)

    y = _fused_conv_bn_relu(xph, w3, bias, kh=kh, kw=kw, sh=sh, sw=sw,
                            ho=ho, wo=wo, relu=relu)
    return jnp.transpose(y, (0, 3, 1, 2)).astype(jnp.float32)        # back to NCHW


# ----------------------------------------------------------------------------
# Parameter folding + module wrapper (mirrors the PyTorch BasicConv2d)
# ----------------------------------------------------------------------------
def fold_bn_conv_params(w_hwio, gamma, beta, mean, var, eps=1e-3):
    """Fold eval-mode BatchNorm into the conv weight; returns bf16 weights + f32 bias."""
    scale = gamma / jnp.sqrt(var + eps)                              # (Cout,)
    w_folded = (w_hwio * scale[None, None, None, :]).astype(jnp.bfloat16)
    bias = (beta - mean * scale).astype(jnp.float32).reshape(1, -1)  # (1, Cout)
    kh, kw, cin, cout = w_hwio.shape
    return w_folded.reshape(kh * kw, cin, cout), bias


class BasicConv2d:
    """Pallas port of: Conv2d(bias=False) -> BatchNorm2d(eps=1e-3) -> ReLU (NCHW io)."""
    # TODO(synk): BatchNorm is applied in eval mode (folded running statistics);
    # training-mode batch statistics are not implemented.

    def __init__(self, key, in_planes, out_planes, kernel_size, stride, padding=0):
        kh, kw = _pair(kernel_size)
        sh, sw = _pair(stride)
        ph, pw = _pair(padding)
        self.cfg = (kh, kw, sh, sw, ph, pw)

        k1, k2, k3, k4, k5 = jax.random.split(key, 5)
        fan_in = in_planes * kh * kw
        # Weight stored as (kh, kw, Cin, Cout)  (== PyTorch (Cout,Cin,kh,kw).transpose(2,3,1,0))
        w = jax.random.normal(k1, (kh, kw, in_planes, out_planes), jnp.float32) \
            * math.sqrt(2.0 / fan_in)
        gamma = jax.random.uniform(k2, (out_planes,), jnp.float32, 0.5, 1.5)
        beta = 0.1 * jax.random.normal(k3, (out_planes,), jnp.float32)
        mean = 0.1 * jax.random.normal(k4, (out_planes,), jnp.float32)
        var = jax.random.uniform(k5, (out_planes,), jnp.float32, 0.5, 1.5)

        self.raw = (w, gamma, beta, mean, var)                       # for reference check
        self.w3, self.bias = fold_bn_conv_params(w, gamma, beta, mean, var)

    def __call__(self, x_nchw):
        kh, kw, sh, sw, ph, pw = self.cfg
        return basic_conv2d_forward(x_nchw, self.w3, self.bias,
                                    kh=kh, kw=kw, sh=sh, sw=sw, ph=ph, pw=pw, relu=True)


# ----------------------------------------------------------------------------
# Pure-JAX reference (for correctness checking only)
# ----------------------------------------------------------------------------
def basic_conv2d_reference(x, w_hwio, gamma, beta, mean, var, *, stride, padding,
                           eps=1e-3, match_bf16=False):
    sh, sw = _pair(stride)
    ph, pw = _pair(padding)
    scale = gamma / jnp.sqrt(var + eps)
    bias = beta - mean * scale
    if match_bf16:
        x = x.astype(jnp.bfloat16).astype(jnp.float32)
        w = (w_hwio * scale[None, None, None, :]).astype(jnp.bfloat16).astype(jnp.float32)
        y = lax.conv_general_dilated(x, w, (sh, sw), ((ph, ph), (pw, pw)),
                                     dimension_numbers=("NCHW", "HWIO", "NCHW"),
                                     precision=lax.Precision.HIGHEST)
        y = y + bias[None, :, None, None]
    else:
        y = lax.conv_general_dilated(x, w_hwio, (sh, sw), ((ph, ph), (pw, pw)),
                                     dimension_numbers=("NCHW", "HWIO", "NCHW"),
                                     precision=lax.Precision.HIGHEST)
        y = y * scale[None, :, None, None] + bias[None, :, None, None]
    return jnp.maximum(y, 0.0)


# ----------------------------------------------------------------------------
if __name__ == "__main__":
    key = jax.random.PRNGKey(0)
    k_mod1, k_mod2, k_x1, k_x2 = jax.random.split(key, 4)

    # --- Config 1: 3x3, stride=1, padding=1  (single-phase fused path).
    m1 = BasicConv2d(k_mod1, in_planes=32, out_planes=128, kernel_size=3,
                     stride=1, padding=1)
    x1 = jax.random.normal(k_x1, (2, 32, 16, 16), jnp.float32)       # NCHW
    y1 = jax.block_until_ready(m1(x1))
    assert y1.shape == (2, 128, 16, 16), y1.shape
    assert bool(jnp.all(jnp.isfinite(y1)))
    r1_matched = basic_conv2d_reference(x1, *m1.raw, stride=1, padding=1, match_bf16=True)
    r1_f32 = basic_conv2d_reference(x1, *m1.raw, stride=1, padding=1, match_bf16=False)
    err_matched = float(jnp.max(jnp.abs(y1 - r1_matched)))
    err_f32 = float(jnp.max(jnp.abs(y1 - r1_f32)))
    assert err_matched < 1e-2, err_matched   # matched-precision (bf16 operands) check
    assert err_f32 < 2.5e-1, err_f32         # loose check against pure-f32 reference

    # --- Config 2: 3x3, stride=2, padding=1  (phase-decomposed fused path).
    m2 = BasicConv2d(k_mod2, in_planes=16, out_planes=64, kernel_size=3,
                     stride=2, padding=1)
    x2 = jax.random.normal(k_x2, (2, 16, 16, 16), jnp.float32)       # NCHW
    y2 = jax.block_until_ready(m2(x2))
    assert y2.shape == (2, 64, 8, 8), y2.shape
    assert bool(jnp.all(jnp.isfinite(y2)))
    r2_matched = basic_conv2d_reference(x2, *m2.raw, stride=2, padding=1, match_bf16=True)
    err2 = float(jnp.max(jnp.abs(y2 - r2_matched)))
    assert err2 < 1e-2, err2

    print("KERNEL_OK")
</pallas_src>

<mosaic_0001>
module attributes {stable_mosaic.version = 11 : i64} {
  func.func @_conv_bn_relu_kernel(%arg0: i32, %arg1: i32, %arg2: i32, %arg3: memref<1x1x18x18x32xbf16, #tpu.memory_space<vmem>>, %arg4: memref<9x32x128xbf16, #tpu.memory_space<vmem>>, %arg5: memref<1x128xf32, #tpu.memory_space<vmem>>, %arg6: memref<1x256x128xf32, #tpu.memory_space<vmem>>) attributes {dimension_semantics = [#tpu.dimension_semantics<parallel>, #tpu.dimension_semantics<parallel>, #tpu.dimension_semantics<parallel>], iteration_bounds = array<i64: 2, 1, 1>, scalar_prefetch = 0 : i64, scratch_operands = 0 : i64, tpu.core_type = #tpu.core_type<tc>, window_params = [{transform_indices = @transform_0, window_bounds = array<i64: 1, 1, 18, 18, 32>}, {transform_indices = @transform_1, window_bounds = array<i64: 9, 32, 128>}, {transform_indices = @transform_2, window_bounds = array<i64: 1, 128>}, {transform_indices = @transform_3, window_bounds = array<i64: 1, 256, 128>}]} {
    %c16_i32 = arith.constant 16 : i32
    %0 = arith.muli %arg1, %c16_i32 : i32
    %cst = arith.constant 0.000000e+00 : f32
    %1 = vector.broadcast %cst : f32 to vector<256x128xf32>
    %c0_i32 = arith.constant 0 : i32
    %2 = arith.addi %0, %c0_i32 : i32
    %c0 = arith.constant 0 : index
    %c0_0 = arith.constant 0 : index
    %3 = arith.index_cast %2 : i32 to index
    %c0_1 = arith.constant 0 : index
    %c0_2 = arith.constant 0 : index
    %4 = vector.load %arg3[%c0, %c0_0, %3, %c0_1, %c0_2] : memref<1x1x18x18x32xbf16, #tpu.memory_space<vmem>>, vector<1x1x16x16x32xbf16>
    %5 = vector.shape_cast %4 : vector<1x1x16x16x32xbf16> to vector<16x16x32xbf16>
    %6 = vector.shape_cast %5 : vector<16x16x32xbf16> to vector<256x32xbf16>
    %c0_3 = arith.constant 0 : index
    %c0_4 = arith.constant 0 : index
    %c0_5 = arith.constant 0 : index
    %7 = vector.load %arg4[%c0_3, %c0_4, %c0_5] : memref<9x32x128xbf16, #tpu.memory_space<vmem>>, vector<1x32x128xbf16>
    %8 = vector.shape_cast %7 : vector<1x32x128xbf16> to vector<32x128xbf16>
    %cst_6 = arith.constant dense<0.000000e+00> : vector<256x128xf32>
    %9 = tpu.matmul %6, %8, %cst_6 {dimension_numbers = #tpu.dot_dimension_numbers<[1], [0], [0], [1], [0, 0, 1, 1], [], []>} : vector<256x32xbf16>, vector<32x128xbf16>, vector<256x128xf32> -> vector<256x128xf32>
    %10 = arith.addf %1, %9 : vector<256x128xf32>
    %c0_i32_7 = arith.constant 0 : i32
    %11 = arith.addi %0, %c0_i32_7 : i32
    %c0_8 = arith.constant 0 : index
    %c0_9 = arith.constant 0 : index
    %12 = arith.index_cast %11 : i32 to index
    %c1 = arith.constant 1 : index
    %c0_10 = arith.constant 0 : index
    %13 = vector.load %arg3[%c0_8, %c0_9, %12, %c1, %c0_10] : memref<1x1x18x18x32xbf16, #tpu.memory_space<vmem>>, vector<1x1x16x16x32xbf16>
    %14 = vector.shape_cast %13 : vector<1x1x16x16x32xbf16> to vector<16x16x32xbf16>
    %15 = vector.shape_cast %14 : vector<16x16x32xbf16> to vector<256x32xbf16>
    %c1_11 = arith.constant 1 : index
    %c0_12 = arith.constant 0 : index
    %c0_13 = arith.constant 0 : index
    %16 = vector.load %arg4[%c1_11, %c0_12, %c0_13] : memref<9x32x128xbf16, #tpu.memory_space<vmem>>, vector<1x32x128xbf16>
    %17 = vector.shape_cast %16 : vector<1x32x128xbf16> to vector<32x128xbf16>
    %cst_14 = arith.constant dense<0.000000e+00> : vector<256x128xf32>
    %18 = tpu.matmul %15, %17, %cst_14 {dimension_numbers = #tpu.dot_dimension_numbers<[1], [0], [0], [1], [0, 0, 1, 1], [], []>} : vector<256x32xbf16>, vector<32x128xbf16>, vector<256x128xf32> -> vector<256x128xf32>
    %19 = arith.addf %10, %18 : vector<256x128xf32>
    %c0_i32_15 = arith.constant 0 : i32
    %20 = arith.addi %0, %c0_i32_15 : i32
    %c0_16 = arith.constant 0 : index
    %c0_17 = arith.constant 0 : index
    %21 = arith.index_cast %20 : i32 to index
    %c2 = arith.constant 2 : index
    %c0_18 = arith.constant 0 : index
    %22 = vector.load %arg3[%c0_16, %c0_17, %21, %c2, %c0_18] : memref<1x1x18x18x32xbf16, #tpu.memory_space<vmem>>, vector<1x1x16x16x32xbf16>
    %23 = vector.shape_cast %22 : vector<1x1x16x16x32xbf16> to vector<16x16x32xbf16>
    %24 = vector.shape_cast %23 : vector<16x16x32xbf16> to vector<256x32xbf16>
    %c2_19 = arith.constant 2 : index
    %c0_20 = arith.constant 0 : index
    %c0_21 = arith.constant 0 : index
    %25 = vector.load %arg4[%c2_19, %c0_20, %c0_21] : memref<9x32x128xbf16, #tpu.memory_space<vmem>>, vector<1x32x128xbf16>
    %26 = vector.shape_cast %25 : vector<1x32x128xbf16> to vector<32x128xbf16>
    %cst_22 = arith.constant dense<0.000000e+00> : vector<256x128xf32>
    %27 = tpu.matmul %24, %26, %cst_22 {dimension_numbers = #tpu.dot_dimension_numbers<[1], [0], [0], [1], [0, 0, 1, 1], [], []>} : vector<256x32xbf16>, vector<32x128xbf16>, vector<256x128xf32> -> vector<256x128xf32>
    %28 = arith.addf %19, %27 : vector<256x128xf32>
    %c1_i32 = arith.constant 1 : i32
    %29 = arith.addi %0, %c1_i32 : i32
    %c0_23 = arith.constant 0 : index
    %c0_24 = arith.constant 0 : index
    %30 = arith.index_cast %29 : i32 to index
    %c0_25 = arith.constant 0 : index
    %c0_26 = arith.constant 0 : index
    %31 = vector.load %arg3[%c0_23, %c0_24, %30, %c0_25, %c0_26] : memref<1x1x18x18x32xbf16, #tpu.memory_space<vmem>>, vector<1x1x16x16x32xbf16>
    %32 = vector.shape_cast %31 : vector<1x1x16x16x32xbf16> to vector<16x16x32xbf16>
    %33 = vector.shape_cast %32 : vector<16x16x32xbf16> to vector<256x32xbf16>
    %c3 = arith.constant 3 : index
    %c0_27 = arith.constant 0 : index
    %c0_28 = arith.constant 0 : index
    %34 = vector.load %arg4[%c3, %c0_27, %c0_28] : memref<9x32x128xbf16, #tpu.memory_space<vmem>>, vector<1x32x128xbf16>
    %35 = vector.shape_cast %34 : vector<1x32x128xbf16> to vector<32x128xbf16>
    %cst_29 = arith.constant dense<0.000000e+00> : vector<256x128xf32>
    %36 = tpu.matmul %33, %35, %cst_29 {dimension_numbers = #tpu.dot_dimension_numbers<[1], [0], [0], [1], [0, 0, 1, 1], [], []>} : vector<256x32xbf16>, vector<32x128xbf16>, vector<256x128xf32> -> vector<256x128xf32>
    %37 = arith.addf %28, %36 : vector<256x128xf32>
    %c1_i32_30 = arith.constant 1 : i32
    %38 = arith.addi %0, %c1_i32_30 : i32
    %c0_31 = arith.constant 0 : index
    %c0_32 = arith.constant 0 : index
    %39 = arith.index_cast %38 : i32 to index
    %c1_33 = arith.constant 1 : index
    %c0_34 = arith.constant 0 : index
    %40 = vector.load %arg3[%c0_31, %c0_32, %39, %c1_33, %c0_34] : memref<1x1x18x18x32xbf16, #tpu.memory_space<vmem>>, vector<1x1x16x16x32xbf16>
    %41 = vector.shape_cast %40 : vector<1x1x16x16x32xbf16> to vector<16x16x32xbf16>
    %42 = vector.shape_cast %41 : vector<16x16x32xbf16> to vector<256x32xbf16>
    %c4 = arith.constant 4 : index
    %c0_35 = arith.constant 0 : index
    %c0_36 = arith.constant 0 : index
    %43 = vector.load %arg4[%c4, %c0_35, %c0_36] : memref<9x32x128xbf16, #tpu.memory_space<vmem>>, vector<1x32x128xbf16>
    %44 = vector.shape_cast %43 : vector<1x32x128xbf16> to vector<32x128xbf16>
    %cst_37 = arith.constant dense<0.000000e+00> : vector<256x128xf32>
    %45 = tpu.matmul %42, %44, %cst_37 {dimension_numbers = #tpu.dot_dimension_numbers<[1], [0], [0], [1], [0, 0, 1, 1], [], []>} : vector<256x32xbf16>, vector<32x128xbf16>, vector<256x128xf32> -> vector<256x128xf32>
    %46 = arith.addf %37, %45 : vector<256x128xf32>
    %c1_i32_38 = arith.constant 1 : i32
    %47 = arith.addi %0, %c1_i32_38 : i32
    %c0_39 = arith.constant 0 : index
    %c0_40 = arith.constant 0 : index
    %48 = arith.index_cast %47 : i32 to index
    %c2_41 = arith.constant 2 : index
    %c0_42 = arith.constant 0 : index
    %49 = vector.load %arg3[%c0_39, %c0_40, %48, %c2_41, %c0_42] : memref<1x1x18x18x32xbf16, #tpu.memory_space<vmem>>, vector<1x1x16x16x32xbf16>
    %50 = vector.shape_cast %49 : vector<1x1x16x16x32xbf16> to vector<16x16x32xbf16>
    %51 = vector.shape_cast %50 : vector<16x16x32xbf16> to vector<256x32xbf16>
    %c5 = arith.constant 5 : index
    %c0_43 = arith.constant 0 : index
    %c0_44 = arith.constant 0 : index
    %52 = vector.load %arg4[%c5, %c0_43, %c0_44] : memref<9x32x128xbf16, #tpu.memory_space<vmem>>, vector<1x32x128xbf16>
    %53 = vector.shape_cast %52 : vector<1x32x128xbf16> to vector<32x128xbf16>
    %cst_45 = arith.constant dense<0.000000e+00> : vector<256x128xf32>
    %54 = tpu.matmul %51, %53, %cst_45 {dimension_numbers = #tpu.dot_dimension_numbers<[1], [0], [0], [1], [0, 0, 1, 1], [], []>} : vector<256x32xbf16>, vector<32x128xbf16>, vector<256x128xf32> -> vector<256x128xf32>
    %55 = arith.addf %46, %54 : vector<256x128xf32>
    %c2_i32 = arith.constant 2 : i32
    %56 = arith.addi %0, %c2_i32 : i32
    %c0_46 = arith.constant 0 : index
    %c0_47 = arith.constant 0 : index
    %57 = arith.index_cast %56 : i32 to index
    %c0_48 = arith.constant 0 : index
    %c0_49 = arith.constant 0 : index
    %58 = vector.load %arg3[%c0_46, %c0_47, %57, %c0_48, %c0_49] : memref<1x1x18x18x32xbf16, #tpu.memory_space<vmem>>, vector<1x1x16x16x32xbf16>
    %59 = vector.shape_cast %58 : vector<1x1x16x16x32xbf16> to vector<16x16x32xbf16>
    %60 = vector.shape_cast %59 : vector<16x16x32xbf16> to vector<256x32xbf16>
    %c6 = arith.constant 6 : index
    %c0_50 = arith.constant 0 : index
    %c0_51 = arith.constant 0 : index
    %61 = vector.load %arg4[%c6, %c0_50, %c0_51] : memref<9x32x128xbf16, #tpu.memory_space<vmem>>, vector<1x32x128xbf16>
    %62 = vector.shape_cast %61 : vector<1x32x128xbf16> to vector<32x128xbf16>
    %cst_52 = arith.constant dense<0.000000e+00> : vector<256x128xf32>
    %63 = tpu.matmul %60, %62, %cst_52 {dimension_numbers = #tpu.dot_dimension_numbers<[1], [0], [0], [1], [0, 0, 1, 1], [], []>} : vector<256x32xbf16>, vector<32x128xbf16>, vector<256x128xf32> -> vector<256x128xf32>
    %64 = arith.addf %55, %63 : vector<256x128xf32>
    %c2_i32_53 = arith.constant 2 : i32
    %65 = arith.addi %0, %c2_i32_53 : i32
    %c0_54 = arith.constant 0 : index
    %c0_55 = arith.constant 0 : index
    %66 = arith.index_cast %65 : i32 to index
    %c1_56 = arith.constant 1 : index
    %c0_57 = arith.constant 0 : index
    %67 = vector.load %arg3[%c0_54, %c0_55, %66, %c1_56, %c0_57] : memref<1x1x18x18x32xbf16, #tpu.memory_space<vmem>>, vector<1x1x16x16x32xbf16>
    %68 = vector.shape_cast %67 : vector<1x1x16x16x32xbf16> to vector<16x16x32xbf16>
    %69 = vector.shape_cast %68 : vector<16x16x32xbf16> to vector<256x32xbf16>
    %c7 = arith.constant 7 : index
    %c0_58 = arith.constant 0 : index
    %c0_59 = arith.constant 0 : index
    %70 = vector.load %arg4[%c7, %c0_58, %c0_59] : memref<9x32x128xbf16, #tpu.memory_space<vmem>>, vector<1x32x128xbf16>
    %71 = vector.shape_cast %70 : vector<1x32x128xbf16> to vector<32x128xbf16>
    %cst_60 = arith.constant dense<0.000000e+00> : vector<256x128xf32>
    %72 = tpu.matmul %69, %71, %cst_60 {dimension_numbers = #tpu.dot_dimension_numbers<[1], [0], [0], [1], [0, 0, 1, 1], [], []>} : vector<256x32xbf16>, vector<32x128xbf16>, vector<256x128xf32> -> vector<256x128xf32>
    %73 = arith.addf %64, %72 : vector<256x128xf32>
    %c2_i32_61 = arith.constant 2 : i32
    %74 = arith.addi %0, %c2_i32_61 : i32
    %c0_62 = arith.constant 0 : index
    %c0_63 = arith.constant 0 : index
    %75 = arith.index_cast %74 : i32 to index
    %c2_64 = arith.constant 2 : index
    %c0_65 = arith.constant 0 : index
    %76 = vector.load %arg3[%c0_62, %c0_63, %75, %c2_64, %c0_65] : memref<1x1x18x18x32xbf16, #tpu.memory_space<vmem>>, vector<1x1x16x16x32xbf16>
    %77 = vector.shape_cast %76 : vector<1x1x16x16x32xbf16> to vector<16x16x32xbf16>
    %78 = vector.shape_cast %77 : vector<16x16x32xbf16> to vector<256x32xbf16>
    %c8 = arith.constant 8 : index
    %c0_66 = arith.constant 0 : index
    %c0_67 = arith.constant 0 : index
    %79 = vector.load %arg4[%c8, %c0_66, %c0_67] : memref<9x32x128xbf16, #tpu.memory_space<vmem>>, vector<1x32x128xbf16>
    %80 = vector.shape_cast %79 : vector<1x32x128xbf16> to vector<32x128xbf16>
    %cst_68 = arith.constant dense<0.000000e+00> : vector<256x128xf32>
    %81 = tpu.matmul %78, %80, %cst_68 {dimension_numbers = #tpu.dot_dimension_numbers<[1], [0], [0], [1], [0, 0, 1, 1], [], []>} : vector<256x32xbf16>, vector<32x128xbf16>, vector<256x128xf32> -> vector<256x128xf32>
    %82 = arith.addf %73, %81 : vector<256x128xf32>
    %c0_69 = arith.constant 0 : index
    %c0_70 = arith.constant 0 : index
    %83 = vector.load %arg5[%c0_69, %c0_70] : memref<1x128xf32, #tpu.memory_space<vmem>>, vector<1x128xf32>
    %84 = vector.broadcast %83 : vector<1x128xf32> to vector<256x128xf32>
    %85 = arith.addf %82, %84 : vector<256x128xf32>
    %cst_71 = arith.constant 0.000000e+00 : f32
    %86 = vector.broadcast %cst_71 : f32 to vector<256x128xf32>
    %87 = arith.maximumf %85, %86 : vector<256x128xf32>
    %c0_72 = arith.constant 0 : index
    %c0_73 = arith.constant 0 : index
    %c0_74 = arith.constant 0 : index
    %88 = vector.load %arg6[%c0_72, %c0_73, %c0_74] : memref<1x256x128xf32, #tpu.memory_space<vmem>>, vector<1x256x128xf32>
    %89 = vector.shape_cast %88 : vector<1x256x128xf32> to vector<256x128xf32>
    %90 = vector.shape_cast %87 : vector<256x128xf32> to vector<1x256x128xf32>
    tpu.vector_store %arg6[%c0_72, %c0_73, %c0_74], %90 {strides = array<i32>} : memref<1x256x128xf32, #tpu.memory_space<vmem>>, vector<1x256x128xf32>,
    return
  }
  func.func @transform_0(%arg0: i32, %arg1: i32, %arg2: i32) -> (i32, i32, i32, i32, i32) {
    %c0_i32 = arith.constant 0 : i32
    %c0_i32_0 = arith.constant 0 : i32
    %c0_i32_1 = arith.constant 0 : i32
    %c0_i32_2 = arith.constant 0 : i32
    %c0_i32_3 = arith.constant 0 : i32
    return %arg0, %c0_i32, %c0_i32_0, %c0_i32_1, %c0_i32_2 : i32, i32, i32, i32, i32
  }
  func.func @transform_1(%arg0: i32, %arg1: i32, %arg2: i32) -> (i32, i32, i32) {
    %c0_i32 = arith.constant 0 : i32
    %c0_i32_0 = arith.constant 0 : i32
    %c0_i32_1 = arith.constant 0 : i32
    return %c0_i32, %c0_i32_0, %arg2 : i32, i32, i32
  }
  func.func @transform_2(%arg0: i32, %arg1: i32, %arg2: i32) -> (i32, i32) {
    %c0_i32 = arith.constant 0 : i32
    %c0_i32_0 = arith.constant 0 : i32
    return %c0_i32, %arg2 : i32, i32
  }
  func.func @transform_3(%arg0: i32, %arg1: i32, %arg2: i32) -> (i32, i32, i32) {
    %c0_i32 = arith.constant 0 : i32
    return %arg0, %arg1, %arg2 : i32, i32, i32
  }
}

</mosaic_0001>

<bundles_post_ra>
// kernel: basic_conv2d_forward.1
= control target key start
LH: loop header
LB: loop body
LE: loop exit
PB: predicated region body
PF: predicated region fallthrough
CT: control target
= control target key end

     0   :  { %8 = vsyncpa [#allocation3], 0  ;;  %s9168_s0 = inlined_call_operand.vmem [shape: bf16[2,1,18,18,32], index: 0, kind: input, shape index: {}]   ;;  %s9169_s1 = inlined_call_operand.vmem [shape: bf16[9,32,128], index: 1, kind: input, shape index: {}]   ;;  %s9170_s2 = inlined_call_operand.vmem [shape: f32[1,128], index: 2, kind: input, shape index: {}]   ;;  %s9171_s3 = inlined_call_operand.hbm [shape: f32[2,256,128], index: 3, kind: output, shape index: {}]  }
   0x1   :  { %10 = vsyncpa [#allocation3 + $0x1], 0  ;;  %s6448_s12 = smov 0   ;;  %s6450_s13 = smov 0  }
   0x2   :  { %s6452_s14 = smov 0   ;;  %s6454_s15 = smov 0  }
   0x3   :  { %s6456_s16 = smov 0   ;;  %s6458_s17 = smov 0  }
   0x4 LB: > { %s5135_s18 = sadd.s32 4294967295, %s6423_s17   ;;  %s5136_s19 = sadd.s32 4294967294, %s6423_s17   ;;  %s6423_s17 = sphi %s6458_s17, %s16_s17   ;;  %s6419_s16 = sphi %s6456_s16, %s9424_s16   ;;  %s6415_s15 = sphi %s6454_s15, %s9423_s15   ;;  %s6411_s14 = sphi %s6452_s14, %s9422_s14   ;;  %s6407_s13 = sphi %s6450_s13, %s9421_s13   ;;  %s6403_s12 = sphi %s6448_s12, %s9420_s12  }
   0x5   : > { %s35_s20 = sadd.s32 1, %s6419_s16  ;;  %s124_s21 = sadd.s32 1, %s6411_s14 }
   0x6   : > { %p37_p0 = scmp.ge.s32.totalorder %s35_s20, 2  ;;  %p134_p1 = scmp.ne.s32.totalorder %s6411_s14, %s6407_s13 }
   0x7   : > { %p135_p2 = scmp.eq.s32.totalorder %s5135_s18, 1  ;;  %p140_p3 = scmp.ne.s32.totalorder %s6407_s13, %s6403_s12 }
   0x8   : > { %s9426_s20 = smov (%p37_p0, %s35_s20), 0  ;;  %p141_p5 = scmp.eq.s32.totalorder %s5136_s19, 1 }
   0x9   : > { %p6488_p4 = por %p135_p2, %p134_p1  ;;  %s117_s23 = ssub.s32 %s6419_s16, %s9426_s20 }
   0xa   : > { %p5141_p6 = scmp.ge.s32.totalorder %s6423_s17, 1  ;;  %p122_p7 = scmp.eq.s32.totalorder %s117_s23, 0 }
   0xb   : > { %p6495_p8 = por %p141_p5, %p140_p3  ;;  %p180_p9 = scmp.lt.s32.totalorder %s6423_s17, 3 }
   0xc   : > { %s6501_s25 = scalar_select %p122_p7, %s6411_s14, %s124_s21  }
   0xd   : > { %p181_p10 = pnand %p5141_p6, %p180_p9 }
   0xf   : > { %184 = sbr.rel (%p181_p10) target bundleno = 579 (0x243), region = 32 }
  0x14   : > { %v6277_v0 = vld [vmem:[%s9169_s1 + $0x18] sm:$0xff]   ;;  %p211_p11 = scmp.lt.s32.totalorder %s6415_s15, 1  ;;  %v6278_v1 = vld [vmem:[%s9169_s1 + $0x10] sm:$0xff]   ;;  %v6514_v2 = vld [vmem:[%s9169_s1 + $0x8] sm:$0xff]   ;;  %vm281_vm0 = vsmask.f32 3328 }
  0x15   : > { %6215 = vmatprep.subr.bf16.mxu1 %v6277_v0  ;;  %5891 = vmatprep.subr.bf16.mxu0 %v6277_v0  ;;  %v6519_v3 = vld [vmem:[%s9169_s1 + $0x28] sm:$0xff]   ;;  %vm282_vm1 = vsmask.f32 7440  ;;  %vm733_vm2 = vcmask 261120   ;;  %vm1292_vm4 = vcmask 1042432   ;;  %vm1293_vm5 = vcmask 1046532  }
  0x16   : > { %s212_s30 = scalar_select %p211_p11, %s6415_s15, 1  ;;  %6217 = vmatpush3.bf16.msra.mxu1 %v6277_v0  ;;  %5892 = vmatpush3.bf16.msra.mxu0 %v6277_v0  ;;  %vm6564_vm3 = vmor %vm281_vm0, %vm282_vm1 }
  0x17   : > { %6216 = vmatprep.subr.bf16.mxu1 %v6278_v1  ;;  %5893 = vmatprep.subr.bf16.mxu0 %v6278_v1  ;;  %vm6850_vm6 = vmor %vm1292_vm4, %vm1293_vm5  ;;  %s5728_s18 = sshll.u32 %s6415_s15, 12  ;;  %s6425_s28 = smov [#allocation2]  }
  0x18   : > { %s6219_s6 = smul.u32 216, %s212_s30  ;;  %s9115_s26 = scalar_lea.hbm %s9171_s3, %s5728_s18 }
  0x19   : > { %s6351_s29 = sshll.u32 %s6425_s28, 4  ;;  %s6352_s29 = int_to_ptr.vmem [resolvable:$false] %s6351_s29 }
  0x1a   : > { %s6524_s11 = scalar_lea.vmem %s9168_s0, %s6219_s6  ;;  %6218 = vmatpush3.bf16.msra.mxu1 %v6278_v1  ;;  %5894 = vmatpush3.bf16.msra.mxu0 %v6278_v1  ;;  %s6353_s30 = scalar_lea.vmem %s6352_s29, 8192 }
  0x1b   : > { %v6527_v4 = vld [vmem:[%s6524_s11] sm:$0xf]  ;;  %v6530_v5 = vld [vmem:[%s6524_s11 + $0x4] sm:$0xf]  ;;  %v6533_v6 = vld [vmem:[%s6524_s11 + $0x8] sm:$0x1]  ;;  %5927 = vmatprep.subr.bf16.mxu1 %v6514_v2  ;;  %5963 = vmatprep.subr.bf16.mxu0 %v6519_v3 }
  0x1c   : > { %v285_v7 = vshrl.u32 %v6527_v4, 16  ;;  %v288_v8 = vshll.u32 %v6527_v4, 16  ;;  %v294_v9 = vshll.u32 %v6530_v5, 16  ;;  %v298_v10 = vshrl.u32 %v6530_v5, 16  ;;  %v6540_v11 = vld [vmem:[%s6524_s11 + $0x60] sm:$0xf] }
  0x1d   : > { %v304_v12 = vshll.u32 %v6533_v6, 16  ;;  %v6546_v13 = vld [vmem:[%s6524_s11 + $0x64] sm:$0xf]  ;;  %v6549_v14 = vld [vmem:[%s6524_s11 + $0x68] sm:$0x1]  ;;  %v477_v20 = vshrl.u32 %v6540_v11, 16 }
  0x1e   : > { %v287_v15 = vrot.slane %v285_v7, 4  ;;  %v290_v16 = vrot.slane %v288_v8, 5  ;;  %v296_v17 = vrot.slane %v294_v9, 5  ;;  %v300_v18 = vrot.slane %v298_v10, 4  ;;  %v6557_v27 = vld [vmem:[%s6524_s11 + $0xc] sm:$0xf] }
  0x1f   : > { %v306_v19 = vrot.slane %v304_v12, 5  ;;  %v480_v21 = vshll.u32 %v6540_v11, 16  ;;  %v486_v22 = vshll.u32 %v6546_v13, 16  ;;  %v490_v25 = vshrl.u32 %v6546_v13, 16  ;;  %v6560_v28 = vld [vmem:[%s6524_s11 + $0x10] sm:$0xf] }
  0x20   : > { %v291_v23 = vor.u32 %v290_v16, %v287_v15  ;;  %v301_v24 = vor.u32 %v300_v18, %v296_v17  ;;  %v496_v26 = vshll.u32 %v6549_v14, 16  ;;  %v479_v31 = vrot.slane %v477_v20, 4  ;;  %v6570_v39 = vld [vmem:[%s6524_s11 + $0x14] sm:$0x1]  ;;  %v6581_v51 = vld [vmem:[%s6524_s11 + $0x6c] sm:$0xf] }
  0x21   : > { %v482_v32 = vrot.slane %v480_v21, 5  ;;  %v488_v33 = vrot.slane %v486_v22, 5  ;;  %v492_v36 = vrot.slane %v490_v25, 4  ;;  %v309_v40 = vshrl.u32 %v6557_v27, 16  ;;  %v6585_v56 = vld [vmem:[%s6524_s11 + $0x70] sm:$0xf] }
  0x22   : > { %v292_v34 = vrot.slane %v291_v23, 4  ;;  %v302_v35 = vrot.slane %v301_v24, 4  ;;  %v498_v37 = vrot.slane %v496_v26, 5  ;;  %v312_v41 = vshll.u32 %v6557_v27, 16  ;;  %v6593_v61 = vld [vmem:[%s6524_s11 + $0x74] sm:$0x1] }
  0x23   : > { %v483_v38 = vor.u32 %v482_v32, %v479_v31  ;;  %v318_v42 = vshll.u32 %v6560_v28, 16  ;;  %v493_v45 = vor.u32 %v492_v36, %v488_v33  ;;  %v322_v46 = vshrl.u32 %v6560_v28, 16  ;;  %v6599_v7 = vld [vmem:[%s6524_s11 + $0x18] sm:$0xf]  ;;  %v6612_v23 = vld [vmem:[%s6524_s11 + $0x20] sm:$0x1] }
  0x24   : > { %v297_v43 = vsel %vm6564_vm3, %v292_v34, %v296_v17  ;;  %v307_v44 = vsel %vm6564_vm3, %v302_v35, %v306_v19  ;;  %v311_v49 = vrot.slane %v309_v40, 4  ;;  %v314_v50 = vrot.slane %v312_v41, 5  ;;  %v6606_v19 = vld [vmem:[%s6524_s11 + $0x1c] sm:$0xf]  ;;  %v6786_v30 = vld [vmem:[%s6524_s11 + $0xac] sm:$0xf] }
  0x25   : > { %v5148_v47 = vcombine.low %v297_v43, %v307_v44  ;;  %v484_v48 = vrot.slane %v483_v38, 4  ;;  %v494_v52 = vrot.slane %v493_v45, 4  ;;  %v320_v53 = vrot.slane %v318_v42, 5  ;;  %v6282_v38 = vld [vmem:[%s9169_s1 + $0x20] sm:$0xff]   ;;  %v6626_v44 = vld [vmem:[%s6524_s11 + $0x7c] sm:$0xf] }
  0x26   : > { %v324_v54 = vrot.slane %v322_v46, 4  ;;  %v328_v55 = vshll.u32 %v6570_v39, 16  ;;  %v315_v58 = vor.u32 %v314_v50, %v311_v49  ;;  %v501_v1 = vshrl.u32 %v6581_v51, 16  ;;  %9204 = vst [vmem:[#allocation5_spill] sm:$0xff] %v6626_v44  ;;  %9212 = vst [vmem:[#allocation13_spill] sm:$0xff] %v6786_v30 }
  0x27   : > { %5895 = vmatprep.mubr.msk.bf16.mxu0 %vm733_vm2, %v5148_v47  ;;  %v489_v57 = vsel %vm6564_vm3, %v484_v48, %v488_v33  ;;  %v499_v62 = vsel %vm6564_vm3, %v494_v52, %v498_v37  ;;  %v504_v10 = vshll.u32 %v6581_v51, 16  ;;  %v510_v12 = vshll.u32 %v6585_v56, 16  ;;  %v249_v33 = vld [vmem:[%s6524_s11 + $0x78] sm:$0xf] }
  0x28   : > { %v325_v63 = vor.u32 %v324_v54, %v320_v53  ;;  %v330_v0 = vrot.slane %v328_v55, 5  ;;  %v5156_v8 = vcombine.low %v489_v57, %v499_v62  ;;  %v316_v9 = vrot.slane %v315_v58, 4  ;;  %v6631_v54 = vld [vmem:[%s6524_s11 + $0x80] sm:$0x1] }
  0x29   : > { %v503_v16 = vrot.slane %v501_v1, 4  ;;  %v514_v17 = vshrl.u32 %v6585_v56, 16  ;;  %v520_v18 = vshll.u32 %v6593_v61, 16  ;;  %v506_v21 = vrot.slane %v504_v10, 5  ;;  %9205 = vst [vmem:[#allocation6_spill] sm:$0xff] %v6631_v54 }
  0x2a   : > { %v326_v15 = vrot.slane %v325_v63, 4  ;;  %5911 = vmatprep.mubr.msk.bf16.mxu1 %vm733_vm2, %v5156_v8  ;;  %v321_v20 = vsel %vm6564_vm3, %v316_v9, %v320_v53  ;;  %v512_v22 = vrot.slane %v510_v12, 5  ;;  %v333_v24 = vshrl.u32 %v6599_v7, 16  ;;  %v6637_v63 = vld [vmem:[%s6524_s11 + $0x24] sm:$0xf] }
  0x2b   : > { %v516_v26 = vrot.slane %v514_v17, 4  ;;  %v522_v31 = vrot.slane %v520_v18, 5  ;;  %v336_v32 = vshll.u32 %v6599_v7, 16  ;;  %v507_v35 = vor.u32 %v506_v21, %v503_v16  ;;  %v6648_v10 = vld [vmem:[%s6524_s11 + $0x28] sm:$0xf]  ;;  %v6281_v18 = vld [vmem:[%s9169_s1] sm:$0xff]  }
  0x2c   : > { %v331_v25 = vsel %vm6564_vm3, %v326_v15, %v330_v0  ;;  %v335_v36 = vrot.slane %v333_v24, 4  ;;  %v342_v37 = vshll.u32 %v6606_v19, 16  ;;  %v346_v42 = vshrl.u32 %v6606_v19, 16  ;;  %v6657_v24 = vld [vmem:[%s6524_s11 + $0x2c] sm:$0x1] }
  0x2d   : > { %v5149_v34 = vcombine.low %v321_v20, %v331_v25  ;;  %v517_v40 = vor.u32 %v516_v26, %v512_v22  ;;  %v338_v41 = vrot.slane %v336_v32, 5  ;;  %v352_v43 = vshll.u32 %v6612_v23, 16 }
  0x2e   : > { %v508_v45 = vrot.slane %v507_v35, 4  ;;  %v344_v46 = vrot.slane %v342_v37, 5  ;;  %v525_v47 = vshrl.u32 %v249_v33, 16  ;;  %v528_v48 = vshll.u32 %v249_v33, 16 }
  0x2f   : > { %5896 = vmatmul.mubr.msk.bf16.vlgmr.msra.gmra.mxu0 %vm733_vm2, %v5149_v34  ;;  %v518_v49 = vrot.slane %v517_v40, 4  ;;  %v339_v50 = vor.u32 %v338_v41, %v335_v36  ;;  %v348_v52 = vrot.slane %v346_v42, 4  ;;  %v354_v53 = vrot.slane %v352_v43, 5  ;;  %v6664_v34 = vld [vmem:[%s6524_s11 + $0x84] sm:$0xf] }
  0x30   : > { %5964 = vmatpush3.bf16.msra.mxu0 %v6519_v3  ;;  %v513_v55 = vsel %vm6564_vm3, %v508_v45, %v512_v22  ;;  %v527_v57 = vrot.slane %v525_v47, 4  ;;  %v530_v58 = vrot.slane %v528_v48, 5  ;;  %v534_v62 = vshll.u32 %v6626_v44, 16  ;;  %v6642_v3 = vld [vmem:[%s9169_s1 + $0x48] sm:$0xff]  }
  0x31   : > { %5965 = vmatprep.subr.bf16.mxu0 %v6282_v38  ;;  %v523_v0 = vsel %vm6564_vm3, %v518_v49, %v522_v31  ;;  %v340_v1 = vrot.slane %v339_v50, 4  ;;  %v349_v8 = vor.u32 %v348_v52, %v344_v46  ;;  %v538_v9 = vshrl.u32 %v6626_v44, 16  ;;  %v6672_v40 = vld [vmem:[%s6524_s11 + $0x88] sm:$0xf]  ;;  %v6683_v49 = vld [vmem:[%s6524_s11 + $0x8c] sm:$0x1] }
  0x32   : > { %v5157_v12 = vcombine.low %v513_v55, %v523_v0  ;;  %v531_v15 = vor.u32 %v530_v58, %v527_v57  ;;  %v536_v16 = vrot.slane %v534_v62, 5  ;;  %v544_v17 = vshll.u32 %v6631_v54, 16  ;;  %v6691_v58 = vld [vmem:[%s6524_s11 + $0x30] sm:$0xf]  ;;  %v6815_v44 = vld [vmem:[%s6524_s11 + $0x5c] sm:$0x1] }
  0x33   : > { %v345_v20 = vsel %vm6564_vm3, %v340_v1, %v344_v46  ;;  %v350_v21 = vrot.slane %v349_v8, 4  ;;  %v540_v22 = vrot.slane %v538_v9, 4  ;;  %v357_v25 = vshrl.u32 %v6637_v63, 16  ;;  %v6696_v9 = vld [vmem:[%s6524_s11 + $0x34] sm:$0xf] }
  0x34   : > { %5966 = vmatpush3.bf16.msra.mxu0 %v6282_v38  ;;  %5912 = vmatmul.mubr.msk.bf16.vlgmr.msra.gmra.mxu1 %vm733_vm2, %v5157_v12  ;;  %v532_v26 = vrot.slane %v531_v15, 4  ;;  %v546_v31 = vrot.slane %v544_v17, 5  ;;  %v360_v32 = vshll.u32 %v6637_v63, 16  ;;  %v366_v33 = vshll.u32 %v6648_v10, 16 }
  0x35   : > { %6035 = vmatprep.subr.bf16.mxu0 %v6642_v3  ;;  %5928 = vmatpush3.bf16.msra.mxu1 %v6514_v2  ;;  %v355_v35 = vsel %vm6564_vm3, %v350_v21, %v354_v53  ;;  %v541_v36 = vor.u32 %v540_v22, %v536_v16  ;;  %v359_v37 = vrot.slane %v357_v25, 4  ;;  %v370_v38 = vshrl.u32 %v6648_v10, 16  ;;  %v6679_v2 = vld [vmem:[%s9169_s1 + $0x38] sm:$0xff]  }
  0x36   : > { %v5150_v41 = vcombine.low %v345_v20, %v355_v35  ;;  %v537_v42 = vsel %vm6564_vm3, %v532_v26, %v536_v16  ;;  %v362_v43 = vrot.slane %v360_v32, 5  ;;  %v368_v45 = vrot.slane %v366_v33, 5  ;;  %5929 = vmatprep.subr.bf16.mxu1 %v6281_v18  ;;  %v6701_v25 = vld [vmem:[%s6524_s11 + $0x38] sm:$0x1]  ;;  %v6710_v35 = vld [vmem:[%s6524_s11 + $0x90] sm:$0xf] }
  0x37   : > { %v542_v46 = vrot.slane %v541_v36, 4  ;;  %v372_v47 = vrot.slane %v370_v38, 4  ;;  %v376_v48 = vshll.u32 %v6657_v24, 16  ;;  %v549_v50 = vshrl.u32 %v6664_v34, 16  ;;  %9206 = vst [vmem:[#allocation7_spill] sm:$0xff] %v6710_v35 }
  0x38   : > { %5899 = vmatprep.mubr.msk.bf16.mxu0 %vm733_vm2, %v5150_v41  ;;  %v363_v52 = vor.u32 %v362_v43, %v359_v37  ;;  %v552_v53 = vshll.u32 %v6664_v34, 16  ;;  %v558_v55 = vshll.u32 %v6672_v40, 16  ;;  %v562_v57 = vshrl.u32 %v6672_v40, 16  ;;  %v6713_v36 = vld [vmem:[%s6524_s11 + $0x94] sm:$0xf] }
  0x39   : > { %v547_v62 = vsel %vm6564_vm3, %v542_v46, %v546_v31  ;;  %v373_v0 = vor.u32 %v372_v47, %v368_v45  ;;  %v378_v1 = vrot.slane %v376_v48, 5  ;;  %v551_v8 = vrot.slane %v549_v50, 4  ;;  %5930 = vmatpush3.bf16.msra.mxu1 %v6281_v18  ;;  %v6718_v48 = vld [vmem:[%s6524_s11 + $0x98] sm:$0x1] }
  0x3a   : > { %v5158_v12 = vcombine.low %v537_v42, %v547_v62  ;;  %v364_v15 = vrot.slane %v363_v52, 4  ;;  %v554_v16 = vrot.slane %v552_v53, 5  ;;  %v560_v17 = vrot.slane %v558_v55, 5  ;;  %5999 = vmatprep.subr.bf16.mxu1 %v6679_v2  ;;  %9207 = vst [vmem:[#allocation8_spill] sm:$0xff] %v6718_v48 }
  0x3b   : > { %v374_v20 = vrot.slane %v373_v0, 4  ;;  %v564_v21 = vrot.slane %v562_v57, 4  ;;  %v568_v22 = vshll.u32 %v6683_v49, 16  ;;  %v381_v26 = vshrl.u32 %v6691_v58, 16 }
  0x3c   : > { %5915 = vmatprep.mubr.msk.bf16.mxu1 %vm733_vm2, %v5158_v12  ;;  %v369_v18 = vsel %vm6564_vm3, %v364_v15, %v368_v45  ;;  %v555_v31 = vor.u32 %v554_v16, %v551_v8  ;;  %v384_v32 = vshll.u32 %v6691_v58, 16  ;;  %v390_v33 = vshll.u32 %v6696_v9, 16  ;;  %v6729_v8 = vld [vmem:[%s6524_s11 + $0x3c] sm:$0xf] }
  0x3d   : > { %v379_v37 = vsel %vm6564_vm3, %v374_v20, %v378_v1  ;;  %v565_v38 = vor.u32 %v564_v21, %v560_v17  ;;  %v570_v41 = vrot.slane %v568_v22, 5  ;;  %v383_v42 = vrot.slane %v381_v26, 4  ;;  %v6734_v21 = vld [vmem:[%s6524_s11 + $0x40] sm:$0xf] }
  0x3e   : > { %v5151_v43 = vcombine.low %v369_v18, %v379_v37  ;;  %v556_v46 = vrot.slane %v555_v31, 4  ;;  %v386_v47 = vrot.slane %v384_v32, 5  ;;  %v392_v45 = vrot.slane %v390_v33, 5 }
  0x3f   : > { %v566_v50 = vrot.slane %v565_v38, 4  ;;  %v394_v52 = vshrl.u32 %v6696_v9, 16  ;;  %v400_v53 = vshll.u32 %v6701_v25, 16  ;;  %v573_v55 = vshrl.u32 %v6710_v35, 16 }
  0x40   : > { %5900 = vmatmul.mubr.msk.bf16.gmra.mxu0 %vm733_vm2, %v5151_v43  ;;  %v561_v57 = vsel %vm6564_vm3, %v556_v46, %v560_v17  ;;  %v387_v62 = vor.u32 %v386_v47, %v383_v42  ;;  %v576_v0 = vshll.u32 %v6710_v35, 16  ;;  %v582_v1 = vshll.u32 %v6713_v36, 16  ;;  %v6743_v42 = vld [vmem:[%s6524_s11 + $0x44] sm:$0x1]  ;;  %v6748_v47 = vld [vmem:[%s6524_s11 + $0x9c] sm:$0xf] }
  0x41   : > { %v571_v12 = vsel %vm6564_vm3, %v566_v50, %v570_v41  ;;  %v396_v15 = vrot.slane %v394_v52, 4  ;;  %v402_v16 = vrot.slane %v400_v53, 5  ;;  %v575_v20 = vrot.slane %v573_v55, 4  ;;  %9208 = vst [vmem:[#allocation9_spill] sm:$0xff] %v6748_v47  ;;  %v1245_v35 = vld [vmem:[%s6524_s11 + $0xc] sm:$0xe] }
  0x42   : > { %v5159_v22 = vcombine.low %v561_v57, %v571_v12  ;;  %v388_v26 = vrot.slane %v387_v62, 4  ;;  %v578_v17 = vrot.slane %v576_v0, 5  ;;  %v584_v18 = vrot.slane %v582_v1, 5  ;;  %v6751_v57 = vld [vmem:[%s6524_s11 + $0xa0] sm:$0xf] }
  0x43   : > { %v397_v31 = vor.u32 %v396_v15, %v392_v45  ;;  %v586_v32 = vshrl.u32 %v6713_v36, 16  ;;  %v592_v33 = vshll.u32 %v6718_v48, 16  ;;  %v405_v37 = vshrl.u32 %v6729_v8, 16  ;;  %9209 = vst [vmem:[#allocation10_spill] sm:$0xff] %v6751_v57  ;;  %v6755_v12 = vld [vmem:[%s6524_s11 + $0xa4] sm:$0x1] }
  0x44   : > { %5916 = vmatmul.mubr.msk.bf16.gmra.mxu1 %vm733_vm2, %v5159_v22  ;;  %v393_v38 = vsel %vm6564_vm3, %v388_v26, %v392_v45  ;;  %v579_v41 = vor.u32 %v578_v17, %v575_v20  ;;  %v408_v43 = vshll.u32 %v6729_v8, 16  ;;  %v414_v46 = vshll.u32 %v6734_v21, 16  ;;  %9210 = vst [vmem:[#allocation11_spill] sm:$0xff] %v6755_v12  ;;  %v6762_v17 = vld [vmem:[%s6524_s11 + $0x48] sm:$0xf] }
  0x45   : > { %v398_v50 = vrot.slane %v397_v31, 4  ;;  %v588_v52 = vrot.slane %v586_v32, 4  ;;  %v594_v53 = vrot.slane %v592_v33, 5  ;;  %v407_v55 = vrot.slane %v405_v37, 4 }
  0x46   : > { %v580_v62 = vrot.slane %v579_v41, 4  ;;  %v410_v0 = vrot.slane %v408_v43, 5  ;;  %v416_v1 = vrot.slane %v414_v46, 5  ;;  %v418_v45 = vshrl.u32 %v6734_v21, 16 }
  0x47   : > { %v403_v15 = vsel %vm6564_vm3, %v398_v50, %v402_v16  ;;  %v589_v20 = vor.u32 %v588_v52, %v584_v18  ;;  %v424_v22 = vshll.u32 %v6743_v42, 16  ;;  %v597_v26 = vshrl.u32 %v6748_v47, 16 }
  0x48   : > { %v5152_v31 = vcombine.low %v393_v38, %v403_v15  ;;  %v585_v32 = vsel %vm6564_vm3, %v580_v62, %v584_v18  ;;  %v411_v33 = vor.u32 %v410_v0, %v407_v55  ;;  %v420_v37 = vrot.slane %v418_v45, 4  ;;  %v6774_v0 = vld [vmem:[%s6524_s11 + $0x4c] sm:$0xf] }
  0x49   : > { %v590_v41 = vrot.slane %v589_v20, 4  ;;  %v426_v43 = vrot.slane %v424_v22, 5  ;;  %v599_v46 = vrot.slane %v597_v26, 4  ;;  %v600_v16 = vshll.u32 %v6748_v47, 16 }
  0x4a   : > { %5903 = vmatprep.mubr.msk.bf16.mxu0 %vm733_vm2, %v5152_v31  ;;  %v412_v50 = vrot.slane %v411_v33, 4  ;;  %v421_v52 = vor.u32 %v420_v37, %v416_v1  ;;  %v606_v60 = vshll.u32 %v6751_v57, 16  ;;  %v610_v38 = vshrl.u32 %v6751_v57, 16  ;;  %v6780_v31 = vld [vmem:[%s6524_s11 + $0x50] sm:$0x1] }
  0x4b   : > { %v595_v18 = vsel %vm6564_vm3, %v590_v41, %v594_v53  ;;  %v602_v55 = vrot.slane %v600_v16, 5  ;;  %v616_v62 = vshll.u32 %v6755_v12, 16  ;;  %v429_v45 = vshrl.u32 %v6762_v17, 16  ;;  %v6783_v33 = vld [vmem:[%s6524_s11 + $0xa8] sm:$0xf] }
  0x4c   : > { %v5160_v15 = vcombine.low %v585_v32, %v595_v18  ;;  %v417_v20 = vsel %vm6564_vm3, %v412_v50, %v416_v1  ;;  %v422_v22 = vrot.slane %v421_v52, 4  ;;  %v608_v26 = vrot.slane %v606_v60, 5  ;;  %9211 = vst [vmem:[#allocation12_spill] sm:$0xff] %v6783_v33 }
  0x4d   : > { %v603_v37 = vor.u32 %v602_v55, %v599_v46  ;;  %v612_v53 = vrot.slane %v610_v38, 4  ;;  %v618_v41 = vrot.slane %v616_v62, 5  ;;  %v431_v16 = vrot.slane %v429_v45, 4  ;;  %v6796_v55 = vld [vmem:[%s6524_s11 + $0xb0] sm:$0x1] }
  0x4e   : > { %5919 = vmatprep.mubr.msk.bf16.mxu1 %vm733_vm2, %v5160_v15  ;;  %v427_v32 = vsel %vm6564_vm3, %v422_v22, %v426_v43  ;;  %v432_v1 = vshll.u32 %v6762_v17, 16  ;;  %v438_v60 = vshll.u32 %v6774_v0, 16  ;;  %v442_v50 = vshrl.u32 %v6774_v0, 16  ;;  %9213 = vst [vmem:[#allocation14_spill] sm:$0xff] %v6796_v55  ;;  %v6800_v43 = vld [vmem:[%s6524_s11 + $0x54] sm:$0xf] }
  0x4f   : > { %v5153_v52 = vcombine.low %v417_v20, %v427_v32  ;;  %v604_v46 = vrot.slane %v603_v37, 4  ;;  %v613_v38 = vor.u32 %v612_v53, %v608_v26  ;;  %v448_v18 = vshll.u32 %v6780_v31, 16  ;;  %v6807_v53 = vld [vmem:[%s6524_s11 + $0x58] sm:$0xf] }
  0x50   : > { %v434_v62 = vrot.slane %v432_v1, 5  ;;  %v440_v45 = vrot.slane %v438_v60, 5  ;;  %v444_v15 = vrot.slane %v442_v50, 4  ;;  %v621_v59 = vshrl.u32 %v6783_v33, 16 }
  0x51   : > { %5904 = vmatmul.mubr.msk.bf16.gmra.mxu0 %vm733_vm2, %v5153_v52  ;;  %v609_v22 = vsel %vm6564_vm3, %v604_v46, %v608_v26  ;;  %v614_v54 = vrot.slane %v613_v38, 4  ;;  %v450_v20 = vrot.slane %v448_v18, 5  ;;  %v624_v37 = vshll.u32 %v6783_v33, 16 }
  0x52   : > { %v435_v32 = vor.u32 %v434_v62, %v431_v16  ;;  %v445_v12 = vor.u32 %v444_v15, %v440_v45  ;;  %v623_v1 = vrot.slane %v621_v59, 4  ;;  %v630_v60 = vshll.u32 %v6786_v30, 16 }
  0x53   : > { %v619_v50 = vsel %vm6564_vm3, %v614_v54, %v618_v41  ;;  %v626_v52 = vrot.slane %v624_v37, 5  ;;  %v634_v26 = vshrl.u32 %v6786_v30, 16  ;;  %v640_v46 = vshll.u32 %v6796_v55, 16  ;;  %v6826_v37 = vld [vmem:[%s6524_s11 + $0xb4] sm:$0xf] }
  0x54   : > { %v5161_v38 = vcombine.low %v609_v22, %v619_v50  ;;  %v436_v18 = vrot.slane %v435_v32, 4  ;;  %v446_v16 = vrot.slane %v445_v12, 4  ;;  %v632_v62 = vrot.slane %v630_v60, 5  ;;  %9214 = vst [vmem:[#allocation15_spill] sm:$0xff] %v6826_v37  ;;  %v6829_v32 = vld [vmem:[%s6524_s11 + $0xb8] sm:$0xf] }
  0x55   : > { %v627_v15 = vor.u32 %v626_v52, %v623_v1  ;;  %v636_v59 = vrot.slane %v634_v26, 4  ;;  %v642_v33 = vrot.slane %v640_v46, 5  ;;  %v453_v47 = vshrl.u32 %v6800_v43, 16 }
  0x56   : > { %5920 = vmatmul.mubr.msk.bf16.gmra.mxu1 %vm733_vm2, %v5161_v38  ;;  %v441_v54 = vsel %vm6564_vm3, %v436_v18, %v440_v45  ;;  %v451_v41 = vsel %vm6564_vm3, %v446_v16, %v450_v20  ;;  %v456_v22 = vshll.u32 %v6800_v43, 16  ;;  %v462_v12 = vshll.u32 %v6807_v53, 16  ;;  %v6834_v20 = vld [vmem:[%s6524_s11 + $0xbc] sm:$0x1] }
  0x57   : > { %v5154_v1 = vcombine.low %v441_v54, %v451_v41  ;;  %v628_v60 = vrot.slane %v627_v15, 4  ;;  %v637_v50 = vor.u32 %v636_v59, %v632_v62  ;;  %v455_v52 = vrot.slane %v453_v47, 4 }
  0x58   : > { %v458_v26 = vrot.slane %v456_v22, 5  ;;  %v464_v46 = vrot.slane %v462_v12, 5  ;;  %v466_v45 = vshrl.u32 %v6807_v53, 16  ;;  %v472_v38 = vshll.u32 %v6815_v44, 16  ;;  %v1244_v12 = vld [vmem:[%s6524_s11] sm:$0xe] }
  0x59   : > { %5907 = vmatprep.mubr.msk.bf16.mxu0 %vm733_vm2, %v5154_v1  ;;  %v633_v18 = vsel %vm6564_vm3, %v628_v60, %v632_v62  ;;  %v638_v16 = vrot.slane %v637_v50, 4  ;;  %v645_v15 = vshrl.u32 %v6826_v37, 16  ;;  %v648_v59 = vshll.u32 %v6826_v37, 16 }
  0x5a   : > { %v459_v47 = vor.u32 %v458_v26, %v455_v52  ;;  %v468_v54 = vrot.slane %v466_v45, 4  ;;  %v474_v41 = vrot.slane %v472_v38, 5  ;;  %v654_v22 = vshll.u32 %v6829_v32, 16 }
  0x5b   : > { %v643_v55 = vsel %vm6564_vm3, %v638_v16, %v642_v33  ;;  %v647_v30 = vrot.slane %v645_v15, 4  ;;  %v650_v1 = vrot.slane %v648_v59, 5  ;;  %v658_v57 = vshrl.u32 %v6829_v32, 16 }
  0x5c   : > { %v5162_v62 = vcombine.low %v633_v18, %v643_v55  ;;  %v460_v60 = vrot.slane %v459_v47, 4  ;;  %v469_v50 = vor.u32 %v468_v54, %v464_v46  ;;  %v656_v48 = vrot.slane %v654_v22, 5  ;;  %v1246_v47 = vld [vmem:[%s6524_s11 + $0x18] sm:$0xe] }
  0x5d   : > { %v651_v37 = vor.u32 %v650_v1, %v647_v30  ;;  %v660_v52 = vrot.slane %v658_v57, 4  ;;  %v664_v26 = vshll.u32 %v6834_v20, 16  ;;  %v5216_v33 = vrot.slane %v1244_v12, 9 }
  0x5e   : > { %5923 = vmatprep.mubr.msk.bf16.mxu1 %vm733_vm2, %v5162_v62  ;;  %v465_v55 = vsel %vm6564_vm3, %v460_v60, %v464_v46  ;;  %v470_v38 = vrot.slane %v469_v50, 4  ;;  %v1297_v18 = vrot.slane %v6530_v5, 5  ;;  %v5183_v30 = vcombine.low %v6557_v27, %v6560_v28 }
  0x5f   : > { %v652_v57 = vrot.slane %v651_v37, 4  ;;  %v661_v16 = vor.u32 %v660_v52, %v656_v48  ;;  %v666_v15 = vrot.slane %v664_v26, 5  ;;  %v5217_v59 = vrot.slane %v1245_v35, 9  ;;  %v1247_v26 = vld [vmem:[%s6524_s11 + $0x24] sm:$0xe] }
  0x60   : > { %v475_v54 = vsel %vm6564_vm3, %v470_v38, %v474_v41  ;;  %v1298_v22 = vsel %vm6850_vm6, %v5216_v33, %v1297_v18  ;;  %v1299_v12 = vrot.slane %v1297_v18, 4  ;;  %v9217_v46 = vrot.slane %v6560_v28, 5 }
  0x61   : > { %v5155_v62 = vcombine.low %v465_v55, %v475_v54  ;;  %v657_v60 = vsel %vm6564_vm3, %v652_v57, %v656_v48  ;;  %v662_v37 = vrot.slane %v661_v16, 4  ;;  %v9218_v50 = vrot.slane %v6533_v6, 5 }
  0x62   : > { %v1306_v1 = vrot.slane %v9217_v46, 4  ;;  %v5184_v41 = vcombine.low %v6599_v7, %v6606_v19  ;;  %v5218_v52 = vrot.slane %v1246_v47, 9  ;;  %v5182_v55 = vcombine.low %v6527_v4, %v6530_v5  ;;  %v1248_v47 = vld [vmem:[%s6524_s11 + $0x30] sm:$0xe] }
  0x63   : > { %v1301_v35 = vsel %vm6850_vm6, %v1299_v12, %v9218_v50  ;;  %5908 = vmatmul.mubr.msk.bf16.gmra.mxu0 %vm733_vm2, %v5155_v62  ;;  %v667_v33 = vsel %vm6564_vm3, %v662_v37, %v666_v15  ;;  %v1311_v6 = vrot.slane %v6606_v19, 5  ;;  %v9219_v18 = vmov %v9217_v46 }
  0x64   : > { %v5236_v48 = vcombine.low %v1298_v22, %v1301_v35  ;;  %v5163_v38 = vcombine.low %v657_v60, %v667_v33  ;;  %v1305_v7 = vsel %vm6850_vm6, %v5217_v59, %v9219_v18  ;;  %v9220_v57 = vrot.slane %v6570_v39, 5  ;;  %v1249_v22 = vld [vmem:[%s6524_s11 + $0x3c] sm:$0xe] }
  0x65   : > { %v1314_v15 = vrot.slane %v6612_v23, 5  ;;  %v1312_v4 = vsel %vm6850_vm6, %v5218_v52, %v1311_v6  ;;  %v1313_v5 = vrot.slane %v1311_v6, 4  ;;  %v5219_v19 = vrot.slane %v1247_v26, 9  ;;  %v6296_v26 = vld [vmem:[%s9169_s1 + $0x40] sm:$0xff]   ;;  %v1251_v6 = vld [vmem:[%s6524_s11 + $0x54] sm:$0xe] }
  0x66   : > { %v1308_v16 = vsel %vm6850_vm6, %v1306_v1, %v9220_v57  ;;  %5967 = vmatprep.mubr.msk.bf16.mxu0 %vm733_vm2, %v5236_v48  ;;  %v1318_v54 = vrot.slane %v6648_v10, 5  ;;  %5924 = vmatmul.mubr.msk.bf16.gmra.mxu1 %vm733_vm2, %v5163_v38  ;;  %v1321_v39 = vrot.slane %v6657_v24, 5  ;;  %v1325_v59 = vrot.slane %v6696_v9, 5  ;;  %v1250_v1 = vld [vmem:[%s6524_s11 + $0x48] sm:$0xe] }
  0x67   : > { %5931 = vmatprep.mubr.msk.bf16.mxu1 %vm733_vm2, %v5182_v55  ;;  %v5237_v23 = vcombine.low %v1305_v7, %v1308_v16  ;;  %v1315_v12 = vsel %vm6850_vm6, %v1313_v5, %v1314_v15  ;;  %v5220_v60 = vrot.slane %v1248_v47, 9  ;;  %v1328_v37 = vrot.slane %v6701_v25, 5  ;;  %v1252_v16 = vld [vmem:[%s6524_s11 + $0x60] sm:$0xe]  ;;  %v6294_v15 = vld [vmem:[%s9169_s1 + $0x30] sm:$0xff]  }
  0x68   : > { %v1320_v46 = vrot.slane %v1318_v54, 4  ;;  %v5238_v62 = vcombine.low %v1312_v4, %v1315_v12  ;;  %v1319_v50 = vsel %vm6850_vm6, %v5219_v19, %v1318_v54  ;;  %v1327_v24 = vrot.slane %v1325_v59, 4 }
  0x69   : > { %v5221_v35 = vrot.slane %v1249_v22, 9  ;;  %v1332_v52 = vrot.slane %v6734_v21, 5  ;;  %v1335_v55 = vrot.slane %v6743_v42, 5  ;;  %v5222_v48 = vrot.slane %v1250_v1, 9  ;;  %v1255_v1 = vld [vmem:[%s6524_s11 + $0x84] sm:$0xe] }
  0x6a   : > { %v1322_v33 = vsel %vm6850_vm6, %v1320_v46, %v1321_v39  ;;  %v1339_v25 = vrot.slane %v6774_v0, 5  ;;  %v1342_v18 = vrot.slane %v6780_v31, 5  ;;  %v5185_v7 = vcombine.low %v6637_v63, %v6648_v10  ;;  %v6938_v63 = vld [vmem:[%s9169_s1 + $0x68] sm:$0xff]  }
  0x6b   : > { %5968 = vmatmul.mubr.msk.bf16.vlgmr.msra.gmra.mxu0 %vm733_vm2, %v5237_v23  ;;  %v1334_v38 = vrot.slane %v1332_v52, 4  ;;  %v1326_v57 = vsel %vm6850_vm6, %v5220_v60, %v1325_v59  ;;  %v5239_v47 = vcombine.low %v1319_v50, %v1322_v33  ;;  %v1329_v31 = vsel %vm6850_vm6, %v1327_v24, %v1328_v37  ;;  %v6979_v46 = vld [vmem:[%s6524_s11 + $0x6c] sm:$0xe]  ;;  %v6996_v24 = vld [vmem:[%s6524_s11 + $0x78] sm:$0xe] }
  0x6c   : > { %6036 = vmatpush3.bf16.msra.mxu0 %v6642_v3  ;;  %5971 = vmatprep.mubr.msk.bf16.mxu0 %vm733_vm2, %v5238_v62  ;;  %v1341_v42 = vrot.slane %v1339_v25, 4  ;;  %v6932_v3 = vsel %vm6850_vm6, %v5221_v35, %v1332_v52  ;;  %v1346_v4 = vrot.slane %v6807_v53, 5  ;;  %v6950_v5 = vsel %vm6850_vm6, %v5222_v48, %v1339_v25  ;;  %v7072_v33 = vld [vmem:[%s6524_s11 + $0x10] sm:$0xf] }
  0x6d   : > { %6037 = vmatprep.subr.bf16.mxu0 %v6296_v26  ;;  %v6946_v10 = vsel %vm6850_vm6, %v1334_v38, %v1335_v55  ;;  %v5223_v19 = vrot.slane %v1251_v6, 9  ;;  %v1349_v54 = vrot.slane %v6815_v44, 5  ;;  %v1353_v39 = vrot.slane %v6546_v13, 5  ;;  %v1256_v55 = vld [vmem:[%s6524_s11 + $0x90] sm:$0xe] }
  0x6e   : > { %5932 = vmatmul.mubr.msk.bf16.vlgmr.msra.gmra.mxu1 %vm733_vm2, %v5183_v30  ;;  %v6957_v27 = vsel %vm6850_vm6, %v1341_v42, %v1342_v18  ;;  %v1348_v28 = vrot.slane %v1346_v4, 4  ;;  %v5224_v30 = vrot.slane %v1252_v16, 9  ;;  %v1356_v59 = vrot.slane %v6549_v14, 5  ;;  %v1257_v18 = vld [vmem:[%s6524_s11 + $0x9c] sm:$0xe] }
  0x6f   : > { %6000 = vmatpush3.bf16.msra.mxu1 %v6679_v2  ;;  %5935 = vmatprep.mubr.msk.bf16.mxu1 %vm733_vm2, %v5184_v41  ;;  %v5186_v22 = vcombine.low %v6691_v58, %v6696_v9  ;;  %v5240_v44 = vcombine.low %v1326_v57, %v1329_v31  ;;  %v5187_v2 = vcombine.low %v6729_v8, %v6734_v21  ;;  %v6968_v41 = vld [vmem:[%s9169_s1 + $0x58] sm:$0xff]   ;;  %v1355_v52 = vrot.slane %v1353_v39, 4  ;;  %v7099_v8 = vld [vmem:[%s6524_s11 + $0x14] sm:$0x1] }
  0x70   : > { %6001 = vmatprep.subr.bf16.mxu1 %v6294_v15  ;;  %6038 = vmatpush3.bf16.msra.mxu0 %v6296_v26  ;;  %v5241_v23 = vcombine.low %v6932_v3, %v6946_v10  ;;  %v5188_v12 = vcombine.low %v6762_v17, %v6774_v0  ;;  %v5189_v58 = vcombine.low %v6800_v43, %v6807_v53  ;;  %v1360_v26 = vrot.slane %v6585_v56, 5  ;;  %v5344_v21 = vld [vmem:[%s6524_s11 + $0x1c] sm:$0xf] }
  0x71   : > { %v5190_v9 = vcombine.low %v6540_v11, %v6546_v13  ;;  %6107 = vmatprep.subr.bf16.mxu0 %v6938_v63  ;;  %v5242_v62 = vcombine.low %v6950_v5, %v6957_v27  ;;  %v6987_v60 = vsel %vm6850_vm6, %v5223_v19, %v1346_v4  ;;  %v6991_v37 = vsel %vm6850_vm6, %v1348_v28, %v1349_v54  ;;  %v9222_v5 = vld [vmem:[#allocation8_spill] sm:$0xff]  ;;  %v9223_v19 = vld [vmem:[#allocation10_spill] sm:$0xff]  ;;  %v9224_v54 = vld [vmem:[#allocation9_spill] sm:$0xff] }
  0x72   : > { %v5191_v50 = vcombine.low %v6581_v51, %v6585_v56  ;;  %v7001_v35 = vsel %vm6850_vm6, %v5224_v30, %v1353_v39  ;;  %v5225_v48 = vrot.slane %v6979_v46, 9  ;;  %v5227_v25 = vrot.slane %v1255_v1, 9  ;;  %v1258_v30 = vld [vmem:[%s6524_s11 + $0xa8] sm:$0xe]  ;;  %v5340_v27 = vld [vmem:[%s6524_s11 + $0xc] sm:$0xf] }
  0x73   : > { %5972 = vmatmul.mubr.msk.bf16.gmra.mxu0 %vm733_vm2, %v5239_v47  ;;  %6002 = vmatpush3.bf16.msra.mxu1 %v6294_v15  ;;  %v1374_v6 = vrot.slane %v6672_v40, 5  ;;  %v1377_v38 = vrot.slane %v6683_v49, 5  ;;  %v5243_v57 = vcombine.low %v6987_v60, %v6991_v37  ;;  %v1363_v42 = vrot.slane %v6593_v61, 5  ;;  %v9221_v15 = vld [vmem:[#allocation7_spill] sm:$0xff]  ;;  %v5343_v1 = vld [vmem:[%s6524_s11 + $0x18] sm:$0xf] }
  0x74   : > { %5975 = vmatprep.mubr.msk.bf16.mxu0 %vm733_vm2, %v5240_v44  ;;  %6071 = vmatprep.subr.bf16.mxu1 %v6968_v41  ;;  %v5226_v16 = vrot.slane %v6996_v24, 9  ;;  %v5228_v3 = vrot.slane %v1256_v55, 9  ;;  %v1381_v4 = vrot.slane %v6713_v36, 5  ;;  %v1362_v10 = vrot.slane %v1360_v26, 4  ;;  %v9226_v55 = vld [vmem:[#allocation11_spill] sm:$0xff] }
  0x75   : > { %v7022_v31 = vsel %vm6850_vm6, %v5227_v25, %v1374_v6  ;;  %v1376_v49 = vrot.slane %v1374_v6, 4  ;;  %v1384_v61 = vrot.slane %v9222_v5, 5  ;;  %v5229_v28 = vrot.slane %v1257_v18, 9  ;;  %v9227_v6 = vld [vmem:[#allocation13_spill] sm:$0xff]  ;;  %v9228_v18 = vld [vmem:[#allocation12_spill] sm:$0xff] }
  0x76   : > { %5936 = vmatmul.mubr.msk.bf16.gmra.mxu1 %vm733_vm2, %v5185_v7  ;;  %v9225_v7 = vld [vmem:[#allocation5_spill] sm:$0xff]  ;;  %v7037_v46 = vsel %vm6850_vm6, %v5228_v3, %v1381_v4  ;;  %v1388_v24 = vrot.slane %v9223_v19, 5  ;;  %v1391_v25 = vrot.slane %v9226_v55, 5  ;;  %v1395_v3 = vrot.slane %v9227_v6, 5 }
  0x77   : > { %5939 = vmatprep.mubr.msk.bf16.mxu1 %vm733_vm2, %v5186_v22  ;;  %v1367_v39 = vrot.slane %v9225_v7, 5  ;;  %v7033_v44 = vsel %vm6850_vm6, %v1376_v49, %v1377_v38  ;;  %v1383_v22 = vrot.slane %v1381_v4, 4  ;;  %v5230_v49 = vrot.slane %v1258_v30, 9  ;;  %v9229_v7 = vld [vmem:[#allocation14_spill] sm:$0xff] }
  0x78   : > { %v1398_v4 = vrot.slane %v9229_v7, 5  ;;  %v7057_v5 = vsel %vm6850_vm6, %v5229_v28, %v1388_v24  ;;  %v1390_v47 = vrot.slane %v1388_v24, 4  ;;  %v1357_v30 = vsel %vm6850_vm6, %v1355_v52, %v1356_v59 }
  0x79   : > { %v7047_v38 = vsel %vm6850_vm6, %v1383_v22, %v1384_v61  ;;  %v9230_v61 = vld [vmem:[#allocation15_spill] sm:$0xff]  ;;  %v7069_v28 = vsel %vm6850_vm6, %v5230_v49, %v1395_v3  ;;  %v1397_v24 = vrot.slane %v1395_v3, 4  ;;  %v1369_v22 = vrot.slane %v1367_v39, 4 }
  0x7a   : > { %v2136_v14 = vshrl.u32 %v5340_v27, 16  ;;  %v2139_v55 = vshll.u32 %v5340_v27, 16  ;;  %v7085_v59 = vsel %vm6850_vm6, %v5225_v48, %v1360_v26  ;;  %v7089_v52 = vsel %vm6850_vm6, %v1362_v10, %v1363_v42 }
  0x7b   : > { %5976 = vmatmul.mubr.msk.bf16.gmra.mxu0 %vm733_vm2, %v5241_v23  ;;  %v9231_v23 = vld [vmem:[#allocation6_spill] sm:$0xff]  ;;  %v7095_v27 = vsel %vm6850_vm6, %v1397_v24, %v1398_v4  ;;  %v2145_v42 = vshll.u32 %v7072_v33, 16  ;;  %v5244_v10 = vcombine.low %v7001_v35, %v1357_v30  ;;  %v1402_v49 = vrot.slane %v6829_v32, 5  ;;  %v5346_v24 = vld [vmem:[%s6524_s11 + $0x24] sm:$0xf] }
  0x7c   : > { %5979 = vmatprep.mubr.msk.bf16.mxu0 %vm733_vm2, %v5242_v62  ;;  %v1370_v7 = vrot.slane %v9231_v23, 5  ;;  %v7076_v62 = vsel %vm6850_vm6, %v1390_v47, %v1391_v25  ;;  %v1259_v25 = vld [vmem:[%s6524_s11 + $0xb4] sm:$0xe]  ;;  %v2138_v26 = vrot.slane %v2136_v14, 4  ;;  %v2141_v48 = vrot.slane %v2139_v55, 5 }
  0x7d   : > { %v2149_v3 = vshrl.u32 %v7072_v33, 16  ;;  %v2160_v4 = vshrl.u32 %v5343_v1, 16  ;;  %v5245_v17 = vcombine.low %v7085_v59, %v7089_v52  ;;  %v1368_v0 = vsel %vm6850_vm6, %v5226_v16, %v1367_v39  ;;  %v5345_v55 = vld [vmem:[%s6524_s11 + $0x20] sm:$0x1]  ;;  %v7123_v47 = vld [vmem:[%s6524_s11 + $0x28] sm:$0xf] }
  0x7e   : > { %5940 = vmatmul.mubr.msk.bf16.gmra.mxu1 %vm733_vm2, %v5187_v2  ;;  %v2163_v23 = vshll.u32 %v5343_v1, 16  ;;  %v5231_v14 = vrot.slane %v1259_v25, 9  ;;  %v7120_v2 = vrot.slane %v2145_v42, 5  ;;  %v2169_v30 = vshll.u32 %v5344_v21, 16 }
  0x7f   : > { %5943 = vmatprep.mubr.msk.bf16.mxu1 %vm733_vm2, %v5188_v12  ;;  %v1371_v12 = vsel %vm6850_vm6, %v1369_v22, %v1370_v7  ;;  %v2151_v35 = vrot.slane %v2149_v3, 4  ;;  %v1405_v16 = vrot.slane %v6834_v20, 5  ;;  %v2142_v39 = vor.u32 %v2141_v48, %v2138_v26 }
  0x80   : > { %v2155_v1 = vshll.u32 %v7099_v8, 16  ;;  %v2173_v22 = vshrl.u32 %v5344_v21, 16  ;;  %v1404_v7 = vrot.slane %v1402_v49, 4  ;;  %v2162_v59 = vrot.slane %v2160_v4, 4  ;;  %v7141_v21 = vld [vmem:[%s6524_s11 + $0x2c] sm:$0x1] }
  0x81   : > { %v2184_v52 = vshrl.u32 %v5346_v24, 16  ;;  %v2187_v25 = vshll.u32 %v5346_v24, 16  ;;  %v2165_v42 = vrot.slane %v2163_v23, 5  ;;  %v7132_v3 = vrot.slane %v2169_v30, 5 }
  0x82   : > { %v2175_v60 = vrot.slane %v2173_v22, 4  ;;  %v2179_v37 = vshll.u32 %v5345_v55, 16  ;;  %v2152_v20 = vor.u32 %v2151_v35, %v7120_v2  ;;  %v5246_v4 = vcombine.low %v1368_v0, %v1371_v12  ;;  %v5352_v0 = vld [vmem:[%s6524_s11 + $0x3c] sm:$0xf] }
  0x83   : > { %5980 = vmatmul.mubr.msk.bf16.gmra.mxu0 %vm733_vm2, %v5243_v57  ;;  %v5349_v57 = vld [vmem:[%s6524_s11 + $0x30] sm:$0xf]  ;;  %v2186_v26 = vrot.slane %v2184_v52, 4  ;;  %v2189_v48 = vrot.slane %v2187_v25, 5  ;;  %v7148_v55 = vrot.slane %v2142_v39, 4  ;;  %v7150_v43 = vrot.slane %v2155_v1, 5 }
  0x84   : > { %5983 = vmatprep.mubr.msk.bf16.mxu0 %vm733_vm2, %v5244_v10  ;;  %v2193_v10 = vshll.u32 %v7123_v47, 16  ;;  %v2197_v53 = vshrl.u32 %v7123_v47, 16  ;;  %v7158_v23 = vsel %vm6850_vm6, %v5231_v14, %v1402_v49  ;;  %v7162_v11 = vsel %vm6850_vm6, %v1404_v7, %v1405_v16  ;;  %v7170_v14 = vld [vmem:[%s6524_s11 + $0x40] sm:$0xf]  ;;  %v6343_v16 = vld [vmem:[%s6524_s11 + $0x78] sm:$0xf] }
  0x85   : > { %v2166_v12 = vor.u32 %v2165_v42, %v2162_v59  ;;  %v2176_v24 = vor.u32 %v2175_v60, %v7132_v3  ;;  %v2190_v35 = vor.u32 %v2189_v48, %v2186_v26  ;;  %v2153_v39 = vrot.slane %v2152_v20, 4  ;;  %v6344_v7 = vld [vmem:[%s6524_s11 + $0x7c] sm:$0xf] }
  0x86   : > { %5944 = vmatmul.mubr.msk.bf16.gmra.mxu1 %vm733_vm2, %v5189_v58  ;;  %v7154_v58 = vld [vmem:[%s6524_s11 + $0x34] sm:$0xf]  ;;  %v7164_v13 = vrot.slane %v2193_v10, 5  ;;  %v2199_v30 = vrot.slane %v2197_v53, 4  ;;  %v2181_v1 = vrot.slane %v2179_v37, 5  ;;  %v2203_v22 = vshll.u32 %v7141_v21, 16 }
  0x87   : > { %5947 = vmatprep.mubr.msk.bf16.mxu1 %vm733_vm2, %v5190_v9  ;;  %v2208_v9 = vshrl.u32 %v5349_v57, 16  ;;  %v2211_v49 = vshll.u32 %v5349_v57, 16  ;;  %v5192_v52 = vcombine.low %v6343_v16, %v6344_v7  ;;  %v2217_v25 = vshll.u32 %v7154_v58, 16  ;;  %v7186_v10 = vld [vmem:[%s6524_s11 + $0x38] sm:$0x1] }
  0x88   : > { %v2200_v59 = vor.u32 %v2199_v30, %v7164_v13  ;;  %v2221_v42 = vshrl.u32 %v7154_v58, 16  ;;  %v5251_v60 = vcombine.low %v7158_v23, %v7162_v11  ;;  %v2167_v20 = vrot.slane %v2166_v12, 4  ;;  %v5355_v30 = vld [vmem:[%s6524_s11 + $0x48] sm:$0xf] }
  0x89   : > { %v2210_v37 = vrot.slane %v2208_v9, 4  ;;  %v2213_v57 = vrot.slane %v2211_v49, 5  ;;  %v2177_v26 = vrot.slane %v2176_v24, 4  ;;  %v2191_v48 = vrot.slane %v2190_v35, 4 }
  0x8a   : > { %v2232_v53 = vshrl.u32 %v5352_v0, 16  ;;  %v2223_v16 = vrot.slane %v2221_v42, 4  ;;  %v2201_v9 = vrot.slane %v2200_v59, 4  ;;  %v2205_v12 = vrot.slane %v2203_v22, 5  ;;  %v7212_v59 = vld [vmem:[%s6524_s11 + $0x4c] sm:$0xf] }
  0x8b   : > { %5984 = vmatmul.mubr.msk.bf16.gmra.mxu0 %vm733_vm2, %v5245_v17  ;;  %v2148_v17 = vsel %vm6564_vm3, %v7148_v55, %v7120_v2  ;;  %v2235_v2 = vshll.u32 %v5352_v0, 16  ;;  %v2241_v55 = vshll.u32 %v7170_v14, 16  ;;  %v2245_v35 = vshrl.u32 %v7170_v14, 16 }
  0x8c   : > { %5987 = vmatprep.mubr.msk.bf16.mxu0 %vm733_vm2, %v5246_v4  ;;  %v7193_v4 = vrot.slane %v2217_v25, 5  ;;  %v2234_v24 = vrot.slane %v2232_v53, 4  ;;  %v2158_v51 = vsel %vm6564_vm3, %v2153_v39, %v7150_v43  ;;  %v2214_v56 = vor.u32 %v2213_v57, %v2210_v37  ;;  %v5358_v57 = vld [vmem:[%s6524_s11 + $0x54] sm:$0xf] }
  0x8d   : > { %v2237_v49 = vrot.slane %v2235_v2, 5  ;;  %v7204_v7 = vrot.slane %v2241_v55, 5  ;;  %v2172_v0 = vsel %vm6564_vm3, %v2167_v20, %v7132_v3  ;;  %v2182_v22 = vsel %vm6564_vm3, %v2177_v26, %v2181_v1  ;;  %v5361_v2 = vld [vmem:[%s6524_s11 + $0x60] sm:$0xf] }
  0x8e   : > { %5948 = vmatmul.mubr.msk.bf16.gmra.mxu1 %vm733_vm2, %v5191_v50  ;;  %v7202_v50 = vld [vmem:[%s6524_s11 + $0x44] sm:$0x1]  ;;  %v2256_v25 = vshrl.u32 %v5355_v30, 16  ;;  %v2196_v43 = vsel %vm6564_vm3, %v2191_v48, %v7164_v13  ;;  %v2224_v39 = vor.u32 %v2223_v16, %v7193_v4  ;;  %v2227_v42 = vshll.u32 %v7186_v10, 16  ;;  %v7229_v48 = vld [vmem:[%s6524_s11 + $0x58] sm:$0xf] }
  0x8f   : > { %5951 = vmatprep.mubr.msk.bf16.mxu1 %vm733_vm2, %v5192_v52  ;;  %v2247_v52 = vrot.slane %v2245_v35, 4  ;;  %v2259_v37 = vshll.u32 %v5355_v30, 16  ;;  %v9232_v3 = vcombine.low %v7022_v31, %v7033_v44  ;;  %v2206_v1 = vsel %vm6564_vm3, %v2201_v9, %v2205_v12  ;;  %v7242_v12 = vld [vmem:[%s6524_s11 + $0x50] sm:$0x1] }
  0x90   : > { %v2238_v20 = vor.u32 %v2237_v49, %v2234_v24  ;;  %v2251_v26 = vshll.u32 %v7202_v50, 16  ;;  %v9233_v53 = vcombine.low %v7037_v46, %v7047_v38  ;;  %v2215_v30 = vrot.slane %v2214_v56, 4  ;;  %v7246_v49 = vld [vmem:[%s6524_s11 + $0x64] sm:$0xf] }
  0x91   : > { %v2248_v13 = vor.u32 %v2247_v52, %v7204_v7  ;;  %v2258_v31 = vrot.slane %v2256_v25, 4  ;;  %v2261_v44 = vrot.slane %v2259_v37, 5  ;;  %v2265_v16 = vshll.u32 %v7212_v59, 16 }
  0x92   : > { %v7237_v55 = vcombine.low %v2148_v17, %v2158_v51  ;;  %v7239_v9 = vcombine.low %v2172_v0, %v2182_v22  ;;  %v2269_v24 = vshrl.u32 %v7212_v59, 16  ;;  %v2280_v35 = vshrl.u32 %v5358_v57, 16 }
  0x93   : > { %5988 = vmatmul.mubr.msk.bf16.gmra.mxu0 %vm733_vm2, %v9232_v3  ;;  %v9234_v46 = vcombine.low %v6664_v34, %v6672_v40  ;;  %v7252_v38 = vcombine.low %v2196_v43, %v2206_v1  ;;  %v2225_v17 = vrot.slane %v2224_v39, 4  ;;  %v2229_v51 = vrot.slane %v2227_v42, 5  ;;  %v5364_v42 = vld [vmem:[%s6524_s11 + $0x6c] sm:$0xf] }
  0x94   : > { %5991 = vmatprep.mubr.msk.bf16.mxu0 %vm733_vm2, %v9233_v53  ;;  %v2283_v56 = vshll.u32 %v5358_v57, 16  ;;  %v9235_v0 = vcombine.low %v9221_v15, %v6713_v36  ;;  %v2239_v22 = vrot.slane %v2238_v20, 4  ;;  %v2249_v52 = vrot.slane %v2248_v13, 4  ;;  %v7266_v57 = vld [vmem:[%s6524_s11 + $0x5c] sm:$0x1] }
  0x95   : > { %v2253_v25 = vrot.slane %v2251_v26, 5  ;;  %v2289_v37 = vshll.u32 %v7229_v48, 16  ;;  %v2220_v34 = vsel %vm6564_vm3, %v2215_v30, %v7193_v4  ;;  %v2262_v40 = vor.u32 %v2261_v44, %v2258_v31 }
  0x96   : > { %5952 = vmatmul.mubr.msk.bf16.gmra.mxu1 %vm733_vm2, %v9234_v46  ;;  %v7262_v43 = vrot.slane %v2265_v16, 5  ;;  %v2271_v39 = vrot.slane %v2269_v24, 4  ;;  %v2282_v36 = vrot.slane %v2280_v35, 4  ;;  %v2285_v15 = vrot.slane %v2283_v56, 5  ;;  %v7285_v24 = vld [vmem:[%s6524_s11 + $0x70] sm:$0xf] }
  0x97   : > { %5955 = vmatprep.mubr.msk.bf16.mxu1 %vm733_vm2, %v9235_v0  ;;  %v2293_v3 = vshrl.u32 %v7229_v48, 16  ;;  %v2304_v1 = vshrl.u32 %v5361_v2, 16  ;;  %v2230_v20 = vsel %vm6564_vm3, %v2225_v17, %v2229_v51  ;;  %v2275_v13 = vshll.u32 %v7242_v12, 16  ;;  %v7295_v35 = vld [vmem:[%s6524_s11 + $0x68] sm:$0x1] }
  0x98   : > { %v2307_v4 = vshll.u32 %v5361_v2, 16  ;;  %v2313_v26 = vshll.u32 %v7246_v49, 16  ;;  %v9236_v53 = vcombine.low %v7057_v5, %v7076_v62  ;;  %v2244_v30 = vsel %vm6564_vm3, %v2239_v22, %v7204_v7  ;;  %v5367_v22 = vld [vmem:[%s6524_s11 + $0x78] sm:$0xf] }
  0x99   : > { %v2254_v31 = vsel %vm6564_vm3, %v2249_v52, %v2253_v25  ;;  %v7282_v44 = vrot.slane %v2289_v37, 5  ;;  %v2295_v16 = vrot.slane %v2293_v3, 4  ;;  %v9237_v2 = vcombine.low %v7069_v28, %v7095_v27 }
  0x9a   : > { %v7291_v5 = vrot.slane %v2262_v40, 4  ;;  %v2272_v62 = vor.u32 %v2271_v39, %v7262_v43  ;;  %v2306_v7 = vrot.slane %v2304_v1, 4  ;;  %v2317_v46 = vshrl.u32 %v7246_v49, 16 }
  0x9b   : > { %5992 = vmatmul.mubr.msk.bf16.gmra.mxu0 %vm733_vm2, %v9236_v53  ;;  %v7298_v17 = vcombine.low %v2220_v34, %v2230_v20  ;;  %v2286_v51 = vor.u32 %v2285_v15, %v2282_v36  ;;  %v2309_v56 = vrot.slane %v2307_v4, 5  ;;  %v2328_v0 = vshrl.u32 %v5364_v42, 16  ;;  %v7311_v34 = vld [vmem:[%s6524_s11 + $0x74] sm:$0x1]  ;;  %v7321_v15 = vld [vmem:[%s6524_s11 + $0x7c] sm:$0xf] }
  0x9c   : > { %5995 = vmatprep.mubr.msk.bf16.mxu0 %vm733_vm2, %v9237_v2  ;;  %v9238_v28 = vcombine.low %v9224_v54, %v9223_v19  ;;  %v7305_v27 = vrot.slane %v2275_v13, 5  ;;  %v2299_v52 = vshll.u32 %v7266_v57, 16  ;;  %v7308_v25 = vrot.slane %v2313_v26, 5 }
  0x9d   : > { %v2319_v37 = vrot.slane %v2317_v46, 4  ;;  %v9239_v40 = vcombine.low %v9228_v18, %v9227_v6  ;;  %v7317_v39 = vcombine.low %v2244_v30, %v2254_v31  ;;  %v2296_v19 = vor.u32 %v2295_v16, %v7282_v44 }
  0x9e   : > { %5956 = vmatmul.mubr.msk.bf16.gmra.mxu1 %vm733_vm2, %v9238_v28  ;;  %v2330_v54 = vrot.slane %v2328_v0, 4  ;;  %v2331_v36 = vshll.u32 %v5364_v42, 16  ;;  %v2268_v3 = vsel %vm6564_vm3, %v7291_v5, %v7262_v43  ;;  %v2273_v1 = vrot.slane %v2272_v62, 4  ;;  %v5370_v42 = vld [vmem:[%s6524_s11 + $0x84] sm:$0xf]  ;;  %v6303_v43 = vld [vmem:[%s6524_s11 + $0xc] sm:$0xff]  }
  0x9f   : > { %5959 = vmatprep.mubr.msk.bf16.mxu1 %vm733_vm2, %v9239_v40  ;;  %v2337_v20 = vshll.u32 %v7285_v24, 16  ;;  %v2341_v6 = vshrl.u32 %v7285_v24, 16  ;;  %v2287_v18 = vrot.slane %v2286_v51, 4  ;;  %v2310_v13 = vor.u32 %v2309_v56, %v2306_v7  ;;  %v7346_v51 = vld [vmem:[%s6524_s11 + $0x80] sm:$0x1] }
  0xa0   : > { %v2323_v4 = vshll.u32 %v7295_v35, 16  ;;  %v2333_v26 = vrot.slane %v2331_v36, 5  ;;  %v2301_v53 = vrot.slane %v2299_v52, 5  ;;  %v2320_v30 = vor.u32 %v2319_v37, %v7308_v25 }
  0xa1   : > { %v7332_v31 = vrot.slane %v2337_v20, 5  ;;  %v2352_v16 = vshrl.u32 %v5367_v22, 16  ;;  %v2297_v2 = vrot.slane %v2296_v19, 4  ;;  %v2343_v62 = vrot.slane %v2341_v6, 4  ;;  %v7373_v20 = vld [vmem:[%s6524_s11 + $0x94] sm:$0xf] }
  0xa2   : > { %v2334_v5 = vor.u32 %v2333_v26, %v2330_v54  ;;  %v2347_v7 = vshll.u32 %v7311_v34, 16  ;;  %v2278_v46 = vsel %vm6564_vm3, %v2273_v1, %v7305_v27  ;;  %v2355_v56 = vshll.u32 %v5367_v22, 16  ;;  %v5373_v54 = vld [vmem:[%s6524_s11 + $0x90] sm:$0xf]  ;;  %9242 = vst [vmem:[#allocation8_spill] sm:$0xff] %v7373_v20  ;;  %v6305_v6 = vld [vmem:[%s6524_s11 + $0x18] sm:$0xff]  }
  0xa3   : > { %5996 = vmatmul.mubr.msk.bf16.gmra.mxu0 %vm733_vm2, %v5251_v60  ;;  %v2361_v23 = vshll.u32 %v7321_v15, 16  ;;  %v2365_v11 = vshrl.u32 %v7321_v15, 16  ;;  %v7351_v60 = vld [vmem:[%s6524_s11 + $0x88] sm:$0xf]  ;;  %v2292_v0 = vsel %vm6564_vm3, %v2287_v18, %v7282_v44  ;;  %v2325_v28 = vrot.slane %v2323_v4, 5 }
  0xa4   : > { %6039 = vmatprep.mubr.msk.bf16.mxu0 %vm733_vm2, %v7237_v55  ;;  %9240 = vst [vmem:[#allocation7_spill] sm:$0xff] %v7351_v60  ;;  %v2311_v55 = vrot.slane %v2310_v13, 4  ;;  %v2344_v52 = vor.u32 %v2343_v62, %v7332_v31  ;;  %v9241_v27 = vcombine.low %v9230_v61, %v6829_v32  ;;  %v2321_v22 = vrot.slane %v2320_v30, 4  ;;  %v6316_v32 = vld [vmem:[%s9169_s1 + $0x60] sm:$0xff]   ;;  %v6314_v62 = vld [vmem:[%s9169_s1 + $0x50] sm:$0xff]  }
  0xa5   : > { %v2354_v37 = vrot.slane %v2352_v16, 4  ;;  %v2357_v40 = vrot.slane %v2355_v56, 5  ;;  %v2376_v19 = vshrl.u32 %v5370_v42, 16  ;;  %v2302_v44 = vsel %vm6564_vm3, %v2297_v2, %v2301_v53  ;;  %v6307_v2 = vld [vmem:[%s6524_s11 + $0x24] sm:$0xff]  }
  0xa6   : > { %5960 = vmatmul.mubr.msk.bf16.gmra.mxu1 %vm733_vm2, %v9241_v27  ;;  %v7365_v36 = vrot.slane %v2334_v5, 4  ;;  %v7367_v1 = vrot.slane %v2347_v7, 5  ;;  %v2379_v61 = vshll.u32 %v5370_v42, 16  ;;  %v7376_v18 = vrot.slane %v2361_v23, 5 }
  0xa7   : > { %6003 = vmatprep.mubr.msk.bf16.mxu1 %vm733_vm2, %v6303_v43  ;;  %v2367_v13 = vrot.slane %v2365_v11, 4  ;;  %v2378_v4 = vrot.slane %v2376_v19, 4  ;;  %v2385_v26 = vshll.u32 %v7351_v60, 16  ;;  %v2345_v53 = vrot.slane %v2344_v52, 4  ;;  %v7399_v52 = vld [vmem:[%s6524_s11 + $0x8c] sm:$0x1] }
  0xa8   : > { %v2371_v30 = vshll.u32 %v7346_v51, 16  ;;  %v2381_v16 = vrot.slane %v2379_v61, 5  ;;  %v2389_v43 = vshrl.u32 %v7351_v60, 16  ;;  %v2316_v42 = vsel %vm6564_vm3, %v2311_v55, %v7308_v25  ;;  %9243 = vst [vmem:[#allocation10_spill] sm:$0xff] %v7399_v52  ;;  %v7529_v60 = vld [vmem:[%s6524_s11 + $0xc8] sm:$0x1] }
  0xa9   : > { %v2326_v5 = vsel %vm6564_vm3, %v2321_v22, %v2325_v28  ;;  %v2358_v7 = vor.u32 %v2357_v40, %v2354_v37  ;;  %v7390_v56 = vrot.slane %v2385_v26, 5  ;;  %v7394_v23 = vcombine.low %v2268_v3, %v2278_v46  ;;  %v5376_v28 = vld [vmem:[%s6524_s11 + $0x9c] sm:$0xf]  ;;  %v7424_v40 = vld [vmem:[%s9169_s1 + $0x88] sm:$0xff]  }
  0xaa   : > { %v7396_v11 = vcombine.low %v2292_v0, %v2302_v44  ;;  %v2391_v25 = vrot.slane %v2389_v43, 4  ;;  %v2400_v55 = vshrl.u32 %v5373_v54, 16  ;;  %v2368_v27 = vor.u32 %v2367_v13, %v7376_v18  ;;  %9245 = vst [vmem:[#allocation5_spill] sm:$0xff] %v7424_v40 }
  0xab   : > { %6040 = vmatmul.mubr.msk.bf16.vlgmr.msra.gmra.mxu0 %vm733_vm2, %v7239_v9  ;;  %v2382_v22 = vor.u32 %v2381_v16, %v2378_v4  ;;  %v2403_v37 = vshll.u32 %v5373_v54, 16  ;;  %v2409_v9 = vshll.u32 %v7373_v20, 16  ;;  %v7407_v3 = vcombine.low %v2316_v42, %v2326_v5  ;;  %v5379_v16 = vld [vmem:[%s6524_s11 + $0xa8] sm:$0xf] }
  0xac   : > { %6108 = vmatpush3.bf16.msra.mxu0 %v6938_v63  ;;  %6043 = vmatprep.mubr.msk.bf16.mxu0 %vm733_vm2, %v7252_v38  ;;  %v2340_v46 = vsel %vm6564_vm3, %v7365_v36, %v7332_v31  ;;  %v2350_v63 = vsel %vm6564_vm3, %v2345_v53, %v7367_v1  ;;  %v7416_v0 = vrot.slane %v2371_v30, 5  ;;  %v7419_v38 = vld [vmem:[%s6524_s11 + $0xa0] sm:$0xf]  ;;  %v7427_v19 = vrot.slane %v2358_v7, 4  ;;  %v7435_v36 = vld [vmem:[%s9169_s1 + $0x78] sm:$0xff]  }
  0xad   : > { %6109 = vmatprep.subr.bf16.mxu0 %v6316_v32  ;;  %9244 = vst [vmem:[#allocation9_spill] sm:$0xff] %v7419_v38  ;;  %v2392_v31 = vor.u32 %v2391_v25, %v7390_v56  ;;  %v2395_v54 = vshll.u32 %v7399_v52, 16  ;;  %v2413_v44 = vshrl.u32 %v7373_v20, 16  ;;  %9246 = vst [vmem:[#allocation11_spill] sm:$0xff] %v7435_v36  ;;  %v7440_v1 = vld [vmem:[%s6524_s11 + $0x98] sm:$0x1] }
  0xae   : > { %6004 = vmatmul.mubr.msk.bf16.vlgmr.msra.gmra.mxu1 %vm733_vm2, %v6305_v6  ;;  %9247 = vst [vmem:[#allocation13_spill] sm:$0xff] %v7440_v1  ;;  %v2402_v61 = vrot.slane %v2400_v55, 4  ;;  %v2405_v6 = vrot.slane %v2403_v37, 5  ;;  %v2424_v13 = vshrl.u32 %v5376_v28, 16  ;;  %v2427_v4 = vshll.u32 %v5376_v28, 16  ;;  %v6308_v25 = vld [vmem:[%s6524_s11 + $0x30] sm:$0xff]  }
  0xaf   : > { %6072 = vmatpush3.bf16.msra.mxu1 %v6968_v41  ;;  %6007 = vmatprep.mubr.msk.bf16.mxu1 %vm733_vm2, %v6307_v2  ;;  %v7442_v26 = vrot.slane %v2368_v27, 4  ;;  %v7444_v53 = vrot.slane %v2382_v22, 4  ;;  %v7446_v30 = vrot.slane %v2409_v9, 5  ;;  %v2433_v41 = vshll.u32 %v7419_v38, 16  ;;  %v7452_v7 = vld [vmem:[%s6524_s11 + $0xac] sm:$0xf] }
  0xb0   : > { %6073 = vmatprep.subr.bf16.mxu1 %v6314_v62  ;;  %6110 = vmatpush3.bf16.msra.mxu0 %v6316_v32  ;;  %v2415_v43 = vrot.slane %v2413_v44, 4  ;;  %v2426_v2 = vrot.slane %v2424_v13, 4  ;;  %v2429_v42 = vrot.slane %v2427_v4, 5  ;;  %v2437_v5 = vshrl.u32 %v7419_v38, 16  ;;  %9248 = vst [vmem:[#allocation12_spill] sm:$0xff] %v7452_v7  ;;  %v6309_v22 = vld [vmem:[%s6524_s11 + $0x3c] sm:$0xff]  }
  0xb1   : > { %6179 = vmatprep.subr.bf16.mxu0 %v7424_v40  ;;  %v7456_v32 = vcombine.low %v2340_v46, %v2350_v63  ;;  %v7458_v55 = vrot.slane %v2392_v31, 4  ;;  %v7460_v28 = vrot.slane %v2395_v54, 5  ;;  %v2419_v27 = vshll.u32 %v7440_v1, 16  ;;  %v7467_v9 = vld [vmem:[%s6524_s11 + $0xa4] sm:$0x1] }
  0xb2   : > { %v2406_v37 = vor.u32 %v2405_v6, %v2402_v61  ;;  %9249 = vst [vmem:[#allocation14_spill] sm:$0xff] %v7467_v9  ;;  %v7469_v44 = vrot.slane %v2433_v41, 5  ;;  %v2439_v46 = vrot.slane %v2437_v5, 4  ;;  %v2448_v63 = vshrl.u32 %v5379_v16, 16  ;;  %v7489_v13 = vld [vmem:[%s6524_s11 + $0xb0] sm:$0x1] }
  0xb3   : > { %6044 = vmatmul.mubr.msk.bf16.gmra.mxu0 %vm733_vm2, %v7298_v17  ;;  %6074 = vmatpush3.bf16.msra.mxu1 %v6314_v62  ;;  %v2451_v62 = vshll.u32 %v5379_v16, 16  ;;  %v2457_v54 = vshll.u32 %v7452_v7, 16  ;;  %v2416_v61 = vor.u32 %v2415_v43, %v7446_v30  ;;  %v2430_v6 = vor.u32 %v2429_v42, %v2426_v2  ;;  %9250 = vst [vmem:[#allocation15_spill] sm:$0xff] %v7489_v13  ;;  %v5382_v41 = vld [vmem:[%s6524_s11 + $0xb4] sm:$0xf] }
  0xb4   : > { %6047 = vmatprep.mubr.msk.bf16.mxu0 %vm733_vm2, %v7317_v39  ;;  %6143 = vmatprep.subr.bf16.mxu1 %v7435_v36  ;;  %v2450_v4 = vrot.slane %v2448_v63, 4  ;;  %v2443_v16 = vshll.u32 %v7467_v9, 16  ;;  %v2461_v17 = vshrl.u32 %v7452_v7, 16  ;;  %v7498_v36 = vld [vmem:[%s6524_s11 + $0xb8] sm:$0xf]  ;;  %v2398_v43 = vsel %vm6564_vm3, %v7458_v55, %v7460_v28 }
  0xb5   : > { %v2453_v5 = vrot.slane %v2451_v62, 5  ;;  %v7494_v31 = vrot.slane %v2457_v54, 5  ;;  %9251 = vst [vmem:[#allocation6_spill] sm:$0xff] %v7498_v36  ;;  %v7505_v2 = vrot.slane %v2406_v37, 4  ;;  %v7507_v42 = vrot.slane %v2419_v27, 5  ;;  %v6310_v27 = vld [vmem:[%s6524_s11 + $0x48] sm:$0xff]  }
  0xb6   : > { %6008 = vmatmul.mubr.msk.bf16.gmra.mxu1 %vm733_vm2, %v6308_v25  ;;  %v2440_v25 = vor.u32 %v2439_v46, %v7469_v44  ;;  %v2463_v63 = vrot.slane %v2461_v17, 4  ;;  %v2467_v62 = vshll.u32 %v7489_v13, 16  ;;  %v7512_v54 = vld [vmem:[%s6524_s11 + $0xbc] sm:$0x1]  ;;  %v2472_v39 = vshrl.u32 %v5382_v41, 16 }
  0xb7   : > { %6011 = vmatprep.mubr.msk.bf16.mxu1 %vm733_vm2, %v6309_v22  ;;  %v2475_v22 = vshll.u32 %v5382_v41, 16  ;;  %v2417_v40 = vrot.slane %v2416_v61, 4  ;;  %v2454_v7 = vor.u32 %v2453_v5, %v2450_v4  ;;  %v2481_v9 = vshll.u32 %v7498_v36, 16  ;;  %v5385_v28 = vld [vmem:[%s6524_s11 + $0xc0] sm:$0xf]  ;;  %v6311_v41 = vld [vmem:[%s6524_s11 + $0x54] sm:$0xff]  }
  0xb8   : > { %v2485_v55 = vshrl.u32 %v7498_v36, 16  ;;  %v2431_v37 = vrot.slane %v2430_v6, 4  ;;  %v2445_v38 = vrot.slane %v2443_v16, 5  ;;  %v2464_v46 = vor.u32 %v2463_v63, %v7494_v31  ;;  %v7520_v13 = vld [vmem:[%s6524_s11 + $0xc4] sm:$0xf] }
  0xb9   : > { %v2474_v17 = vrot.slane %v2472_v39, 4  ;;  %v2477_v61 = vrot.slane %v2475_v22, 5  ;;  %v2483_v4 = vrot.slane %v2481_v9, 5  ;;  %v2491_v1 = vshll.u32 %v7512_v54, 16 }
  0xba   : > { %v2487_v5 = vrot.slane %v2485_v55, 4  ;;  %v2441_v6 = vrot.slane %v2440_v25, 4  ;;  %v2469_v16 = vrot.slane %v2467_v62, 5  ;;  %v2496_v36 = vshrl.u32 %v5385_v28, 16 }
  0xbb   : > { %6048 = vmatmul.mubr.msk.bf16.gmra.mxu0 %vm733_vm2, %v7394_v23  ;;  %v2499_v63 = vshll.u32 %v5385_v28, 16  ;;  %v2455_v39 = vrot.slane %v2454_v7, 4  ;;  %v2478_v20 = vor.u32 %v2477_v61, %v2474_v17  ;;  %v2505_v23 = vshll.u32 %v7520_v13, 16  ;;  %v6312_v61 = vld [vmem:[%s6524_s11 + $0x60] sm:$0xff]  }
  0xbc   : > { %6051 = vmatprep.mubr.msk.bf16.mxu0 %vm733_vm2, %v7396_v11  ;;  %v2488_v52 = vor.u32 %v2487_v5, %v2483_v4  ;;  %v2465_v9 = vrot.slane %v2464_v46, 4  ;;  %v2498_v22 = vrot.slane %v2496_v36, 4  ;;  %v2509_v11 = vshrl.u32 %v7520_v13, 16 }
  0xbd   : > { %v2501_v55 = vrot.slane %v2499_v63, 5  ;;  %v2479_v25 = vrot.slane %v2478_v20, 4  ;;  %v2493_v7 = vrot.slane %v2491_v1, 5  ;;  %v7535_v28 = vrot.slane %v2505_v23, 5 }
  0xbe   : > { %6012 = vmatmul.mubr.msk.bf16.gmra.mxu1 %vm733_vm2, %v6310_v27  ;;  %v2489_v62 = vrot.slane %v2488_v52, 4  ;;  %v9252_v27 = vsel %vm6564_vm3, %v7442_v26, %v7416_v0  ;;  %v9253_v36 = vsel %vm6564_vm3, %v7427_v19, %v7376_v18  ;;  %v2515_v20 = vshll.u32 %v7529_v60, 16  ;;  %v5428_v26 = vld [vmem:[%s6524_s11 + $0x24] sm:$0xe] }
  0xbf   : > { %6015 = vmatprep.mubr.msk.bf16.mxu1 %vm733_vm2, %v6311_v41  ;;  %v5401_v46 = vcombine.low %v9253_v36, %v9252_v27  ;;  %v2502_v17 = vor.u32 %v2501_v55, %v2498_v22  ;;  %v2511_v41 = vrot.slane %v2509_v11, 4  ;;  %v9254_v52 = vsel %vm6564_vm3, %v7444_v53, %v7390_v56 }
  0xc0   : > { %v5402_v1 = vcombine.low %v9254_v52, %v2398_v43  ;;  %v2412_v0 = vsel %vm6564_vm3, %v7505_v2, %v7446_v30  ;;  %v2422_v18 = vsel %vm6564_vm3, %v2417_v40, %v7507_v42  ;;  %v2436_v19 = vsel %vm6564_vm3, %v2431_v37, %v7469_v44  ;;  %v7574_v2 = vld [vmem:[%s6524_s11 + $0xc] sm:$0xe]  ;;  %v5429_v37 = vld [vmem:[%s6524_s11 + $0x30] sm:$0xe] }
  0xc1   : > { %v2446_v56 = vsel %vm6564_vm3, %v2441_v6, %v2445_v38  ;;  %v2460_v53 = vsel %vm6564_vm3, %v2455_v39, %v7494_v31  ;;  %v2470_v30 = vsel %vm6564_vm3, %v2465_v9, %v2469_v16  ;;  %v2512_v43 = vor.u32 %v2511_v41, %v7535_v28  ;;  %v6313_v40 = vld [vmem:[%s6524_s11 + $0x6c] sm:$0xff]   ;;  %v5430_v9 = vld [vmem:[%s6524_s11 + $0x3c] sm:$0xe] }
  0xc2   : > { %v2484_v44 = vsel %vm6564_vm3, %v2479_v25, %v2483_v4  ;;  %v2494_v38 = vsel %vm6564_vm3, %v2489_v62, %v2493_v7  ;;  %v7583_v42 = vrot.slane %v2502_v17, 4  ;;  %v2891_v31 = vrot.slane %v7072_v33, 5  ;;  %v5431_v25 = vld [vmem:[%s6524_s11 + $0x48] sm:$0xe]  ;;  %v6322_v33 = vld [vmem:[%s6524_s11 + $0xc0] sm:$0xff]  }
  0xc3   : > { %6052 = vmatmul.mubr.msk.bf16.gmra.mxu0 %vm733_vm2, %v7407_v3  ;;  %v7589_v5 = vcombine.low %v2412_v0, %v2422_v18  ;;  %v7591_v3 = vrot.slane %v2512_v43, 4  ;;  %v7593_v6 = vrot.slane %v2515_v20, 5  ;;  %v5444_v16 = vrot.slane %v5428_v26, 9  ;;  %v5432_v20 = vld [vmem:[%s6524_s11 + $0x54] sm:$0xe]  ;;  %v6315_v26 = vld [vmem:[%s6524_s11 + $0x78] sm:$0xff]  }
  0xc4   : > { %6055 = vmatprep.mubr.msk.bf16.mxu0 %vm733_vm2, %v7456_v32  ;;  %v7595_v4 = vcombine.low %v2436_v19, %v2446_v56  ;;  %v7597_v63 = vcombine.low %v2460_v53, %v2470_v30  ;;  %v5442_v39 = vrot.slane %v7574_v2, 9  ;;  %v2905_v23 = vrot.slane %v7123_v47, 5  ;;  %v5433_v53 = vld [vmem:[%s6524_s11 + $0x60] sm:$0xe] }
  0xc5   : > { %v7603_v32 = vcombine.low %v2484_v44, %v2494_v38  ;;  %v2894_v22 = vrot.slane %v7099_v8, 5  ;;  %v2908_v55 = vrot.slane %v7141_v21, 5  ;;  %v5445_v11 = vrot.slane %v5429_v37, 9  ;;  %v5434_v37 = vld [vmem:[%s6524_s11 + $0x6c] sm:$0xe] }
  0xc6   : > { %6016 = vmatmul.mubr.msk.bf16.gmra.mxu1 %vm733_vm2, %v6312_v61  ;;  %v2508_v47 = vsel %vm6564_vm3, %v7583_v42, %v7535_v28  ;;  %v7615_v62 = vrot.slane %v2891_v31, 4  ;;  %v7619_v7 = vsel %vm6850_vm6, %v5444_v16, %v2905_v23  ;;  %v2907_v21 = vrot.slane %v2905_v23, 4  ;;  %v6323_v42 = vld [vmem:[%s6524_s11 + $0x18] sm:$0xff]  }
  0xc7   : > { %6019 = vmatprep.mubr.msk.bf16.mxu1 %vm733_vm2, %v6313_v40  ;;  %v2518_v27 = vsel %vm6564_vm3, %v7591_v3, %v7593_v6  ;;  %v2912_v36 = vrot.slane %v7154_v58, 5  ;;  %v2915_v17 = vrot.slane %v7186_v10, 5  ;;  %v5446_v41 = vrot.slane %v5430_v9, 9  ;;  %v5435_v9 = vld [vmem:[%s6524_s11 + $0x78] sm:$0xe] }
  0xc8   : > { %v7630_v52 = vsel %vm6850_vm6, %v2907_v21, %v2908_v55  ;;  %v2919_v0 = vrot.slane %v7170_v14, 5  ;;  %v2922_v18 = vrot.slane %v7202_v50, 5  ;;  %v5447_v19 = vrot.slane %v5431_v25, 9  ;;  %v6317_v14 = vld [vmem:[%s6524_s11 + $0x84] sm:$0xff]   ;;  %v5427_v6 = vld [vmem:[%s6524_s11 + $0x18] sm:$0xe] }
  0xc9   : > { %v5464_v61 = vcombine.low %v7619_v7, %v7630_v52  ;;  %v7639_v58 = vsel %vm6850_vm6, %v5445_v11, %v2912_v36  ;;  %v2914_v10 = vrot.slane %v2912_v36, 4  ;;  %v2926_v56 = vrot.slane %v7212_v59, 5 }
  0xca   : > { %v7647_v50 = vsel %vm6850_vm6, %v5446_v41, %v2919_v0  ;;  %v2921_v30 = vrot.slane %v2919_v0, 4  ;;  %v2929_v43 = vrot.slane %v7242_v12, 5  ;;  %v5448_v40 = vrot.slane %v5432_v20, 9  ;;  %v5436_v41 = vld [vmem:[%s6524_s11 + $0x84] sm:$0xe] }
  0xcb   : > { %6056 = vmatmul.mubr.msk.bf16.gmra.mxu0 %vm733_vm2, %v5401_v46  ;;  %v7653_v44 = vsel %vm6850_vm6, %v2914_v10, %v2915_v17  ;;  %v7657_v59 = vsel %vm6850_vm6, %v5447_v19, %v2926_v56  ;;  %v2928_v46 = vrot.slane %v2926_v56, 4  ;;  %v2933_v38 = vrot.slane %v7229_v48, 5  ;;  %v5437_v56 = vld [vmem:[%s6524_s11 + $0x90] sm:$0xe] }
  0xcc   : > { %6059 = vmatprep.mubr.msk.bf16.mxu0 %vm733_vm2, %v5402_v1  ;;  %v5465_v16 = vcombine.low %v7639_v58, %v7653_v44  ;;  %v7665_v12 = vsel %vm6850_vm6, %v2921_v30, %v2922_v18  ;;  %v2936_v1 = vrot.slane %v7266_v57, 5  ;;  %v5449_v23 = vrot.slane %v5433_v53, 9  ;;  %v6318_v53 = vld [vmem:[%s6524_s11 + $0x90] sm:$0xff]  }
  0xcd   : > { %v5466_v55 = vcombine.low %v7647_v50, %v7665_v12  ;;  %v7674_v48 = vsel %vm6850_vm6, %v2928_v46, %v2929_v43  ;;  %v7678_v11 = vsel %vm6850_vm6, %v5448_v40, %v2933_v38  ;;  %v2935_v25 = vrot.slane %v2933_v38, 4  ;;  %v6319_v43 = vld [vmem:[%s6524_s11 + $0x9c] sm:$0xff]   ;;  %v9255_v38 = vld [vmem:[#allocation7_spill] sm:$0xff] }
  0xce   : > { %6020 = vmatmul.mubr.msk.bf16.gmra.mxu1 %vm733_vm2, %v6315_v26  ;;  %v5467_v57 = vcombine.low %v7657_v59, %v7674_v48  ;;  %v2940_v21 = vrot.slane %v7246_v49, 5  ;;  %v2943_v36 = vrot.slane %v7295_v35, 5  ;;  %v5450_v17 = vrot.slane %v5434_v37, 9  ;;  %v6332_v59 = vld [vmem:[%s6524_s11 + $0x6c] sm:$0xff]   ;;  %v6333_v48 = vld [vmem:[%s6524_s11 + $0x78] sm:$0xff]  }
  0xcf   : > { %6023 = vmatprep.mubr.msk.bf16.mxu1 %vm733_vm2, %v6317_v14  ;;  %v7688_v20 = vsel %vm6850_vm6, %v2935_v25, %v2936_v1  ;;  %v2947_v0 = vrot.slane %v7285_v24, 5  ;;  %v2950_v18 = vrot.slane %v7311_v34, 5  ;;  %v5451_v19 = vrot.slane %v5435_v9, 9  ;;  %v5438_v1 = vld [vmem:[%s6524_s11 + $0x9c] sm:$0xe] }
  0xd0   : > { %v7696_v49 = vsel %vm6850_vm6, %v5449_v23, %v2940_v21  ;;  %v2942_v35 = vrot.slane %v2940_v21, 4  ;;  %v2954_v10 = vrot.slane %v7321_v15, 5  ;;  %v2957_v34 = vrot.slane %v7346_v51, 5  ;;  %v9256_v23 = vld [vmem:[#allocation10_spill] sm:$0xff] }
  0xd1   : > { %v7703_v14 = vsel %vm6850_vm6, %v5450_v17, %v2947_v0  ;;  %v2949_v24 = vrot.slane %v2947_v0, 4  ;;  %v5452_v30 = vrot.slane %v5436_v41, 9  ;;  %v2961_v37 = vrot.slane %v9255_v38, 5  ;;  %v5439_v21 = vld [vmem:[%s6524_s11 + $0xa8] sm:$0xe] }
  0xd2   : > { %v7711_v40 = vsel %vm6850_vm6, %v2942_v35, %v2943_v36  ;;  %v7715_v15 = vsel %vm6850_vm6, %v5451_v19, %v2954_v10  ;;  %v2956_v46 = vrot.slane %v2954_v10, 4  ;;  %v2964_v9 = vrot.slane %v9256_v23, 5  ;;  %v9258_v35 = vld [vmem:[#allocation13_spill] sm:$0xff]  ;;  %v9260_v38 = vld [vmem:[#allocation14_spill] sm:$0xff] }
  0xd3   : > { %6060 = vmatmul.mubr.msk.bf16.gmra.mxu0 %vm733_vm2, %v7589_v5  ;;  %v7725_v5 = vsel %vm6850_vm6, %v2949_v24, %v2950_v18  ;;  %v5453_v25 = vrot.slane %v5437_v56, 9  ;;  %v2963_v41 = vrot.slane %v2961_v37, 4  ;;  %v9257_v18 = vld [vmem:[#allocation8_spill] sm:$0xff]  ;;  %v2971_v10 = vrot.slane %v9258_v35, 5  ;;  %v5440_v24 = vld [vmem:[%s6524_s11 + $0xb4] sm:$0xe] }
  0xd4   : > { %6063 = vmatprep.mubr.msk.bf16.mxu0 %vm733_vm2, %v7595_v4  ;;  %v7733_v17 = vsel %vm6850_vm6, %v2956_v46, %v2957_v34  ;;  %v7737_v4 = vsel %vm6850_vm6, %v5452_v30, %v2961_v37  ;;  %v2968_v19 = vrot.slane %v9257_v18, 5  ;;  %v5454_v56 = vrot.slane %v5438_v1, 9  ;;  %v9259_v30 = vld [vmem:[#allocation9_spill] sm:$0xff]  ;;  %v9261_v35 = vld [vmem:[#allocation12_spill] sm:$0xff]  ;;  %v6320_v36 = vld [vmem:[%s6524_s11 + $0xa8] sm:$0xff]  }
  0xd5   : > { %v7748_v34 = vsel %vm6850_vm6, %v2963_v41, %v2964_v9  ;;  %v2975_v46 = vrot.slane %v9259_v30, 5  ;;  %v5455_v37 = vrot.slane %v5439_v21, 9  ;;  %v5441_v0 = vld [vmem:[%s6524_s11 + $0xc0] sm:$0xe]  ;;  %v9262_v30 = vld [vmem:[#allocation15_spill] sm:$0xff]  ;;  %v5456_v21 = vrot.slane %v5440_v24, 9 }
  0xd6   : > { %6024 = vmatmul.mubr.msk.bf16.gmra.mxu1 %vm733_vm2, %v6318_v53  ;;  %v2978_v53 = vrot.slane %v9260_v38, 5  ;;  %v7756_v1 = vsel %vm6850_vm6, %v5453_v25, %v2968_v19  ;;  %v2970_v18 = vrot.slane %v2968_v19, 4  ;;  %v2985_v38 = vrot.slane %v9262_v30, 5 }
  0xd7   : > { %6027 = vmatprep.mubr.msk.bf16.mxu1 %vm733_vm2, %v6319_v43  ;;  %v2982_v43 = vrot.slane %v9261_v35, 5  ;;  %v7762_v9 = vsel %vm6850_vm6, %v5454_v56, %v2975_v46  ;;  %v2977_v41 = vrot.slane %v2975_v46, 4  ;;  %v9263_v35 = vld [vmem:[#allocation6_spill] sm:$0xff]  ;;  %v6321_v56 = vld [vmem:[%s6524_s11 + $0xb4] sm:$0xff]   ;;  %v2892_v3 = vsel %vm6850_vm6, %v5442_v39, %v2891_v31 }
  0xd8   : > { %v7768_v23 = vsel %vm6850_vm6, %v2970_v18, %v2971_v10  ;;  %v2989_v51 = vrot.slane %v9263_v35, 5  ;;  %v2992_v10 = vrot.slane %v7512_v54, 5  ;;  %v5457_v18 = vrot.slane %v5441_v0, 9  ;;  %v6327_v35 = vld [vmem:[%s6524_s11 + $0x30] sm:$0xff]  }
  0xd9   : > { %v7772_v25 = vsel %vm6850_vm6, %v5455_v37, %v2982_v43  ;;  %v2984_v19 = vrot.slane %v2982_v43, 4  ;;  %v7782_v46 = vsel %vm6850_vm6, %v2977_v41, %v2978_v53  ;;  %v2996_v0 = vrot.slane %v7520_v13, 5  ;;  %v6345_v41 = vld [vmem:[%s6524_s11 + $0x1c] sm:$0xf] }
  0xda   : > { %v7795_v43 = vsel %vm6850_vm6, %v5456_v21, %v2989_v51  ;;  %v2991_v53 = vrot.slane %v2989_v51, 4  ;;  %v2898_v30 = vrot.slane %v6345_v41, 5  ;;  %v2895_v28 = vsel %vm6850_vm6, %v7615_v62, %v2894_v22  ;;  %v6346_v22 = vld [vmem:[%s6524_s11 + $0x20] sm:$0x1] }
  0xdb   : > { %6064 = vmatmul.mubr.msk.bf16.gmra.mxu0 %vm733_vm2, %v7597_v63  ;;  %v7791_v63 = vsel %vm6850_vm6, %v2984_v19, %v2985_v38  ;;  %v7822_v51 = vsel %vm6850_vm6, %v5457_v18, %v2996_v0  ;;  %v5462_v8 = vcombine.low %v2892_v3, %v2895_v28  ;;  %v5443_v31 = vrot.slane %v5427_v6, 9  ;;  %v6325_v19 = vld [vmem:[%s6524_s11 + $0x24] sm:$0xff]   ;;  %v7860_v18 = vld [vmem:[%s6524_s11 + $0x1c] sm:$0xf] }
  0xdc   : > { %6067 = vmatprep.mubr.msk.bf16.mxu0 %vm733_vm2, %v7603_v32  ;;  %v2999_v32 = vrot.slane %v7529_v60, 5  ;;  %v7805_v38 = vsel %vm6850_vm6, %v2991_v53, %v2992_v10  ;;  %v5407_v60 = vcombine.low %v2508_v47, %v2518_v27  ;;  %v2900_v39 = vrot.slane %v2898_v30, 4  ;;  %v5566_v10 = vld [vmem:[%s6524_s11 + $0x18] sm:$0xf]  ;;  %v9264_v41 = vld [vmem:[#allocation5_spill] sm:$0xff] }
  0xdd   : > { %v2901_v62 = vrot.slane %v6346_v22, 5  ;;  %v2899_v27 = vsel %vm6850_vm6, %v5443_v31, %v2898_v30  ;;  %v6334_v30 = vld [vmem:[%s9169_s1 + $0x70] sm:$0xff]   ;;  %v3739_v3 = vshll.u32 %v7860_v18, 16  ;;  %v3743_v28 = vshrl.u32 %v7860_v18, 16  ;;  %v6329_v22 = vld [vmem:[%s6524_s11 + $0x48] sm:$0xff]  }
  0xde   : > { %6028 = vmatmul.mubr.msk.bf16.gmra.mxu1 %vm733_vm2, %v6320_v36  ;;  %v2998_v36 = vrot.slane %v2996_v0, 4  ;;  %v5569_v0 = vld [vmem:[%s6524_s11 + $0x24] sm:$0xf]  ;;  %v9265_v31 = vld [vmem:[#allocation11_spill] sm:$0xff] }
  0xdf   : > { %6031 = vmatprep.mubr.msk.bf16.mxu1 %vm733_vm2, %v6321_v56  ;;  %v2902_v21 = vsel %vm6850_vm6, %v2900_v39, %v2901_v62  ;;  %v6336_v56 = vld [vmem:[%s9169_s1 + $0x80] sm:$0xff]   ;;  %v3757_v6 = vshll.u32 %v5569_v0, 16 }
  0xe0   : > { %v7839_v47 = vsel %vm6850_vm6, %v2998_v36, %v2999_v32  ;;  %v5463_v53 = vcombine.low %v2899_v27, %v2902_v21  ;;  %v7865_v32 = vld [vmem:[%s6524_s11 + $0x28] sm:$0xf]  ;;  %v3733_v36 = vshll.u32 %v5566_v10, 16  ;;  %v6328_v39 = vld [vmem:[%s6524_s11 + $0x3c] sm:$0xff]  }
  0xe1   : > { %v7885_v62 = vld [vmem:[%s6524_s11 + $0x20] sm:$0x1] }
  0xe2   : > { %v3735_v21 = vrot.slane %v3733_v36, 5  ;;  %v7899_v36 = vld [vmem:[%s6524_s11 + $0x34] sm:$0xf] }
  0xe3   : > { %6068 = vmatmul.mubr.msk.bf16.gmra.mxu0 %vm733_vm2, %v5407_v60  ;;  %v3730_v60 = vshrl.u32 %v5566_v10, 16 }
  0xe4   : > { %6111 = vmatprep.mubr.msk.bf16.mxu0 %vm733_vm2, %v6323_v42  ;;  %v3754_v42 = vshrl.u32 %v5569_v0, 16  ;;  %v5572_v0 = vld [vmem:[%s6524_s11 + $0x30] sm:$0xf] }
  0xe5   : > { %v3732_v27 = vrot.slane %v3730_v60, 4  ;;  %v5571_v60 = vld [vmem:[%s6524_s11 + $0x2c] sm:$0x1] }
  0xe6   : > { %6032 = vmatmul.mubr.msk.bf16.gmra.mxu1 %vm733_vm2, %v6322_v33  ;;  %v3763_v33 = vshll.u32 %v7865_v32, 16  ;;  %v3756_v10 = vrot.slane %v3754_v42, 4  ;;  %v5652_v42 = vld [vmem:[%s6524_s11 + $0x18] sm:$0xe]  ;;  %v4495_v12 = vrot.slane %v5571_v60, 5 }
  0xe7   : > { %6075 = vmatprep.mubr.msk.bf16.mxu1 %vm733_vm2, %v5462_v8  ;;  %v3767_v8 = vshrl.u32 %v7865_v32, 16  ;;  %v5668_v44 = vrot.slane %v5652_v42, 9 }
  0xe8   : > { %v7890_v7 = vrot.slane %v3763_v33, 5  ;;  %v3781_v33 = vshll.u32 %v5572_v0, 16 }
  0xe9   : > { %v3769_v52 = vrot.slane %v3767_v8, 4 }
  0xea   : > { %v3783_v13 = vrot.slane %v3781_v33, 5 }
  0xeb   : > { %6112 = vmatmul.mubr.msk.bf16.vlgmr.msra.gmra.mxu0 %vm733_vm2, %v6325_v19  ;;  %v7887_v19 = vrot.slane %v3739_v3, 5  ;;  %v3736_v3 = vor.u32 %v3735_v21, %v3732_v27  ;;  %v3787_v27 = vshll.u32 %v7899_v36, 16  ;;  %v3791_v21 = vshrl.u32 %v7899_v36, 16 }
  0xec   : > { %6180 = vmatpush3.bf16.msra.mxu0 %v9264_v41  ;;  %6115 = vmatprep.mubr.msk.bf16.mxu0 %vm733_vm2, %v6327_v35  ;;  %v3745_v35 = vrot.slane %v3743_v28, 4  ;;  %v4485_v41 = vrot.slane %v7860_v18, 5 }
  0xed   : > { %6181 = vmatprep.subr.bf16.mxu0 %v6336_v56  ;;  %v7929_v42 = vrot.slane %v3787_v27, 5  ;;  %v5575_v27 = vld [vmem:[%s6524_s11 + $0x3c] sm:$0xf] }
  0xee   : > { %6076 = vmatmul.mubr.msk.bf16.vlgmr.msra.gmra.mxu1 %vm733_vm2, %v5463_v53  ;;  %v3759_v53 = vrot.slane %v3757_v6, 5  ;;  %v3746_v28 = vor.u32 %v3745_v35, %v7887_v19  ;;  %v3778_v6 = vshrl.u32 %v5572_v0, 16  ;;  %v3737_v0 = vrot.slane %v3736_v3, 4 }
  0xef   : > { %6144 = vmatpush3.bf16.msra.mxu1 %v9265_v31  ;;  %6079 = vmatprep.mubr.msk.bf16.mxu1 %vm733_vm2, %v5464_v61  ;;  %v7893_v61 = vpop.f32.mrf.mxu0  ;;  %v3770_v31 = vor.u32 %v3769_v52, %v7890_v7 }
  0xf0   : > { %6145 = vmatprep.subr.bf16.mxu1 %v6334_v30  ;;  %6182 = vmatpush3.bf16.msra.mxu0 %v6336_v56  ;;  %v3749_v56 = vshll.u32 %v7885_v62, 16  ;;  %v3760_v8 = vor.u32 %v3759_v53, %v3756_v10  ;;  %v4488_v10 = vrot.slane %v7885_v62, 5  ;;  %v6331_v53 = vld [vmem:[%s6524_s11 + $0x60] sm:$0xff]   ;;  %v3747_v52 = vrot.slane %v3746_v28, 4 }
  0xf1   : > { %v7920_v35 = vpop.f32.mrf.mxu0  ;;  %v3780_v2 = vrot.slane %v3778_v6, 4  ;;  %v3771_v24 = vrot.slane %v3770_v31, 4  ;;  %v3793_v62 = vrot.slane %v3791_v21, 4  ;;  %v7936_v28 = vsel %vm6850_vm6, %v5668_v44, %v4485_v41  ;;  %v7963_v21 = vld [vmem:[%s6524_s11 + $0x40] sm:$0xf] }
  0xf2   : > { %v3751_v58 = vrot.slane %v3749_v56, 5  ;;  %v3761_v54 = vrot.slane %v3760_v8, 4  ;;  %v7927_v56 = vld [vmem:[%s6524_s11 + $0x38] sm:$0x1]  ;;  %v3742_v6 = vsel %vm6564_vm3, %v3737_v0, %v7887_v19  ;;  %v3805_v44 = vshll.u32 %v5575_v27, 16 }
  0xf3   : > { %6116 = vmatmul.mubr.msk.bf16.gmra.mxu0 %vm733_vm2, %v6328_v39  ;;  %6146 = vmatpush3.bf16.msra.mxu1 %v6334_v30  ;;  %v4492_v30 = vrot.slane %v7865_v32, 5  ;;  %v3773_v39 = vshll.u32 %v5571_v60, 16  ;;  %v6330_v32 = vld [vmem:[%s6524_s11 + $0x54] sm:$0xff]   ;;  %v7932_v3 = vpop.f32.mrf.mxu0  ;;  %v5654_v60 = vld [vmem:[%s6524_s11 + $0x30] sm:$0xe]  ;;  %v3784_v31 = vor.u32 %v3783_v13, %v3780_v2  ;;  %v3794_v13 = vor.u32 %v3793_v62, %v7929_v42 }
  0xf4   : > { %6119 = vmatprep.mubr.msk.bf16.mxu0 %vm733_vm2, %v6329_v22  ;;  %v7909_v18 = vpop.f32.mrf.mxu1  ;;  %v5653_v22 = vld [vmem:[%s6524_s11 + $0x24] sm:$0xe]  ;;  %v3752_v33 = vsel %vm6564_vm3, %v3747_v52, %v3751_v58  ;;  %v5670_v2 = vrot.slane %v5654_v60, 9  ;;  %v7999_v0 = vld [vmem:[%s6524_s11 + $0x44] sm:$0x1]  ;;  %v3815_v52 = vshrl.u32 %v7963_v21, 16 }
  0xf5   : > { %9266 = vst [vmem:[#allocation7_spill] sm:$0xff] %v7909_v18  ;;  %v5669_v37 = vrot.slane %v5653_v22, 9  ;;  %v4494_v50 = vrot.slane %v4492_v30, 4  ;;  %v3775_v26 = vrot.slane %v3773_v39, 5  ;;  %v3797_v22 = vshll.u32 %v7927_v56, 16 }
  0xf6   : > { %6080 = vmatmul.mubr.msk.bf16.gmra.mxu1 %vm733_vm2, %v5465_v16  ;;  %v4487_v16 = vrot.slane %v4485_v41, 4  ;;  %v3766_v41 = vsel %vm6564_vm3, %v3761_v54, %v7890_v7  ;;  %v4499_v7 = vrot.slane %v7899_v36, 5  ;;  %v7988_v58 = vrot.slane %v3784_v31, 4 }
  0xf7   : > { %6083 = vmatprep.mubr.msk.bf16.mxu1 %vm733_vm2, %v5466_v55  ;;  %v7924_v55 = vpop.f32.mrf.mxu1  ;;  %v7954_v39 = vsel %vm6850_vm6, %v5669_v37, %v4492_v30  ;;  %v7958_v19 = vsel %vm6850_vm6, %v4494_v50, %v4495_v12  ;;  %v3776_v37 = vsel %vm6564_vm3, %v3771_v24, %v3775_v26  ;;  %v9269_v30 = vcombine.low %v7678_v11, %v7688_v20  ;;  %v5578_v24 = vld [vmem:[%s6524_s11 + $0x48] sm:$0xf]  ;;  %v7992_v20 = vld [vmem:[%s6524_s11 + $0x4c] sm:$0xf] }
  0xf8   : > { %9267 = vst [vmem:[#allocation10_spill] sm:$0xff] %v7924_v55  ;;  %v7947_v8 = vsel %vm6850_vm6, %v4487_v16, %v4488_v10  ;;  %v3802_v36 = vshrl.u32 %v5575_v27, 16  ;;  %v3811_v11 = vshll.u32 %v7963_v21, 16  ;;  %v7994_v16 = vcombine.low %v3766_v41, %v3776_v37 }
  0xf9   : > { %v7969_v54 = vpop.f32.mrf.mxu1  ;;  %v3795_v12 = vrot.slane %v3794_v13, 4  ;;  %v8006_v62 = vsel %vm6850_vm6, %v5670_v2, %v4499_v7  ;;  %v4501_v60 = vrot.slane %v4499_v7, 4  ;;  %v3826_v41 = vshrl.u32 %v5578_v24, 16  ;;  %v8016_v13 = vld [vmem:[%s6524_s11 + $0x58] sm:$0xf] }
  0xfa   : > { %9268 = vst [vmem:[#allocation8_spill] sm:$0xff] %v7969_v54  ;;  %v3835_v27 = vshll.u32 %v7992_v20, 16  ;;  %v3839_v37 = vshrl.u32 %v7992_v20, 16  ;;  %v3804_v2 = vrot.slane %v3802_v36, 4  ;;  %v3807_v7 = vrot.slane %v3805_v44, 5  ;;  %v6335_v54 = vld [vmem:[%s6524_s11 + $0x84] sm:$0xff]  }
  0xfb   : > { %6120 = vmatmul.mubr.msk.bf16.gmra.mxu0 %vm733_vm2, %v6330_v32  ;;  %v7983_v32 = vcombine.low %v3742_v6, %v3752_v33  ;;  %v8002_v50 = vpop.f32.mrf.mxu1  ;;  %v4502_v6 = vrot.slane %v7927_v56, 5  ;;  %v5581_v33 = vld [vmem:[%s6524_s11 + $0x54] sm:$0xf]  ;;  %v3790_v56 = vsel %vm6564_vm3, %v7988_v58, %v7929_v42  ;;  %v4506_v10 = vrot.slane %v7963_v21, 5 }
  0xfc   : > { %6123 = vmatprep.mubr.msk.bf16.mxu0 %vm733_vm2, %v6331_v53  ;;  %v3799_v53 = vrot.slane %v3797_v22, 5  ;;  %9270 = vst [vmem:[#allocation13_spill] sm:$0xff] %v8002_v50  ;;  %v3829_v22 = vshll.u32 %v5578_v24, 16  ;;  %v5655_v24 = vld [vmem:[%s6524_s11 + $0x3c] sm:$0xe]  ;;  %v3850_v26 = vshrl.u32 %v5581_v33, 16  ;;  %v9274_v44 = vcombine.low %v7703_v14, %v7725_v5 }
  0xfd   : > { %v3853_v50 = vshll.u32 %v5581_v33, 16  ;;  %v8036_v42 = vsel %vm6850_vm6, %v4501_v60, %v4502_v6  ;;  %v3821_v58 = vshll.u32 %v7999_v0, 16  ;;  %v3859_v36 = vshll.u32 %v8016_v13, 16  ;;  %v6337_v33 = vld [vmem:[%s6524_s11 + $0x90] sm:$0xff]  }
  0xfe   : > { %6084 = vmatmul.mubr.msk.bf16.gmra.mxu1 %vm733_vm2, %v5467_v57  ;;  %v7981_v57 = vpop.f32.mrf.mxu0  ;;  %v3863_v21 = vshrl.u32 %v8016_v13, 16  ;;  %v8050_v60 = vrot.slane %v3835_v27, 5  ;;  %v3841_v6 = vrot.slane %v3839_v37, 4  ;;  %v5671_v18 = vrot.slane %v5655_v24, 9  ;;  %v8074_v24 = vld [vmem:[%s6524_s11 + $0x5c] sm:$0x1] }
  0xff   : > { %6087 = vmatprep.mubr.msk.bf16.mxu1 %vm733_vm2, %v9269_v30  ;;  %v8023_v30 = vrot.slane %v3811_v11, 5  ;;  %v3828_v11 = vrot.slane %v3826_v41, 4  ;;  %v4509_v14 = vrot.slane %v7999_v0, 5  ;;  %v5584_v41 = vld [vmem:[%s6524_s11 + $0x60] sm:$0xf] }
 0x100   : > { %v8011_v31 = vpop.f32.mrf.mxu0  ;;  %v3877_v27 = vshll.u32 %v5584_v41, 16 }
 0x101   : > { %9271 = vst [vmem:[#allocation9_spill] sm:$0xff] %v8011_v31  ;;  %v3855_v31 = vrot.slane %v3853_v50, 5  ;;  %v3842_v50 = vor.u32 %v3841_v6, %v8050_v60  ;;  %v8090_v6 = vld [vmem:[%s6524_s11 + $0x64] sm:$0xf] }
 0x103   : > { %6124 = vmatmul.mubr.msk.bf16.gmra.mxu0 %vm733_vm2, %v6332_v59  ;;  %v3817_v59 = vrot.slane %v3815_v52, 4  ;;  %v3831_v52 = vrot.slane %v3829_v22, 5 }
 0x104   : > { %6127 = vmatprep.mubr.msk.bf16.mxu0 %vm733_vm2, %v6333_v48  ;;  %v9272_v48 = vcombine.low %v7696_v49, %v7711_v40  ;;  %v8032_v55 = vpop.f32.mrf.mxu1  ;;  %v8045_v49 = vpop.f32.mrf.mxu0  ;;  %v8048_v40 = vld [vmem:[%s6524_s11 + $0x50] sm:$0x1] }
 0x105   : > { %9273 = vst [vmem:[#allocation14_spill] sm:$0xff] %v8032_v55  ;;  %9275 = vst [vmem:[#allocation12_spill] sm:$0xff] %v8045_v49  ;;  %v3808_v55 = vor.u32 %v3807_v7, %v3804_v2  ;;  %v3818_v5 = vor.u32 %v3817_v59, %v8023_v30  ;;  %v3852_v49 = vrot.slane %v3850_v26, 4  ;;  %v3845_v37 = vshll.u32 %v8048_v40, 16  ;;  %v5656_v7 = vld [vmem:[%s6524_s11 + $0x48] sm:$0xe] }
 0x106   : > { %6088 = vmatmul.mubr.msk.bf16.gmra.mxu1 %vm733_vm2, %v9272_v48  ;;  %v3800_v48 = vsel %vm6564_vm3, %v3795_v12, %v3799_v53  ;;  %v8058_v22 = vpop.f32.mrf.mxu1  ;;  %v8063_v53 = vrot.slane %v3859_v36, 5  ;;  %v3865_v12 = vrot.slane %v3863_v21, 4  ;;  %v8066_v0 = vpop.f32.mrf.mxu0  ;;  %v3832_v26 = vor.u32 %v3831_v52, %v3828_v11 }
 0x107   : > { %6091 = vmatprep.mubr.msk.bf16.mxu1 %vm733_vm2, %v9274_v44  ;;  %v4508_v44 = vrot.slane %v4506_v10, 4  ;;  %9276 = vst [vmem:[#allocation15_spill] sm:$0xff] %v8058_v22  ;;  %v8068_v2 = vcombine.low %v3790_v56, %v3800_v48  ;;  %v4513_v59 = vrot.slane %v7992_v20, 5  ;;  %v8077_v36 = vrot.slane %v3808_v55, 4 }
 0x108   : > { %v8079_v21 = vrot.slane %v3821_v58, 5  ;;  %v3819_v56 = vrot.slane %v3818_v5, 4  ;;  %v8083_v11 = vsel %vm6850_vm6, %v5671_v18, %v4506_v10  ;;  %v3856_v52 = vor.u32 %v3855_v31, %v3852_v49  ;;  %v8096_v58 = vpop.f32.mrf.mxu1  ;;  %v6338_v31 = vld [vmem:[%s6524_s11 + $0x9c] sm:$0xff]   ;;  %v8105_v49 = vpop.f32.mrf.mxu0  ;;  %v6339_v5 = vld [vmem:[%s6524_s11 + $0xa8] sm:$0xff]  }
 0x109   : > { %v8087_v20 = vsel %vm6850_vm6, %v4508_v44, %v4509_v14  ;;  %v9277_v55 = vcombine.low %v7715_v15, %v7733_v17  ;;  %9278 = vst [vmem:[#allocation6_spill] sm:$0xff] %v8096_v58  ;;  %v5672_v48 = vrot.slane %v5656_v7, 9  ;;  %v3866_v18 = vor.u32 %v3865_v12, %v8063_v53  ;;  %9280 = vst [vmem:[#allocation5_spill] sm:$0xff] %v8105_v49 }
 0x10a   : > { %v3869_v10 = vshll.u32 %v8074_v24, 16  ;;  %v9279_v14 = vcombine.low %v7737_v4, %v7748_v34  ;;  %v3833_v15 = vrot.slane %v3832_v26, 4  ;;  %v3843_v17 = vrot.slane %v3842_v50, 4  ;;  %v8120_v50 = vpop.f32.mrf.mxu1 }
 0x10b   : > { %6128 = vmatmul.mubr.msk.bf16.gmra.mxu0 %vm733_vm2, %v6335_v54  ;;  %v3874_v54 = vshrl.u32 %v5584_v41, 16  ;;  %v4515_v44 = vrot.slane %v4513_v59, 4  ;;  %v4516_v41 = vrot.slane %v8048_v40, 5  ;;  %v3879_v12 = vrot.slane %v3877_v27, 5  ;;  %9281 = vst [vmem:[#allocation11_spill] sm:$0xff] %v8120_v50 }
 0x10c   : > { %6131 = vmatprep.mubr.msk.bf16.mxu0 %vm733_vm2, %v6337_v33  ;;  %v3847_v33 = vrot.slane %v3845_v37, 5  ;;  %v5657_v37 = vld [vmem:[%s6524_s11 + $0x54] sm:$0xe]  ;;  %v3887_v58 = vshrl.u32 %v8090_v6, 16  ;;  %v3814_v4 = vsel %vm6564_vm3, %v8077_v36, %v8023_v30  ;;  %v3824_v34 = vsel %vm6564_vm3, %v3819_v56, %v8079_v21  ;;  %v5587_v36 = vld [vmem:[%s6524_s11 + $0x6c] sm:$0xf] }
 0x10d   : > { %v3876_v7 = vrot.slane %v3874_v54, 4  ;;  %v3857_v26 = vrot.slane %v3856_v52, 4  ;;  %v4520_v40 = vrot.slane %v8016_v13, 5  ;;  %v8126_v54 = vsel %vm6850_vm6, %v5672_v48, %v4513_v59  ;;  %v8142_v48 = vld [vmem:[%s6524_s11 + $0x68] sm:$0x1] }
 0x10e   : > { %6092 = vmatmul.mubr.msk.bf16.gmra.mxu1 %vm733_vm2, %v9277_v55  ;;  %v3883_v55 = vshll.u32 %v8090_v6, 16  ;;  %v3871_v30 = vrot.slane %v3869_v10, 5  ;;  %v3838_v13 = vsel %vm6564_vm3, %v3833_v15, %v8050_v60  ;;  %v3848_v56 = vsel %vm6564_vm3, %v3843_v17, %v3847_v33  ;;  %v8150_v15 = vld [vmem:[%s6524_s11 + $0x70] sm:$0xf] }
 0x10f   : > { %6095 = vmatprep.mubr.msk.bf16.mxu1 %vm733_vm2, %v9279_v14  ;;  %v3867_v14 = vrot.slane %v3866_v18, 4  ;;  %v8139_v52 = vsel %vm6850_vm6, %v4515_v44, %v4516_v41  ;;  %v5673_v59 = vrot.slane %v5657_v37, 9  ;;  %v5658_v18 = vld [vmem:[%s6524_s11 + $0x60] sm:$0xe]  ;;  %v4523_v10 = vrot.slane %v8074_v24, 5 }
 0x110   : > { %v8147_v27 = vrot.slane %v3883_v55, 5  ;;  %v3889_v60 = vrot.slane %v3887_v58, 4  ;;  %v3862_v33 = vsel %vm6564_vm3, %v3857_v26, %v8063_v53  ;;  %v4522_v17 = vrot.slane %v4520_v40, 4 }
 0x111   : > { %v8130_v21 = vpop.f32.mrf.mxu0  ;;  %v3898_v44 = vshrl.u32 %v5587_v36, 16  ;;  %v3901_v41 = vshll.u32 %v5587_v36, 16  ;;  %v3872_v58 = vsel %vm6564_vm3, %v3867_v14, %v3871_v30  ;;  %v3893_v37 = vshll.u32 %v8142_v48, 16  ;;  %v6341_v36 = vld [vmem:[%s6524_s11 + $0xc0] sm:$0xff]  }
 0x112   : > { %9282 = vst [vmem:[#allocation16_spill] sm:$0xff] %v8130_v21  ;;  %v4527_v53 = vrot.slane %v8090_v6, 5  ;;  %v8172_v55 = vcombine.low %v3814_v4, %v3824_v34  ;;  %v8174_v26 = vcombine.low %v3838_v13, %v3848_v56  ;;  %v3907_v14 = vshll.u32 %v8150_v15, 16  ;;  %v5590_v34 = vld [vmem:[%s6524_s11 + $0x78] sm:$0xf] }
 0x113   : > { %6132 = vmatmul.mubr.msk.bf16.gmra.mxu0 %vm733_vm2, %v6338_v31  ;;  %v3880_v31 = vor.u32 %v3879_v12, %v3876_v7  ;;  %v5674_v7 = vrot.slane %v5658_v18, 9  ;;  %v9285_v12 = vcombine.low %v7762_v9, %v7782_v46  ;;  %v3911_v30 = vshrl.u32 %v8150_v15, 16  ;;  %v8196_v18 = vld [vmem:[%s6524_s11 + $0x74] sm:$0x1]  ;;  %v8199_v6 = vld [vmem:[%s6524_s11 + $0x7c] sm:$0xf] }
 0x114   : > { %6135 = vmatprep.mubr.msk.bf16.mxu0 %vm733_vm2, %v6339_v5  ;;  %v9283_v5 = vcombine.low %v7756_v1, %v7768_v23  ;;  %v6340_v23 = vld [vmem:[%s6524_s11 + $0xb4] sm:$0xff]   ;;  %v8170_v1 = vpop.f32.mrf.mxu0  ;;  %v8183_v9 = vsel %vm6850_vm6, %v5673_v59, %v4520_v40  ;;  %v3890_v4 = vor.u32 %v3889_v60, %v8147_v27  ;;  %v8189_v13 = vcombine.low %v3862_v33, %v3872_v58  ;;  %v5593_v33 = vld [vmem:[%s6524_s11 + $0x84] sm:$0xf] }
 0x115   : > { %9286 = vst [vmem:[#allocation18_spill] sm:$0xff] %v8170_v1  ;;  %v8185_v46 = vrot.slane %v3880_v31, 4  ;;  %v8193_v56 = vsel %vm6850_vm6, %v4522_v17, %v4523_v10  ;;  %v8203_v59 = vrot.slane %v3893_v37, 5  ;;  %v8207_v31 = vsel %vm6850_vm6, %v5674_v7, %v4527_v53  ;;  %v5659_v7 = vld [vmem:[%s6524_s11 + $0x6c] sm:$0xe] }
 0x116   : > { %6096 = vmatmul.mubr.msk.bf16.gmra.mxu1 %vm733_vm2, %v9283_v5  ;;  %v8159_v24 = vpop.f32.mrf.mxu1  ;;  %9287 = vst [vmem:[#allocation19_spill] sm:$0xff] %v8189_v13  ;;  %v3900_v5 = vrot.slane %v3898_v44, 4  ;;  %v4529_v60 = vrot.slane %v4527_v53, 4  ;;  %v4530_v10 = vrot.slane %v8142_v48, 5  ;;  %v8212_v17 = vpop.f32.mrf.mxu0  ;;  %v8214_v44 = vrot.slane %v3907_v14, 5 }
 0x117   : > { %9284 = vst [vmem:[#allocation17_spill] sm:$0xff] %v8159_v24  ;;  %6099 = vmatprep.mubr.msk.bf16.mxu1 %vm733_vm2, %v9285_v12  ;;  %v3903_v12 = vrot.slane %v3901_v41, 5  ;;  %9289 = vst [vmem:[#allocation21_spill] sm:$0xff] %v8212_v17  ;;  %v3913_v41 = vrot.slane %v3911_v30, 4  ;;  %v3922_v58 = vshrl.u32 %v5590_v34, 16  ;;  %v8224_v48 = vrot.slane %v3890_v4, 4 }
 0x118   : > { %v8201_v40 = vpop.f32.mrf.mxu1  ;;  %v8217_v24 = vld [vmem:[%s6524_s11 + $0x88] sm:$0xf]  ;;  %v3931_v53 = vshll.u32 %v8199_v6, 16  ;;  %v4534_v30 = vrot.slane %v8150_v15, 5  ;;  %v3949_v50 = vshll.u32 %v5593_v33, 16  ;;  %v8238_v4 = vsel %vm6850_vm6, %v4529_v60, %v4530_v10 }
 0x119   : > { %9288 = vst [vmem:[#allocation20_spill] sm:$0xff] %v8201_v40  ;;  %v3925_v40 = vshll.u32 %v5590_v34, 16  ;;  %v3904_v14 = vor.u32 %v3903_v12, %v3900_v5  ;;  %v3946_v34 = vshrl.u32 %v5593_v33, 16  ;;  %v3917_v22 = vshll.u32 %v8196_v18, 16  ;;  %v8243_v12 = vpop.f32.mrf.mxu0  ;;  %v5592_v60 = vld [vmem:[%s6524_s11 + $0x80] sm:$0x1] }
 0x11a   : > { %v8234_v37 = vpop.f32.mrf.mxu1  ;;  %v3955_v5 = vshll.u32 %v8217_v24, 16  ;;  %v3959_v15 = vshrl.u32 %v8217_v24, 16  ;;  %9292 = vst [vmem:[#allocation23_spill] sm:$0xff] %v8243_v12  ;;  %v3914_v33 = vor.u32 %v3913_v41, %v8214_v44  ;;  %v3924_v10 = vrot.slane %v3922_v58, 4  ;;  %v5660_v13 = vld [vmem:[%s6524_s11 + $0x78] sm:$0xe] }
 0x11b   : > { %6136 = vmatmul.mubr.msk.bf16.gmra.mxu0 %vm733_vm2, %v6340_v23  ;;  %v3935_v23 = vshrl.u32 %v8199_v6, 16  ;;  %9291 = vst [vmem:[#allocation22_spill] sm:$0xff] %v8234_v37  ;;  %v3927_v37 = vrot.slane %v3925_v40, 5  ;;  %v4537_v17 = vrot.slane %v8196_v18, 5  ;;  %v8253_v1 = vrot.slane %v3931_v53, 5 }
 0x11c   : > { %6139 = vmatprep.mubr.msk.bf16.mxu0 %vm733_vm2, %v6341_v36  ;;  %v9290_v36 = vcombine.low %v7772_v25, %v7791_v63  ;;  %v9293_v25 = vcombine.low %v7795_v43, %v7805_v38  ;;  %v6342_v63 = vld [vmem:[%s6524_s11 + $0xcc] sm:$0xff]   ;;  %v4541_v12 = vrot.slane %v8199_v6, 5  ;;  %v8257_v49 = vrot.slane %v3904_v14, 4  ;;  %v8259_v41 = vpop.f32.mrf.mxu1 }
 0x11d   : > { %v3937_v21 = vrot.slane %v3935_v23, 4  ;;  %v4536_v43 = vrot.slane %v4534_v30, 4  ;;  %v3948_v38 = vrot.slane %v3946_v34, 4  ;;  %9294 = vst [vmem:[#allocation24_spill] sm:$0xff] %v8259_v41  ;;  %v3896_v40 = vsel %vm6564_vm3, %v8224_v48, %v8203_v59  ;;  %v8268_v58 = vld [vmem:[%s6524_s11 + $0x8c] sm:$0x1] }
 0x11e   : > { %6100 = vmatmul.mubr.msk.bf16.gmra.mxu1 %vm733_vm2, %v9290_v36  ;;  %v5675_v36 = vrot.slane %v5659_v7, 9  ;;  %v8265_v18 = vrot.slane %v3917_v22, 5  ;;  %v8270_v7 = vrot.slane %v3955_v5, 5  ;;  %v3961_v6 = vrot.slane %v3959_v15, 4  ;;  %v5596_v41 = vld [vmem:[%s6524_s11 + $0x90] sm:$0xf] }
 0x11f   : > { %6103 = vmatprep.mubr.msk.bf16.mxu1 %vm733_vm2, %v9293_v25  ;;  %v3951_v25 = vrot.slane %v3949_v50, 5  ;;  %v3915_v50 = vrot.slane %v3914_v33, 4  ;;  %v3928_v23 = vor.u32 %v3927_v37, %v3924_v10  ;;  %v3941_v14 = vshll.u32 %v5592_v60, 16 }
 0x120   : > { %v5676_v34 = vrot.slane %v5660_v13, 9  ;;  %v9295_v22 = vcombine.low %v7936_v28, %v7947_v8  ;;  %v8282_v59 = vsel %vm6850_vm6, %v5675_v36, %v4534_v30  ;;  %v3938_v48 = vor.u32 %v3937_v21, %v8253_v1  ;;  %v8297_v30 = vld [vmem:[%s6524_s11 + $0x94] sm:$0xf] }
 0x121   : > { %v4543_v5 = vrot.slane %v4541_v12, 4  ;;  %v4544_v15 = vrot.slane %v5592_v60, 5  ;;  %v3910_v13 = vsel %vm6564_vm3, %v8257_v49, %v8214_v44  ;;  %v8293_v28 = vsel %vm6850_vm6, %v4536_v43, %v4537_v17  ;;  %v5661_v60 = vld [vmem:[%s6524_s11 + $0x84] sm:$0xe] }
 0x122   : > { %v3952_v8 = vor.u32 %v3951_v25, %v3948_v38  ;;  %v3965_v37 = vshll.u32 %v8268_v58, 16  ;;  %v9296_v21 = vcombine.low %v7822_v51, %v7839_v47  ;;  %v3962_v36 = vor.u32 %v3961_v6, %v8270_v7 }
 0x123   : > { %v8272_v53 = vpop.f32.mrf.mxu0  ;;  %6140 = vmatmul.mubr.msk.bf16.gmra.mxu0 %vm733_vm2, %v6342_v63  ;;  %v4548_v49 = vrot.slane %v8217_v24, 5  ;;  %v3970_v44 = vshrl.u32 %v5596_v41, 16  ;;  %v3973_v17 = vshll.u32 %v5596_v41, 16  ;;  %v3920_v43 = vsel %vm6564_vm3, %v3915_v50, %v8265_v18 }
 0x124   : > { %6183 = vmatprep.mubr.msk.bf16.mxu0 %vm733_vm2, %v9295_v22  ;;  %v3929_v38 = vrot.slane %v3928_v23, 4  ;;  %v3943_v51 = vrot.slane %v3941_v14, 5  ;;  %v8317_v47 = vsel %vm6850_vm6, %v5676_v34, %v4541_v12  ;;  %v3939_v24 = vrot.slane %v3938_v48, 4  ;;  %v9331_v29 = vld [vmem:[#allocation24_spill] sm:$0xff] }
 0x125   : > { %v8285_v63 = vpop.f32.mrf.mxu0  ;;  %v8323_v41 = vsel %vm6850_vm6, %v4543_v5, %v4544_v15  ;;  %v3979_v6 = vshll.u32 %v8297_v30, 16  ;;  %v3953_v18 = vrot.slane %v3952_v8, 4  ;;  %v3967_v50 = vrot.slane %v3965_v37, 5 }
 0x126   : > { %v8299_v33 = vpop.f32.mrf.mxu1  ;;  %6104 = vmatmul.mubr.msk.bf16.gmra.mxu1 %vm733_vm2, %v9296_v21  ;;  %v5677_v23 = vrot.slane %v5661_v60, 9  ;;  %v4551_v12 = vrot.slane %v8268_v58, 5  ;;  %v3963_v34 = vrot.slane %v3962_v36, 4  ;;  %v4550_v48 = vrot.slane %v4548_v49, 4 }
 0x127   : > { %v8308_v10 = vpop.f32.mrf.mxu0  ;;  %6147 = vmatprep.mubr.msk.bf16.mxu1 %vm733_vm2, %v7983_v32  ;;  %v3983_v32 = vshrl.u32 %v8297_v30, 16  ;;  %v3972_v21 = vrot.slane %v3970_v44, 4  ;;  %v3975_v5 = vrot.slane %v3973_v17, 5  ;;  %v5693_v8 = vcombine.low %v8183_v9, %v8193_v56 }
 0x128   : > { %v8319_v25 = vpop.f32.mrf.mxu1  ;;  %v9299_v58 = vsel %vm6564_vm3, %v8185_v46, %v8147_v27  ;;  %v9300_v44 = vcombine.low %v8006_v62, %v8036_v42  ;;  %v3934_v27 = vsel %vm6564_vm3, %v3929_v38, %v8253_v1  ;;  %v3944_v46 = vsel %vm6564_vm3, %v3939_v24, %v3943_v51  ;;  %v8378_v38 = vld [vmem:[%s6524_s11 + $0xa0] sm:$0xf]  ;;  %v5602_v62 = vld [vmem:[%s6524_s11 + $0xa8] sm:$0xf] }
 0x129   : > { %9297 = vst [vmem:[#allocation25_spill] sm:$0xff] %v8319_v25  ;;  %v8327_v22 = vpop.f32.mrf.mxu0  ;;  %v9298_v25 = vcombine.low %v7954_v39, %v7958_v19  ;;  %v8343_v37 = vcombine.low %v9299_v58, %v3896_v40  ;;  %v8350_v39 = vld [vmem:[%s6524_s11 + $0x98] sm:$0x1]  ;;  %v8363_v40 = vrot.slane %v3979_v6, 5  ;;  %v3985_v17 = vrot.slane %v3983_v32, 4 }
 0x12a   : > { %v8330_v14 = vpop.f32.mrf.mxu1  ;;  %v8366_v60 = vcombine.low %v3910_v13, %v3920_v43  ;;  %v3958_v42 = vsel %vm6564_vm3, %v3953_v18, %v8270_v7  ;;  %v8375_v1 = vsel %vm6850_vm6, %v5677_v23, %v4548_v49  ;;  %v3968_v13 = vsel %vm6564_vm3, %v3963_v34, %v3967_v50  ;;  %v5662_v18 = vld [vmem:[%s6524_s11 + $0x90] sm:$0xe] }
 0x12b   : > { %v5969_v15 = vpop.f32.mrf.mxu0  ;;  %6184 = vmatmul.mubr.msk.bf16.vlgmr.msra.gmra.mxu0 %vm733_vm2, %v9298_v25  ;;  %v5599_v25 = vld [vmem:[%s6524_s11 + $0x9c] sm:$0xf]  ;;  %v8386_v43 = vsel %vm6850_vm6, %v4550_v48, %v4551_v12  ;;  %v3976_v24 = vor.u32 %v3975_v5, %v3972_v21  ;;  %v3989_v7 = vshll.u32 %v8350_v39, 16  ;;  %v8392_v32 = vcombine.low %v3934_v27, %v3944_v46 }
 0x12c   : > { %v8352_v19 = vpop.f32.mrf.mxu1  ;;  %6187 = vmatprep.mubr.msk.bf16.mxu0 %vm733_vm2, %v9300_v44  ;;  %v3997_v23 = vshll.u32 %v5599_v25, 16  ;;  %v3986_v34 = vor.u32 %v3985_v17, %v8363_v40  ;;  %v4555_v12 = vrot.slane %v8297_v30, 5  ;;  %v4003_v48 = vshll.u32 %v8378_v38, 16 }
 0x12d   : > { %v1554_v58 = vpop.f32.mrf.mxu0  ;;  %v4007_v21 = vshrl.u32 %v8378_v38, 16  ;;  %v8402_v44 = vcombine.low %v3958_v42, %v3968_v13  ;;  %v3991_v17 = vrot.slane %v3989_v7, 5  ;;  %v5678_v30 = vrot.slane %v5662_v18, 9 }
 0x12e   : > { %v5933_v51 = vpop.f32.mrf.mxu1  ;;  %6148 = vmatmul.mubr.msk.bf16.vlgmr.msra.gmra.mxu1 %vm733_vm2, %v7994_v16  ;;  %v3994_v16 = vshrl.u32 %v5599_v25, 16  ;;  %v8406_v25 = vrot.slane %v3976_v24, 4  ;;  %v9301_v42 = vcombine.low %v8083_v11, %v8087_v20  ;;  %v8418_v24 = vld [vmem:[%s6524_s11 + $0xac] sm:$0xf]  ;;  %v4557_v18 = vrot.slane %v4555_v12, 4 }
 0x12f   : > { %v1126_v6 = vadd.f32 %v5933_v51, %v7893_v61  ;;  %v5970_v49 = vpop.f32.mrf.mxu0  ;;  %6151 = vmatprep.mubr.msk.bf16.mxu1 %vm733_vm2, %v8068_v2  ;;  %v4558_v51 = vrot.slane %v8350_v39, 5  ;;  %v9302_v39 = vcombine.low %v8126_v54, %v8139_v52  ;;  %v8440_v52 = vsel %vm6850_vm6, %v5678_v30, %v4555_v12 }
 0x130   : > { %v1117_v50 = vpop.f32.mrf.mxu1  ;;  %v3996_v13 = vrot.slane %v3994_v16, 4  ;;  %v8430_v16 = vld [vmem:[%s6524_s11 + $0xa4] sm:$0x1]  ;;  %v3982_v54 = vsel %vm6564_vm3, %v8406_v25, %v8363_v40  ;;  %v4562_v40 = vrot.slane %v8378_v38, 5 }
 0x131   : > { %v8399_v61 = vadd.f32 %v5969_v15, %v1126_v6  ;;  %v1118_v5 = vadd.f32 %v1117_v50, %v7920_v35  ;;  %v1557_v2 = vpop.f32.mrf.mxu0  ;;  %v3999_v6 = vrot.slane %v3997_v23, 5  ;;  %v8424_v50 = vrot.slane %v4003_v48, 5 }
 0x132   : > { %v5934_v46 = vpop.f32.mrf.mxu1  ;;  %v4018_v23 = vshrl.u32 %v5602_v62, 16  ;;  %v8455_v30 = vsel %vm6850_vm6, %v4557_v18, %v4558_v51 }
 0x133   : > { %v8410_v36 = vadd.f32 %v1554_v58, %v1118_v5  ;;  %v1129_v35 = vadd.f32 %v5934_v46, %v7932_v3  ;;  %v5973_v15 = vpop.f32.mrf.mxu0  ;;  %6188 = vmatmul.mubr.msk.bf16.gmra.mxu0 %vm733_vm2, %v9301_v42  ;;  %v3987_v58 = vrot.slane %v3986_v34, 4  ;;  %v4009_v3 = vrot.slane %v4007_v21, 4 }
 0x134   : > { %v1120_v7 = vpop.f32.mrf.mxu1  ;;  %6191 = vmatprep.mubr.msk.bf16.mxu0 %vm733_vm2, %v9302_v39  ;;  %v4021_v46 = vshll.u32 %v5602_v62, 16  ;;  %v9303_v62 = vld [vmem:[#allocation9_spill] sm:$0xff]  ;;  %v4020_v38 = vrot.slane %v4018_v23, 4 }
 0x135   : > { %v8426_v5 = vadd.f32 %v5970_v49, %v1129_v35  ;;  %v1121_v11 = vadd.f32 %v1120_v7, %v7981_v57  ;;  %v1570_v20 = vpop.f32.mrf.mxu0  ;;  %v4027_v57 = vshll.u32 %v8418_v24, 16  ;;  %v4031_v49 = vshrl.u32 %v8418_v24, 16  ;;  %v5663_v35 = vld [vmem:[%s6524_s11 + $0x9c] sm:$0xe] }
 0x136   : > { %v5937_v42 = vpop.f32.mrf.mxu1  ;;  %6152 = vmatmul.mubr.msk.bf16.gmra.mxu1 %vm733_vm2, %v8172_v55  ;;  %v4000_v55 = vor.u32 %v3999_v6, %v3996_v13  ;;  %v3992_v12 = vsel %vm6564_vm3, %v3987_v58, %v3991_v17  ;;  %v4013_v7 = vshll.u32 %v8430_v16, 16  ;;  %v4023_v6 = vrot.slane %v4021_v46, 5 }
 0x137   : > { %v8444_v34 = vadd.f32 %v1557_v2, %v1121_v11  ;;  %v1142_v48 = vadd.f32 %v5937_v42, %v9303_v62  ;;  %v5974_v21 = vpop.f32.mrf.mxu0  ;;  %6155 = vmatprep.mubr.msk.bf16.mxu1 %vm733_vm2, %v8174_v26  ;;  %v4010_v2 = vor.u32 %v4009_v3, %v8424_v50  ;;  %v9304_v11 = vld [vmem:[#allocation12_spill] sm:$0xff]  ;;  %v5679_v62 = vrot.slane %v5663_v35, 9 }
 0x138   : > { %v1133_v25 = vpop.f32.mrf.mxu1  ;;  %v4565_v17 = vrot.slane %v8430_v16, 5  ;;  %v8463_v58 = vrot.slane %v4027_v57, 5  ;;  %v4033_v51 = vrot.slane %v4031_v49, 4  ;;  %v8472_v23 = vrot.slane %v4000_v55, 4  ;;  %v5664_v16 = vld [vmem:[%s6524_s11 + $0xa8] sm:$0xe] }
 0x139   : > { %v8459_v39 = vadd.f32 %v5973_v15, %v1142_v48  ;;  %v1134_v26 = vadd.f32 %v1133_v25, %v9304_v11  ;;  %v1573_v13 = vpop.f32.mrf.mxu0  ;;  %v4564_v46 = vrot.slane %v4562_v40, 4  ;;  %v8475_v48 = vld [vmem:[%s6524_s11 + $0xb0] sm:$0x1]  ;;  %v8486_v56 = vrot.slane %v4010_v2, 4  ;;  %v9306_v55 = vld [vmem:[#allocation5_spill] sm:$0xff] }
 0x13a   : > { %v5938_v42 = vpop.f32.mrf.mxu1  ;;  %v4024_v11 = vor.u32 %v4023_v6, %v4020_v38  ;;  %v4034_v2 = vor.u32 %v4033_v51, %v8463_v58  ;;  %v9308_v38 = vld [vmem:[#allocation16_spill] sm:$0xff] }
 0x13b   : > { %v8465_v18 = vadd.f32 %v1570_v20, %v1134_v26  ;;  %v1145_v3 = vadd.f32 %v5938_v42, %v8066_v0  ;;  %v5977_v15 = vpop.f32.mrf.mxu0  ;;  %6192 = vmatmul.mubr.msk.bf16.gmra.mxu0 %vm733_vm2, %v5693_v8  ;;  %v9305_v20 = vcombine.low %v8207_v31, %v8238_v4  ;;  %v8482_v0 = vcombine.low %v3982_v54, %v3992_v12  ;;  %v5605_v31 = vld [vmem:[%s6524_s11 + $0xb4] sm:$0xf] }
 0x13c   : > { %v1136_v57 = vpop.f32.mrf.mxu1  ;;  %v8488_v8 = vrot.slane %v4013_v7, 5  ;;  %v4569_v26 = vrot.slane %v8418_v24, 5  ;;  %v9307_v54 = vld [vmem:[#allocation19_spill] sm:$0xff]  ;;  %v8499_v12 = vsel %vm6850_vm6, %v5679_v62, %v4562_v40  ;;  %v5680_v7 = vrot.slane %v5664_v16, 9  ;;  %v8522_v16 = vld [vmem:[%s6524_s11 + $0xb8] sm:$0xf] }
 0x13d   : > { %6195 = vmatprep.mubr.msk.bf16.mxu0 %vm733_vm2, %v9305_v20  ;;  %v8490_v49 = vadd.f32 %v5974_v21, %v1145_v3  ;;  %v1137_v35 = vadd.f32 %v1136_v57, %v9306_v55  ;;  %v1586_v25 = vpop.f32.mrf.mxu0  ;;  %v4037_v21 = vshll.u32 %v8475_v48, 16  ;;  %v4006_v40 = vsel %vm6564_vm3, %v8472_v23, %v8424_v50  ;;  %v9309_v50 = vld [vmem:[#allocation18_spill] sm:$0xff] }
 0x13e   : > { %v5941_v4 = vpop.f32.mrf.mxu1  ;;  %6156 = vmatmul.mubr.msk.bf16.gmra.mxu1 %vm733_vm2, %v9307_v54  ;;  %v8514_v62 = vsel %vm6850_vm6, %v4564_v46, %v4565_v17  ;;  %v4572_v3 = vrot.slane %v8475_v48, 5  ;;  %v4045_v57 = vshll.u32 %v5605_v31, 16  ;;  %v4025_v17 = vrot.slane %v4024_v11, 4 }
 0x13f   : > { %v8503_v42 = vadd.f32 %v1573_v13, %v1137_v35  ;;  %v1158_v6 = vadd.f32 %v5941_v4, %v9308_v38  ;;  %v5978_v24 = vpop.f32.mrf.mxu0  ;;  %6159 = vmatprep.mubr.msk.bf16.mxu1 %vm733_vm2, %v8343_v37  ;;  %v4016_v13 = vsel %vm6564_vm3, %v8486_v56, %v8488_v8  ;;  %v4042_v37 = vshrl.u32 %v5605_v31, 16  ;;  %v5608_v35 = vld [vmem:[%s6524_s11 + $0xc0] sm:$0xf] }
 0x140   : > { %v1149_v51 = vpop.f32.mrf.mxu1  ;;  %v4571_v46 = vrot.slane %v4569_v26, 4  ;;  %v4035_v8 = vrot.slane %v4034_v2, 4  ;;  %v4039_v48 = vrot.slane %v4037_v21, 5  ;;  %v8532_v54 = vsel %vm6850_vm6, %v5680_v7, %v4569_v26  ;;  %v8547_v21 = vld [vmem:[%s6524_s11 + $0xc4] sm:$0xf] }
 0x141   : > { %v8524_v20 = vadd.f32 %v5977_v15, %v1158_v6  ;;  %v1150_v23 = vadd.f32 %v1149_v51, %v9309_v50  ;;  %v1589_v55 = vpop.f32.mrf.mxu0  ;;  %v9310_v15 = vld [vmem:[#allocation21_spill] sm:$0xff]  ;;  %v9311_v11 = vcombine.low %v8282_v59, %v8293_v28  ;;  %v8542_v51 = vld [vmem:[%s6524_s11 + $0xbc] sm:$0x1]  ;;  %v4051_v50 = vshll.u32 %v8522_v16, 16 }
 0x142   : > { %v5942_v4 = vpop.f32.mrf.mxu1  ;;  %v4055_v2 = vshrl.u32 %v8522_v16, 16  ;;  %v4044_v7 = vrot.slane %v4042_v37, 4  ;;  %v4066_v59 = vshrl.u32 %v5608_v35, 16  ;;  %v4069_v28 = vshll.u32 %v5608_v35, 16  ;;  %v5665_v37 = vld [vmem:[%s6524_s11 + $0xb4] sm:$0xe] }
 0x143   : > { %v8534_v31 = vadd.f32 %v1586_v25, %v1150_v23  ;;  %v1161_v38 = vadd.f32 %v5942_v4, %v9310_v15  ;;  %v5981_v6 = vpop.f32.mrf.mxu0  ;;  %6196 = vmatmul.mubr.msk.bf16.gmra.mxu0 %vm733_vm2, %v9311_v11  ;;  %v9312_v25 = vcombine.low %v8317_v47, %v8323_v41  ;;  %v4047_v23 = vrot.slane %v4045_v57, 5  ;;  %v9313_v15 = vld [vmem:[#allocation23_spill] sm:$0xff] }
 0x144   : > { %v1152_v26 = vpop.f32.mrf.mxu1  ;;  %v4030_v9 = vsel %vm6564_vm3, %v4025_v17, %v8463_v58  ;;  %v8561_v27 = vsel %vm6850_vm6, %v4571_v46, %v4572_v3  ;;  %v4040_v41 = vsel %vm6564_vm3, %v4035_v8, %v4039_v48  ;;  %v4075_v57 = vshll.u32 %v8547_v21, 16 }
 0x145   : > { %6199 = vmatprep.mubr.msk.bf16.mxu0 %vm733_vm2, %v9312_v25  ;;  %v8553_v4 = vadd.f32 %v5978_v24, %v1161_v38  ;;  %v1153_v11 = vadd.f32 %v1152_v26, %v9313_v15  ;;  %v1602_v56 = vpop.f32.mrf.mxu0  ;;  %v4061_v24 = vshll.u32 %v8542_v51, 16  ;;  %v4079_v35 = vshrl.u32 %v8547_v21, 16 }
 0x146   : > { %v5945_v47 = vpop.f32.mrf.mxu1  ;;  %6160 = vmatmul.mubr.msk.bf16.gmra.mxu1 %vm733_vm2, %v8366_v60  ;;  %v8576_v17 = vrot.slane %v4051_v50, 5  ;;  %v4057_v60 = vrot.slane %v4055_v2, 4  ;;  %v4048_v8 = vor.u32 %v4047_v23, %v4044_v7  ;;  %v4576_v48 = vrot.slane %v8522_v16, 5 }
 0x147   : > { %v8571_v38 = vadd.f32 %v1589_v55, %v1153_v11  ;;  %v1174_v58 = vadd.f32 %v5945_v47, %v8272_v53  ;;  %v5982_v3 = vpop.f32.mrf.mxu0  ;;  %6163 = vmatprep.mubr.msk.bf16.mxu1 %vm733_vm2, %v8392_v32  ;;  %v4068_v26 = vrot.slane %v4066_v59, 4  ;;  %v4071_v25 = vrot.slane %v4069_v28, 5 }
 0x148   : > { %v1165_v46 = vpop.f32.mrf.mxu1  ;;  %v8582_v11 = vcombine.low %v4006_v40, %v4016_v13  ;;  %v5681_v47 = vrot.slane %v5665_v37, 9  ;;  %v8584_v50 = vcombine.low %v4030_v9, %v4040_v41  ;;  %v5700_v2 = vcombine.low %v8532_v54, %v8561_v27  ;;  %v5610_v27 = vld [vmem:[%s6524_s11 + $0xc8] sm:$0x1]  ;;  %v5611_v54 = vld [vmem:[%s6524_s11 + $0xcc] sm:$0xf] }
 0x149   : > { %v8579_v15 = vadd.f32 %v5981_v6, %v1174_v58  ;;  %v1166_v55 = vadd.f32 %v1165_v46, %v8285_v63  ;;  %v1605_v53 = vpop.f32.mrf.mxu0  ;;  %v8588_v7 = vrot.slane %v4075_v57, 5  ;;  %v4081_v16 = vrot.slane %v4079_v35, 4  ;;  %v8610_v41 = vld [vmem:[%s6524_s11 + $0xd0] sm:$0xf] }
 0x14a   : > { %v5946_v32 = vpop.f32.mrf.mxu1  ;;  %v9315_v40 = vcombine.low %v8375_v1, %v8386_v43  ;;  %v8597_v9 = vrot.slane %v4061_v24, 5  ;;  %v4579_v13 = vrot.slane %v8542_v51, 5  ;;  %v4058_v28 = vor.u32 %v4057_v60, %v8576_v17 }
 0x14b   : > { %v8590_v6 = vadd.f32 %v1602_v56, %v1166_v55  ;;  %v1177_v23 = vadd.f32 %v5946_v32, %v8308_v10  ;;  %v5985_v63 = vpop.f32.mrf.mxu0  ;;  %v9316_v56 = vcombine.low %v8440_v52, %v8455_v30  ;;  %v8606_v10 = vrot.slane %v4048_v8, 4  ;;  %v5666_v52 = vld [vmem:[%s6524_s11 + $0xc0] sm:$0xe] }
 0x14c   : > { %6200 = vmatmul.mubr.msk.bf16.gmra.mxu0 %vm733_vm2, %v9315_v40  ;;  %v1168_v59 = vpop.f32.mrf.mxu1  ;;  %v4578_v1 = vrot.slane %v4576_v48, 4  ;;  %v4072_v43 = vor.u32 %v4071_v25, %v4068_v26  ;;  %v8617_v57 = vsel %vm6850_vm6, %v5681_v47, %v4576_v48  ;;  %v4583_v30 = vrot.slane %v8547_v21, 5 }
 0x14d   : > { %9314 = vst [vmem:[#allocation9_spill] sm:$0xff] %v8590_v6  ;;  %6203 = vmatprep.mubr.msk.bf16.mxu0 %vm733_vm2, %v9316_v56  ;;  %v8612_v24 = vadd.f32 %v5982_v3, %v1177_v23  ;;  %v1169_v51 = vadd.f32 %v1168_v59, %v8327_v22  ;;  %v1618_v37 = vpop.f32.mrf.mxu0  ;;  %v4082_v58 = vor.u32 %v4081_v16, %v8588_v7  ;;  %v4085_v60 = vshll.u32 %v5610_v27, 16  ;;  %v9319_v22 = vld [vmem:[#allocation7_spill] sm:$0xff] }
 0x14e   : > { %v5949_v35 = vpop.f32.mrf.mxu1  ;;  %6164 = vmatmul.mubr.msk.bf16.gmra.mxu1 %vm733_vm2, %v8402_v44  ;;  %v4090_v46 = vshrl.u32 %v5611_v54, 16  ;;  %v4093_v3 = vshll.u32 %v5611_v54, 16  ;;  %v4099_v48 = vshll.u32 %v8610_v41, 16  ;;  %v4103_v21 = vshrl.u32 %v8610_v41, 16 }
 0x14f   : > { %9317 = vst [vmem:[#allocation12_spill] sm:$0xff] %v8612_v24  ;;  %v8624_v8 = vadd.f32 %v1605_v53, %v1169_v51  ;;  %v1190_v26 = vadd.f32 %v5949_v35, %v9319_v22  ;;  %v5986_v25 = vpop.f32.mrf.mxu0  ;;  %6167 = vmatprep.mubr.msk.bf16.mxu1 %vm733_vm2, %v8482_v0  ;;  %v4059_v47 = vrot.slane %v4058_v28, 4  ;;  %v4580_v44 = vsel %vm6850_vm6, %v4578_v1, %v4579_v13  ;;  %v9320_v53 = vld [vmem:[#allocation10_spill] sm:$0xff]  ;;  %v9321_v28 = vld [vmem:[#allocation8_spill] sm:$0xff] }
 0x150   : > { %v1181_v55 = vpop.f32.mrf.mxu1  ;;  %v4073_v32 = vrot.slane %v4072_v43, 4  ;;  %v5682_v16 = vrot.slane %v5666_v52, 9  ;;  %v4585_v59 = vrot.slane %v4583_v30, 4  ;;  %v4586_v56 = vrot.slane %v5610_v27, 5 }
 0x151   : > { %9318 = vst [vmem:[#allocation5_spill] sm:$0xff] %v8624_v8  ;;  %v8633_v23 = vadd.f32 %v5985_v63, %v1190_v26  ;;  %v1182_v40 = vadd.f32 %v1181_v55, %v9320_v53  ;;  %v1621_v54 = vpop.f32.mrf.mxu0  ;;  %v4083_v51 = vrot.slane %v4082_v58, 4  ;;  %v4087_v35 = vrot.slane %v4085_v60, 5  ;;  %v5613_v58 = vld [vmem:[%s6524_s11 + $0xd4] sm:$0x1]  ;;  %v9323_v60 = vld [vmem:[#allocation13_spill] sm:$0xff] }
 0x152   : > { %v5950_v0 = vpop.f32.mrf.mxu1  ;;  %v4092_v22 = vrot.slane %v4090_v46, 4  ;;  %v4095_v8 = vrot.slane %v4093_v3, 5  ;;  %v9322_v63 = vcombine.low %v8499_v12, %v8514_v62  ;;  %v8643_v1 = vrot.slane %v4099_v48, 5  ;;  %v5667_v48 = vld [vmem:[%s6524_s11 + $0xcc] sm:$0xe]  ;;  %s208_s11 = sand.u32 1, %s6407_s13  }
 0x153   : > { %v8636_v24 = vadd.f32 %v1618_v37, %v1182_v40  ;;  %v1193_v6 = vadd.f32 %v5950_v0, %v9321_v28  ;;  %v5989_v13 = vpop.f32.mrf.mxu0  ;;  %v4105_v27 = vrot.slane %v4103_v21, 4  ;;  %v4054_v37 = vsel %vm6564_vm3, %v8606_v10, %v8576_v17  ;;  %v9325_v40 = vld [vmem:[#allocation15_spill] sm:$0xff]  ;;  %s5142_s9 = sshll.u32 %s208_s11, 8  ;;  %s9123_s15 = scalar_lea.sflag [#allocation3], %s208_s11 }
 0x154   : > { %6204 = vmatmul.mubr.msk.bf16.gmra.mxu0 %vm733_vm2, %v9322_v63  ;;  %v1184_v43 = vpop.f32.mrf.mxu1  ;;  %v4064_v52 = vsel %vm6564_vm3, %v4059_v47, %v8597_v9  ;;  %v4590_v12 = vrot.slane %v8610_v41, 5  ;;  %v4587_v26 = vsel %vm6850_vm6, %v4585_v59, %v4586_v56  ;;  %v5701_v9 = vcombine.low %v8617_v57, %v4580_v44  ;;  %s8974_s10 = scalar_lea.vmem [#allocation2], %s5142_s9 }
 0x155   : > { %6207 = vmatprep.mubr.msk.bf16.mxu0 %vm733_vm2, %v5700_v2  ;;  %v8655_v62 = vadd.f32 %v5986_v25, %v1193_v6  ;;  %v1185_v46 = vadd.f32 %v1184_v43, %v9323_v60  ;;  %v1634_v3 = vpop.f32.mrf.mxu0  ;;  %v4584_v2 = vsel %vm6850_vm6, %v5682_v16, %v4583_v30  ;;  %v4078_v6 = vsel %vm6564_vm3, %v4073_v32, %v8588_v7  ;;  %v9324_v30 = vld [vmem:[#allocation14_spill] sm:$0xff]  ;;  %s5021_s19 = sshll.u32 %s8974_s10, 4  ;;  %s9117_s19 = int_to_ptr.vmem [resolvable:$true] %s5021_s19 }
 0x156   : > { %v5953_v17 = vpop.f32.mrf.mxu1  ;;  %6168 = vmatmul.mubr.msk.bf16.gmra.mxu1 %vm733_vm2, %v8582_v11  ;;  %v4088_v10 = vsel %vm6564_vm3, %v4083_v51, %v4087_v35  ;;  %v4096_v41 = vor.u32 %v4095_v8, %v4092_v22  ;;  %v4106_v11 = vor.u32 %v4105_v27, %v8643_v1  ;;  %v4109_v47 = vshll.u32 %v5613_v58, 16  ;;  %s6347_s27 = scalar_lea.vmem %s9117_s19, 4096  ;;  %p6354_p1 = scmp.lt.s32.totalorder %s9117_s19, %s6352_s29 }
 0x157   : > { %v8671_v25 = vadd.f32 %v1621_v54, %v1185_v46  ;;  %v1206_v21 = vadd.f32 %v5953_v17, %v9324_v30  ;;  %v5990_v55 = vpop.f32.mrf.mxu0  ;;  %6171 = vmatprep.mubr.msk.bf16.mxu1 %vm733_vm2, %v8584_v50  ;;  %v5702_v44 = vcombine.low %v4584_v2, %v4587_v26  ;;  %v5683_v16 = vrot.slane %v5667_v48, 9  ;;  %v9326_v50 = vld [vmem:[#allocation6_spill] sm:$0xff]  ;;  %v9328_v48 = vld [vmem:[#allocation17_spill] sm:$0xff]  ;;  %p6348_p12 = scmp.ne.s32.totalorder %s9117_s19, %s6347_s27  ;;  %p6355_p2 = scmp.lt.s32.totalorder %s6353_s30, %s6347_s27 }
 0x158   : > { %v1197_v57 = vpop.f32.mrf.mxu1  ;;  %v4592_v53 = vrot.slane %v4590_v12, 4  ;;  %v4593_v7 = vrot.slane %v5613_v58, 5  ;;  %v5631_v56 = vcombine.low %v4054_v37, %v4064_v52  ;;  %v5632_v0 = vcombine.low %v4078_v6, %v4088_v10  ;;  %v9327_v58 = vld [vmem:[#allocation11_spill] sm:$0xff] }
 0x159   : > { %v8677_v32 = vadd.f32 %v5989_v13, %v1206_v21  ;;  %v1198_v8 = vadd.f32 %v1197_v57, %v9325_v40  ;;  %v1637_v54 = vpop.f32.mrf.mxu0  ;;  %v4097_v51 = vrot.slane %v4096_v41, 4  ;;  %v4107_v63 = vrot.slane %v4106_v11, 4  ;;  %v9329_v41 = vld [vmem:[#allocation20_spill] sm:$0xff]  ;;  %p6349_p13 = pnand %p6348_p12, %p6488_p4  ;;  %p6356_p3 = por %p6355_p2, %p6354_p1 }
 0x15a   : > { %v5954_v59 = vpop.f32.mrf.mxu1  ;;  %v4111_v27 = vrot.slane %v4109_v47, 5  ;;  %v4591_v13 = vsel %vm6850_vm6, %v5683_v16, %v4590_v12  ;;  %v4594_v37 = vsel %vm6850_vm6, %v4592_v53, %v4593_v7  ;;  %v9330_v47 = vld [vmem:[#allocation22_spill] sm:$0xff] }
 0x15b   : > { %v8680_v35 = vadd.f32 %v1634_v3, %v1198_v8  ;;  %v1209_v22 = vadd.f32 %v5954_v59, %v9326_v50  ;;  %v5993_v28 = vpop.f32.mrf.mxu0  ;;  %v4102_v2 = vsel %vm6564_vm3, %v4097_v51, %v8643_v1  ;;  %v9332_v50 = vld [vmem:[#allocation25_spill] sm:$0xff]  ;;  %p6350_p0 = pneg %p6349_p13 }
 0x15c   : > { %6208 = vmatmul.mubr.msk.bf16.gmra.mxu0 %vm733_vm2, %v5701_v9  ;;  %v1200_v43 = vpop.f32.mrf.mxu1  ;;  %v4112_v45 = vsel %vm6564_vm3, %v4107_v63, %v4111_v27  ;;  %v5703_v9 = vcombine.low %v4591_v13, %v4594_v37 }
 0x15d   : > { %6211 = vmatprep.mubr.msk.bf16.mxu0 %vm733_vm2, %v5702_v44  ;;  %v8689_v52 = vadd.f32 %v5990_v55, %v1209_v22  ;;  %v1201_v60 = vadd.f32 %v1200_v43, %v9327_v58  ;;  %v1650_v46 = vpop.f32.mrf.mxu0  ;;  %v5633_v11 = vcombine.low %v4102_v2, %v4112_v45  ;;  %p6357_p5 = pnand %p6356_p3, %p6350_p0 }
 0x15e   : > { %v5957_v3 = vpop.f32.mrf.mxu1  ;;  %6172 = vmatmul.mubr.msk.bf16.gmra.mxu1 %vm733_vm2, %v5631_v56 }
 0x15f   : > { %v8696_v26 = vadd.f32 %v1637_v54, %v1201_v60  ;;  %v1222_v17 = vadd.f32 %v5957_v3, %v9328_v48  ;;  %v5994_v12 = vpop.f32.mrf.mxu0  ;;  %6175 = vmatprep.mubr.msk.bf16.mxu1 %vm733_vm2, %v5632_v0 }
 0x160   : > { %v1213_v6 = vpop.f32.mrf.mxu1 }
 0x161   : > { %v8702_v10 = vadd.f32 %v5993_v28, %v1222_v17  ;;  %v1214_v30 = vadd.f32 %v1213_v6, %v9329_v41  ;;  %v1653_v21 = vpop.f32.mrf.mxu0 }
 0x162   : > { %v5958_v55 = vpop.f32.mrf.mxu1 }
 0x163   : > { %v8705_v1 = vadd.f32 %v1650_v46, %v1214_v30  ;;  %v1225_v57 = vadd.f32 %v5958_v55, %v9330_v47  ;;  %v5997_v44 = vpop.f32.mrf.mxu0 }
 0x164   : > { %6212 = vmatmul.mubr.msk.bf16.gmra.mxu0 %vm733_vm2, %v5703_v9  ;;  %v1216_v16 = vpop.f32.mrf.mxu1 }
 0x165   : > { %v8709_v53 = vadd.f32 %v5994_v12, %v1225_v57  ;;  %v1217_v7 = vadd.f32 %v1216_v16, %v9331_v29  ;;  %v1666_v40 = vpop.f32.mrf.mxu0 }
 0x166   : > { %v5961_v8 = vpop.f32.mrf.mxu1  ;;  %6176 = vmatmul.mubr.msk.bf16.gmra.mxu1 %vm733_vm2, %v5633_v11 }
 0x167   : > { %v8713_v54 = vadd.f32 %v1653_v21, %v1217_v7  ;;  %v1238_v59 = vadd.f32 %v5961_v8, %v8299_v33  ;;  %v5998_v56 = vpop.f32.mrf.mxu0 }
 0x168   : > { %v1229_v0 = vpop.f32.mrf.mxu1 }
 0x169   : > { %v8716_v51 = vadd.f32 %v5997_v44, %v1238_v59  ;;  %v1230_v22 = vadd.f32 %v1229_v0, %v9332_v50  ;;  %v1669_v28 = vpop.f32.mrf.mxu0 }
 0x16a   : > { %v5962_v63 = vpop.f32.mrf.mxu1 }
 0x16b   : > { %v8719_v27 = vadd.f32 %v1666_v40, %v1230_v22  ;;  %v1241_v43 = vadd.f32 %v5962_v63, %v8330_v14  ;;  %v6041_v13 = vpop.f32.mrf.mxu0 }
 0x16c   : > { %v1232_v37 = vpop.f32.mrf.mxu1 }
 0x16d   : > { %v8722_v58 = vadd.f32 %v5998_v56, %v1241_v43  ;;  %v1233_v60 = vadd.f32 %v1232_v37, %v8352_v19  ;;  %v2666_v46 = vpop.f32.mrf.mxu0 }
 0x16e   : > { %v6005_v33 = vpop.f32.mrf.mxu1 }
 0x16f   : > { %v8725_v3 = vadd.f32 %v1669_v28, %v1233_v60  ;;  %v2057_v2 = vadd.f32 %v6005_v33, %v8399_v61  ;;  %v6042_v48 = vpop.f32.mrf.mxu0 }
 0x170   : > { %v1928_v17 = vpop.f32.mrf.mxu1 }
 0x171   : > { %v8728_v12 = vadd.f32 %v6041_v13, %v2057_v2  ;;  %v2055_v45 = vadd.f32 %v1928_v17, %v8410_v36  ;;  %v2669_v9 = vpop.f32.mrf.mxu0 }
 0x172   : > { %v6006_v14 = vpop.f32.mrf.mxu1 }
 0x173   : > { %v8731_v6 = vadd.f32 %v2666_v46, %v2055_v45  ;;  %v2058_v41 = vadd.f32 %v6006_v14, %v8426_v5  ;;  %v6045_v30 = vpop.f32.mrf.mxu0 }
 0x174   : > { %v1931_v19 = vpop.f32.mrf.mxu1 }
 0x175   : > { %v8734_v21 = vadd.f32 %v6042_v48, %v2058_v41  ;;  %v2056_v55 = vadd.f32 %v1931_v19, %v8444_v34  ;;  %v2682_v11 = vpop.f32.mrf.mxu0 }
 0x176   : > { %v6009_v61 = vpop.f32.mrf.mxu1 }
 0x177   : > { %v8737_v47 = vadd.f32 %v2669_v9, %v2056_v55  ;;  %v2061_v57 = vadd.f32 %v6009_v61, %v8459_v39  ;;  %v6046_v44 = vpop.f32.mrf.mxu0  ;;  %v9334_v61 = vld [vmem:[#allocation12_spill] sm:$0xff] }
 0x178   : > { %v1944_v36 = vpop.f32.mrf.mxu1 }
 0x179   : > { %v8740_v16 = vadd.f32 %v6045_v30, %v2061_v57  ;;  %v2059_v29 = vadd.f32 %v1944_v36, %v8465_v18  ;;  %v2685_v7 = vpop.f32.mrf.mxu0  ;;  %v9333_v30 = vld [vmem:[#allocation9_spill] sm:$0xff] }
 0x17a   : > { %v6010_v5 = vpop.f32.mrf.mxu1 }
 0x17b   : > { %v8743_v40 = vadd.f32 %v2682_v11, %v2059_v29  ;;  %v2062_v8 = vadd.f32 %v6010_v5, %v8490_v49  ;;  %v6049_v59 = vpop.f32.mrf.mxu0  ;;  %v9335_v29 = vld [vmem:[#allocation5_spill] sm:$0xff] }
 0x17c   : > { %v1947_v34 = vpop.f32.mrf.mxu1 }
 0x17d   : > { %v8746_v56 = vadd.f32 %v6046_v44, %v2062_v8  ;;  %v2060_v0 = vadd.f32 %v1947_v34, %v8503_v42  ;;  %v2698_v50 = vpop.f32.mrf.mxu0 }
 0x17e   : > { %v6013_v39 = vpop.f32.mrf.mxu1 }
 0x17f   : > { %v8749_v22 = vadd.f32 %v2685_v7, %v2060_v0  ;;  %v2065_v28 = vadd.f32 %v6013_v39, %v8524_v20  ;;  %v6050_v63 = vpop.f32.mrf.mxu0 }
 0x180   : > { %v1960_v18 = vpop.f32.mrf.mxu1 }
 0x181   : > { %v8752_v43 = vadd.f32 %v6049_v59, %v2065_v28  ;;  %v2063_v13 = vadd.f32 %v1960_v18, %v8534_v31  ;;  %v2701_v37 = vpop.f32.mrf.mxu0 }
 0x182   : > { %v6014_v49 = vpop.f32.mrf.mxu1 }
 0x183   : > { %v8755_v60 = vadd.f32 %v2698_v50, %v2063_v13  ;;  %v2066_v46 = vadd.f32 %v6014_v49, %v8553_v4  ;;  %v6053_v33 = vpop.f32.mrf.mxu0 }
 0x184   : > { %v1963_v42 = vpop.f32.mrf.mxu1 }
 0x185   : > { %v8758_v2 = vadd.f32 %v6050_v63, %v2066_v46  ;;  %v2064_v48 = vadd.f32 %v1963_v42, %v8571_v38  ;;  %v2714_v17 = vpop.f32.mrf.mxu0 }
 0x186   : > { %v6017_v20 = vpop.f32.mrf.mxu1 }
 0x187   : > { %v8761_v45 = vadd.f32 %v2701_v37, %v2064_v48  ;;  %v2069_v9 = vadd.f32 %v6017_v20, %v8579_v15  ;;  %v6054_v14 = vpop.f32.mrf.mxu0 }
 0x188   : > { %v1976_v31 = vpop.f32.mrf.mxu1 }
 0x189   : > { %v8764_v41 = vadd.f32 %v6053_v33, %v2069_v9  ;;  %v2067_v19 = vadd.f32 %v1976_v31, %v9333_v30  ;;  %v2717_v55 = vpop.f32.mrf.mxu0 }
 0x18a   : > { %v6018_v4 = vpop.f32.mrf.mxu1 }
 0x18b   : > { %v8767_v11 = vadd.f32 %v2714_v17, %v2067_v19  ;;  %v2070_v57 = vadd.f32 %v6018_v4, %v9334_v61  ;;  %v6057_v44 = vpop.f32.mrf.mxu0 }
 0x18c   : > { %v1979_v38 = vpop.f32.mrf.mxu1 }
 0x18d   : > { %v8770_v36 = vadd.f32 %v6054_v14, %v2070_v57  ;;  %v2068_v7 = vadd.f32 %v1979_v38, %v9335_v29  ;;  %v2730_v5 = vpop.f32.mrf.mxu0 }
 0x18e   : > { %v6021_v15 = vpop.f32.mrf.mxu1 }
 0x18f   : > { %v8773_v8 = vadd.f32 %v2717_v55, %v2068_v7  ;;  %v2073_v59 = vadd.f32 %v6021_v15, %v8633_v23  ;;  %v6058_v34 = vpop.f32.mrf.mxu0 }
 0x190   : > { %v1992_v0 = vpop.f32.mrf.mxu1 }
 0x191   : > { %v8776_v50 = vadd.f32 %v6057_v44, %v2073_v59  ;;  %v2071_v39 = vadd.f32 %v1992_v0, %v8636_v24  ;;  %v2733_v28 = vpop.f32.mrf.mxu0 }
 0x192   : > { %v6022_v63 = vpop.f32.mrf.mxu1 }
 0x193   : > { %v8779_v18 = vadd.f32 %v2730_v5, %v2071_v39  ;;  %v2074_v13 = vadd.f32 %v6022_v63, %v8655_v62  ;;  %v6061_v37 = vpop.f32.mrf.mxu0 }
 0x194   : > { %v1995_v49 = vpop.f32.mrf.mxu1 }
 0x195   : > { %v8782_v46 = vadd.f32 %v6058_v34, %v2074_v13  ;;  %v2072_v33 = vadd.f32 %v1995_v49, %v8671_v25  ;;  %v2746_v42 = vpop.f32.mrf.mxu0 }
 0x196   : > { %v6025_v23 = vpop.f32.mrf.mxu1 }
 0x197   : > { %9336 = vst [vmem:[#allocation19_spill] sm:$0xff] %v8782_v46  ;;  %v8785_v48 = vadd.f32 %v2733_v28, %v2072_v33  ;;  %v2077_v17 = vadd.f32 %v6025_v23, %v8677_v32  ;;  %v6062_v20 = vpop.f32.mrf.mxu0 }
 0x198   : > { %v2008_v24 = vpop.f32.mrf.mxu1 }
 0x199   : > { %9337 = vst [vmem:[#allocation16_spill] sm:$0xff] %v8785_v48  ;;  %v8788_v9 = vadd.f32 %v6061_v37, %v2077_v17  ;;  %v2075_v14 = vadd.f32 %v2008_v24, %v8680_v35  ;;  %v2749_v31 = vpop.f32.mrf.mxu0 }
 0x19a   : > { %v6026_v62 = vpop.f32.mrf.mxu1 }
 0x19b   : > { %9338 = vst [vmem:[#allocation18_spill] sm:$0xff] %v8788_v9  ;;  %v8791_v30 = vadd.f32 %v2746_v42, %v2075_v14  ;;  %v2078_v19 = vadd.f32 %v6026_v62, %v8689_v52  ;;  %v6065_v55 = vpop.f32.mrf.mxu0 }
 0x19c   : > { %v2011_v25 = vpop.f32.mrf.mxu1 }
 0x19d   : > { %9339 = vst [vmem:[#allocation21_spill] sm:$0xff] %v8791_v30  ;;  %v8794_v4 = vadd.f32 %v6062_v20, %v2078_v19  ;;  %v2076_v61 = vadd.f32 %v2011_v25, %v8696_v26  ;;  %v2762_v57 = vpop.f32.mrf.mxu0 }
 0x19e   : > { %v6029_v32 = vpop.f32.mrf.mxu1 }
 0x19f   : > { %9340 = vst [vmem:[#allocation23_spill] sm:$0xff] %v8794_v4  ;;  %v8797_v44 = vadd.f32 %v2749_v31, %v2076_v61  ;;  %v2081_v38 = vadd.f32 %v6029_v32, %v8702_v10  ;;  %v6066_v29 = vpop.f32.mrf.mxu0 }
 0x1a0   : > { %v2024_v35 = vpop.f32.mrf.mxu1 }
 0x1a1   : > { %9341 = vst [vmem:[#allocation7_spill] sm:$0xff] %v8797_v44  ;;  %v8800_v7 = vadd.f32 %v6065_v55, %v2081_v38  ;;  %v2079_v5 = vadd.f32 %v2024_v35, %v8705_v1  ;;  %v2765_v15 = vpop.f32.mrf.mxu0 }
 0x1a2   : > { %v6030_v52 = vpop.f32.mrf.mxu1 }
 0x1a3   : > { %9342 = vst [vmem:[#allocation10_spill] sm:$0xff] %v8800_v7  ;;  %v8803_v59 = vadd.f32 %v2762_v57, %v2079_v5  ;;  %v2082_v34 = vadd.f32 %v6030_v52, %v8709_v53  ;;  %v6069_v0 = vpop.f32.mrf.mxu0 }
 0x1a4   : > { %v2027_v26 = vpop.f32.mrf.mxu1 }
 0x1a5   : > { %9343 = vst [vmem:[#allocation8_spill] sm:$0xff] %v8803_v59  ;;  %v8806_v39 = vadd.f32 %v6066_v29, %v2082_v34  ;;  %v2080_v28 = vadd.f32 %v2027_v26, %v8713_v54  ;;  %v2778_v63 = vpop.f32.mrf.mxu0 }
 0x1a6   : > { %v6033_v10 = vpop.f32.mrf.mxu1 }
 0x1a7   : > { %9344 = vst [vmem:[#allocation13_spill] sm:$0xff] %v8806_v39  ;;  %v8809_v13 = vadd.f32 %v2765_v15, %v2080_v28  ;;  %v2085_v37 = vadd.f32 %v6033_v10, %v8716_v51  ;;  %v6070_v49 = vpop.f32.mrf.mxu0 }
 0x1a8   : > { %v2040_v1 = vpop.f32.mrf.mxu1 }
 0x1a9   : > { %9345 = vst [vmem:[#allocation14_spill] sm:$0xff] %v8809_v13  ;;  %v8812_v33 = vadd.f32 %v6069_v0, %v2085_v37  ;;  %v2083_v42 = vadd.f32 %v2040_v1, %v8719_v27  ;;  %v2781_v23 = vpop.f32.mrf.mxu0 }
 0x1aa   : > { %v6034_v53 = vpop.f32.mrf.mxu1 }
 0x1ab   : > { %9346 = vst [vmem:[#allocation15_spill] sm:$0xff] %v8812_v33  ;;  %v8815_v17 = vadd.f32 %v2778_v63, %v2083_v42  ;;  %v2086_v20 = vadd.f32 %v6034_v53, %v8722_v58  ;;  %v8818_v24 = vpop.f32.mrf.mxu0 }
 0x1ac   : > { %v2043_v54 = vpop.f32.mrf.mxu1 }
 0x1ad   : > { %9347 = vst [vmem:[#allocation6_spill] sm:$0xff] %v8815_v17  ;;  %v8820_v14 = vadd.f32 %v6070_v49, %v2086_v20  ;;  %v2084_v31 = vadd.f32 %v2043_v54, %v8725_v3  ;;  %v8823_v51 = vpop.f32.mrf.mxu0 }
 0x1ae   : > { %v6077_v62 = vpop.f32.mrf.mxu1 }
 0x1af   : > { %9348 = vst [vmem:[#allocation11_spill] sm:$0xff] %v8820_v14  ;;  %v8825_v19 = vadd.f32 %v2781_v23, %v2084_v31  ;;  %v8827_v55 = vpop.f32.mrf.mxu0 }
 0x1b0   : > { %v3148_v27 = vpop.f32.mrf.mxu1 }
 0x1b1   : > { %9349 = vst [vmem:[#allocation17_spill] sm:$0xff] %v8825_v19  ;;  %v8829_v25 = vpop.f32.mrf.mxu0 }
 0x1b2   : > { %v6078_v61 = vpop.f32.mrf.mxu1 }
 0x1b3   : > { %v8831_v57 = vpop.f32.mrf.mxu0 }
 0x1b4   : > { %v8833_v58 = vpop.f32.mrf.mxu1 }
 0x1b5   : > { %v8835_v32 = vpop.f32.mrf.mxu0 }
 0x1b6   : > { %v8837_v38 = vpop.f32.mrf.mxu1 }
 0x1b7   : > { %v8839_v3 = vpop.f32.mrf.mxu0 }
 0x1b8   : > { %v8841_v29 = vpop.f32.mrf.mxu1 }
 0x1b9   : > { %v8843_v35 = vpop.f32.mrf.mxu0 }
 0x1ba   : > { %v8845_v5 = vpop.f32.mrf.mxu1 }
 0x1bb   : > { %v8847_v15 = vpop.f32.mrf.mxu0 }
 0x1bc   : > { %v8849_v52 = vpop.f32.mrf.mxu1 }
 0x1bd   : > { %v8851_v34 = vpop.f32.mrf.mxu0 }
 0x1be   : > { %v8853_v0 = vpop.f32.mrf.mxu1 }
 0x1bf   : > { %v8855_v26 = vpop.f32.mrf.mxu0 }
 0x1c0   : > { %v8857_v28 = vpop.f32.mrf.mxu1 }
 0x1c1   : > { %v8859_v63 = vpop.f32.mrf.mxu0 }
 0x1c2   : > { %v8861_v10 = vpop.f32.mrf.mxu1 }
 0x1c3   : > { %v8863_v37 = vpop.f32.mrf.mxu0 }
 0x1c4   : > { %v8865_v49 = vpop.f32.mrf.mxu1 }
 0x1c5   : > { %v8867_v1 = vpop.f32.mrf.mxu0 }
 0x1c6   : > { %v8869_v42 = vpop.f32.mrf.mxu1 }
 0x1c7   : > { %v8871_v23 = vpop.f32.mrf.mxu0 }
 0x1c8   : > { %v8873_v53 = vpop.f32.mrf.mxu1 }
 0x1c9   : > { %v8875_v20 = vpop.f32.mrf.mxu0 }
 0x1ca   : > { %v8877_v54 = vpop.f32.mrf.mxu1 }
 0x1cb   : > { %v8879_v31 = vpop.f32.mrf.mxu0 }
 0x1cc   : > { %v8881_v19 = vpop.f32.mrf.mxu1 }
 0x1cd   : > { %v8883_v14 = vpop.f32.mrf.mxu0 }
 0x1ce   : > { %9350 = vst [vmem:[#allocation20_spill] sm:$0xff] %v8883_v14  ;;  %v8885_v17 = vpop.f32.mrf.mxu1 }
 0x1cf   : > { %v8887_v33 = vpop.f32.mrf.mxu0 }
 0x1d0   : > { %9351 = vst [vmem:[#allocation22_spill] sm:$0xff] %v8887_v33  ;;  %v8889_v13 = vpop.f32.mrf.mxu1 }
 0x1d1   : > { %v8891_v39 = vpop.f32.mrf.mxu0 }
 0x1d2   : > { %9352 = vst [vmem:[#allocation24_spill] sm:$0xff] %v8891_v39  ;;  %v8893_v59 = vpop.f32.mrf.mxu1 }
 0x1d3   : > { %9353 = vst [vmem:[#allocation25_spill] sm:$0xff] %v8893_v59  ;;  %v8895_v7 = vpop.f32.mrf.mxu0 }
 0x1d4   : > { %9354 = vst [vmem:[#allocation9_spill] sm:$0xff] %v8895_v7  ;;  %v8897_v44 = vpop.f32.mrf.mxu1 }
 0x1d5   : > { %9355 = vst [vmem:[#allocation12_spill] sm:$0xff] %v8897_v44  ;;  %v8899_v4 = vpop.f32.mrf.mxu0 }
 0x1d6   : > { %9356 = vst [vmem:[#allocation5_spill] sm:$0xff] %v8899_v4  ;;  %v8901_v30 = vpop.f32.mrf.mxu1 }
 0x1d7   : > { %9357 = vst [vmem:[#allocation26_spill] sm:$0xff] %v8901_v30  ;;  %v8903_v9 = vpop.f32.mrf.mxu0 }
 0x1d8   : > { %9358 = vst [vmem:[#allocation27_spill] sm:$0xff] %v8903_v9  ;;  %v8905_v48 = vpop.f32.mrf.mxu1 }
 0x1d9   : > { %9359 = vst [vmem:[#allocation28_spill] sm:$0xff] %v8905_v48  ;;  %v8907_v14 = vpop.f32.mrf.mxu0 }
 0x1da   : > { %9360 = vst [vmem:[#allocation29_spill] sm:$0xff] %v8907_v14  ;;  %v8909_v33 = vpop.f32.mrf.mxu1 }
 0x1db   : > { %9361 = vst [vmem:[#allocation30_spill] sm:$0xff] %v8909_v33  ;;  %v8911_v46 = vpop.f32.mrf.mxu0 }
 0x1dc   : > { %9362 = vst [vmem:[#allocation31_spill] sm:$0xff] %v8911_v46  ;;  %v8913_v39 = vpop.f32.mrf.mxu1 }
 0x1dd   : > { %9363 = vst [vmem:[#allocation32_spill] sm:$0xff] %v8913_v39  ;;  %v8915_v59 = vpop.f32.mrf.mxu0 }
 0x1de   : > { %9364 = vst [vmem:[#allocation33_spill] sm:$0xff] %v8915_v59  ;;  %v8917_v7 = vpop.f32.mrf.mxu1 }
 0x1df   : > { %9365 = vst [vmem:[#allocation34_spill] sm:$0xff] %v8917_v7  ;;  %v8919_v44 = vpop.f32.mrf.mxu0 }
 0x1e0   : > { %9366 = vst [vmem:[#allocation35_spill] sm:$0xff] %v8919_v44  ;;  %v8921_v4 = vpop.f32.mrf.mxu1  ;;  %v3277_v44 = vadd.f32 %v6077_v62, %v8728_v12  ;;  %v3276_v12 = vadd.f32 %v8833_v58, %v8737_v47  ;;  %v3279_v47 = vadd.f32 %v8841_v29, %v8743_v40 }
 0x1e1   : > { %9367 = vst [vmem:[#allocation36_spill] sm:$0xff] %v8921_v4  ;;  %v8923_v30 = vpop.f32.mrf.mxu0 }
 0x1e2   : > { %9368 = vst [vmem:[#allocation37_spill] sm:$0xff] %v8923_v30  ;;  %v8925_v9 = vpop.f32.mrf.mxu1  ;;  %v3653_v29 = vadd.f32 %v8835_v32, %v3279_v47  ;;  %v3285_v32 = vadd.f32 %v8853_v0, %v8752_v43 }
 0x1e3   : > { %9369 = vst [vmem:[#allocation38_spill] sm:$0xff] %v8925_v9  ;;  %v8927_v48 = vpop.f32.mrf.mxu0  ;;  %v3275_v9 = vadd.f32 %v3148_v27, %v8731_v6  ;;  %v3281_v6 = vadd.f32 %v8837_v38, %v8740_v16  ;;  %v8958_v27 = vld [vmem:[%s9170_s2] ss:$0 sm:$0xff] }
 0x1e4   : > { %9370 = vst [vmem:[#allocation39_spill] sm:$0xff] %v8927_v48  ;;  %v8929_v14 = vpop.f32.mrf.mxu1 }
 0x1e5   : > { %9371 = vst [vmem:[#allocation40_spill] sm:$0xff] %v8929_v14  ;;  %v8931_v46 = vpop.f32.mrf.mxu0 }
 0x1e6   : > { %9372 = vst [vmem:[#allocation41_spill] sm:$0xff] %v8931_v46  ;;  %v8933_v39 = vpop.f32.mrf.mxu1  ;;  %v3651_v46 = vadd.f32 %v8818_v24, %v3277_v44 }
 0x1e7   : > { %9373 = vst [vmem:[#allocation42_spill] sm:$0xff] %v8933_v39  ;;  %v8935_v59 = vpop.f32.mrf.mxu0  ;;  %v3278_v39 = vadd.f32 %v6078_v61, %v8734_v21 }
 0x1e8   : > { %9374 = vst [vmem:[#allocation43_spill] sm:$0xff] %v8935_v59  ;;  %v8937_v7 = vpop.f32.mrf.mxu1 }
 0x1e9   : > { %9375 = vst [vmem:[#allocation44_spill] sm:$0xff] %v8937_v7  ;;  %v8940_v4 = vpop.f32.mrf.mxu0  ;;  %v3649_v7 = vadd.f32 %v8823_v51, %v3275_v9  ;;  %v3652_v21 = vadd.f32 %v8827_v55, %v3278_v39  ;;  %v3282_v39 = vadd.f32 %v8845_v5, %v8746_v56 }
 0x1ea   : > { %9376 = vst [vmem:[#allocation45_spill] sm:$0xff] %v8940_v4  ;;  %v8942_v30 = vpop.f32.mrf.mxu1 }
 0x1eb   : > { %v6185_v48 = vpop.f32.mrf.mxu0 }
 0x1ec   : > { %v8945_v33 = vpop.f32.mrf.mxu1 }
 0x1ed   : > { %9377 = vst [vmem:[#allocation46_spill] sm:$0xff] %v8945_v33  ;;  %v4742_v14 = vpop.f32.mrf.mxu0  ;;  %v3655_v33 = vadd.f32 %v8831_v57, %v3281_v6  ;;  %v3656_v6 = vadd.f32 %v8839_v3, %v3282_v39 }
 0x1ee   : > { %v6149_v59 = vpop.f32.mrf.mxu1 }
 0x1ef   : > { %v4389_v62 = vadd.f32 %v6149_v59, %v3651_v46  ;;  %v6186_v4 = vpop.f32.mrf.mxu0  ;;  %v3650_v59 = vadd.f32 %v8829_v25, %v3276_v12  ;;  %v3280_v25 = vadd.f32 %v8849_v52, %v8749_v22 }
 0x1f0   : > { %v4260_v44 = vpop.f32.mrf.mxu1 }
 0x1f1   : > { %v4871_v24 = vadd.f32 %v6185_v48, %v4389_v62  ;;  %v4387_v9 = vadd.f32 %v4260_v44, %v3649_v7  ;;  %v4745_v51 = vpop.f32.mrf.mxu0 }
 0x1f2   : > { %v6150_v46 = vpop.f32.mrf.mxu1 }
 0x1f3   : > { %v4910_v16 = vadd.f32 %v8958_v27, %v4871_v24  ;;  %v4869_v61 = vadd.f32 %v4742_v14, %v4387_v9  ;;  %v4390_v58 = vadd.f32 %v6150_v46, %v3652_v21  ;;  %v6189_v38 = vpop.f32.mrf.mxu0  ;;  %v3654_v46 = vadd.f32 %v8843_v35, %v3280_v25 }
 0x1f4   : > { %v4263_v55 = vpop.f32.mrf.mxu1  ;;  %v3289_v25 = vadd.f32 %v8869_v42, %v8764_v41 }
 0x1f5   : > { %v4942_v48 = vmax.f32 %v4910_v16, 0.0  ;;  %v4908_v7 = vadd.f32 %v8958_v27, %v4869_v61  ;;  %v4872_v62 = vadd.f32 %v6186_v4, %v4390_v58  ;;  %v4388_v44 = vadd.f32 %v4263_v55, %v3650_v59  ;;  %v4758_v40 = vpop.f32.mrf.mxu0 }
 0x1f6   : > { %v6153_v14 = vpop.f32.mrf.mxu1  ;;  %v3659_v61 = vadd.f32 %v8847_v15, %v3285_v32  ;;  %v3286_v58 = vadd.f32 %v8861_v10, %v8758_v2 }
 0x1f7   : > { %4974 = vst [vmem:[%s8974_s10 + $0x10] sm:$0xff] %v4942_v48  ;;  %v4940_v57 = vmax.f32 %v4908_v7, 0.0  ;;  %v4911_v56 = vadd.f32 %v8958_v27, %v4872_v62  ;;  %v4870_v5 = vadd.f32 %v4745_v51, %v4388_v44  ;;  %v4393_v12 = vadd.f32 %v6153_v14, %v3655_v33  ;;  %v6190_v4 = vpop.f32.mrf.mxu0 }
 0x1f8   : > { %v4276_v21 = vpop.f32.mrf.mxu1  ;;  %v3283_v33 = vadd.f32 %v8857_v28, %v8755_v60  ;;  %v3284_v7 = vadd.f32 %v8865_v49, %v8761_v45 }
 0x1f9   : > { %4972 = vst [vmem:[%s8974_s10] sm:$0xff] %v4940_v57  ;;  %v4943_v22 = vmax.f32 %v4911_v56, 0.0  ;;  %v4909_v52 = vadd.f32 %v8958_v27, %v4870_v5  ;;  %v4875_v24 = vadd.f32 %v6189_v38, %v4393_v12  ;;  %v4391_v9 = vadd.f32 %v4276_v21, %v3653_v29  ;;  %v4761_v47 = vpop.f32.mrf.mxu0 }
 0x1fa   : > { %v6154_v51 = vpop.f32.mrf.mxu1  ;;  %v3657_v48 = vadd.f32 %v8851_v34, %v3283_v33  ;;  %v3660_v29 = vadd.f32 %v8855_v26, %v3286_v58  ;;  %v3658_v5 = vadd.f32 %v8859_v63, %v3284_v7  ;;  %v3287_v12 = vadd.f32 %v8873_v53, %v8767_v11 }
 0x1fb   : > { %4975 = vst [vmem:[%s8974_s10 + $0x18] sm:$0xff] %v4943_v22  ;;  %v4941_v3 = vmax.f32 %v4909_v52, 0.0  ;;  %v4914_v59 = vadd.f32 %v8958_v27, %v4875_v24  ;;  %v4873_v43 = vadd.f32 %v4758_v40, %v4391_v9  ;;  %v4394_v0 = vadd.f32 %v6154_v51, %v3656_v6  ;;  %v6193_v16 = vpop.f32.mrf.mxu0 }
 0x1fc   : > { %v4279_v38 = vpop.f32.mrf.mxu1  ;;  %v3663_v21 = vadd.f32 %v8863_v37, %v3289_v25  ;;  %v3290_v22 = vadd.f32 %v8877_v54, %v8770_v36 }
 0x1fd   : > { %4973 = vst [vmem:[%s8974_s10 + $0x8] sm:$0xff] %v4941_v3  ;;  %v4946_v35 = vmax.f32 %v4914_v59, 0.0  ;;  %v4912_v39 = vadd.f32 %v8958_v27, %v4873_v43  ;;  %v4876_v60 = vadd.f32 %v6190_v4, %v4394_v0  ;;  %v4392_v28 = vadd.f32 %v4279_v38, %v3654_v46  ;;  %v4774_v55 = vpop.f32.mrf.mxu0 }
 0x1fe   : > { %v6157_v62 = vpop.f32.mrf.mxu1  ;;  %v3288_v46 = vadd.f32 %v8881_v19, %v8773_v8  ;;  %v3664_v59 = vadd.f32 %v8871_v23, %v3290_v22  ;;  %v3293_v43 = vadd.f32 %v8885_v17, %v8776_v50  ;;  %v3291_v38 = vadd.f32 %v8889_v13, %v8779_v18 }
 0x1ff   : > { %4978 = vst [vmem:[%s8974_s10 + $0x30] sm:$0xff] %v4946_v35  ;;  %v4944_v15 = vmax.f32 %v4912_v39, 0.0  ;;  %v4915_v44 = vadd.f32 %v8958_v27, %v4876_v60  ;;  %v4874_v2 = vadd.f32 %v4761_v47, %v4392_v28  ;;  %v4397_v10 = vadd.f32 %v6157_v62, %v3659_v61  ;;  %v6194_v40 = vpop.f32.mrf.mxu0 }
 0x200   : > { %v4292_v14 = vpop.f32.mrf.mxu1  ;;  %v3661_v47 = vadd.f32 %v8867_v1, %v3287_v12  ;;  %v3662_v58 = vadd.f32 %v8875_v20, %v3288_v46  ;;  %v3667_v28 = vadd.f32 %v8879_v31, %v3293_v43  ;;  %v9384_v12 = vld [vmem:[#allocation18_spill] sm:$0xff] }
 0x201   : > { %4976 = vst [vmem:[%s8974_s10 + $0x20] sm:$0xff] %v4944_v15  ;;  %v4947_v34 = vmax.f32 %v4915_v44, 0.0  ;;  %v4913_v57 = vadd.f32 %v8958_v27, %v4874_v2  ;;  %v4879_v45 = vadd.f32 %v6193_v16, %v4397_v10  ;;  %v4395_v49 = vadd.f32 %v4292_v14, %v3657_v48  ;;  %v4777_v56 = vpop.f32.mrf.mxu0  ;;  %v9379_v48 = vld [vmem:[#allocation25_spill] sm:$0xff]  ;;  %v9380_v2 = vld [vmem:[#allocation20_spill] sm:$0xff] }
 0x202   : > { %v6158_v4 = vpop.f32.mrf.mxu1  ;;  %v3665_v10 = vadd.f32 %v9380_v2, %v3291_v38 }
 0x203   : > { %4979 = vst [vmem:[%s8974_s10 + $0x38] sm:$0xff] %v4947_v34  ;;  %v4945_v26 = vmax.f32 %v4913_v57, 0.0  ;;  %v4918_v6 = vadd.f32 %v8958_v27, %v4879_v45  ;;  %v4877_v41 = vadd.f32 %v4774_v55, %v4395_v49  ;;  %v4398_v42 = vadd.f32 %v6158_v4, %v3660_v29  ;;  %v6197_v32 = vpop.f32.mrf.mxu0  ;;  %v9378_v55 = vld [vmem:[#allocation19_spill] sm:$0xff]  ;;  %v9382_v29 = vld [vmem:[#allocation12_spill] sm:$0xff]  ;;  %v9385_v4 = vld [vmem:[#allocation26_spill] sm:$0xff] }
 0x204   : > { %v4295_v52 = vpop.f32.mrf.mxu1  ;;  %v3294_v7 = vadd.f32 %v9379_v48, %v9378_v55 }
 0x205   : > { %4977 = vst [vmem:[%s8974_s10 + $0x28] sm:$0xff] %v4945_v26  ;;  %v4950_v63 = vmax.f32 %v4918_v6, 0.0  ;;  %v4916_v24 = vadd.f32 %v8958_v27, %v4877_v41  ;;  %v4880_v11 = vadd.f32 %v6194_v40, %v4398_v42  ;;  %v4396_v53 = vadd.f32 %v4295_v52, %v3658_v5  ;;  %v4790_v9 = vpop.f32.mrf.mxu0  ;;  %v9381_v40 = vld [vmem:[#allocation16_spill] sm:$0xff] }
 0x206   : > { %v6161_v33 = vpop.f32.mrf.mxu1  ;;  %v3292_v25 = vadd.f32 %v9382_v29, %v9381_v40  ;;  %v3297_v26 = vadd.f32 %v9385_v4, %v9384_v12  ;;  %v9386_v52 = vld [vmem:[#allocation24_spill] sm:$0xff] }
 0x207   : > { %4982 = vst [vmem:[%s8974_s10 + $0x50] sm:$0xff] %v4950_v63  ;;  %v4948_v37 = vmax.f32 %v4916_v24, 0.0  ;;  %v4919_v51 = vadd.f32 %v8958_v27, %v4880_v11  ;;  %v4878_v36 = vadd.f32 %v4777_v56, %v4396_v53  ;;  %v4401_v54 = vadd.f32 %v6161_v33, %v3663_v21  ;;  %v6198_v3 = vpop.f32.mrf.mxu0  ;;  %v9383_v56 = vld [vmem:[#allocation22_spill] sm:$0xff]  ;;  %v9387_v24 = vld [vmem:[#allocation21_spill] sm:$0xff]  ;;  %v9388_v11 = vld [vmem:[#allocation28_spill] sm:$0xff] }
 0x208   : > { %v4308_v0 = vpop.f32.mrf.mxu1  ;;  %v3668_v5 = vadd.f32 %v9383_v56, %v3294_v7  ;;  %v3666_v63 = vadd.f32 %v9386_v52, %v3292_v25  ;;  %v3295_v53 = vadd.f32 %v9388_v11, %v9387_v24  ;;  %v9395_v7 = vld [vmem:[#allocation27_spill] sm:$0xff]  ;;  %v9398_v25 = vld [vmem:[#allocation29_spill] sm:$0xff] }
 0x209   : > { %4980 = vst [vmem:[%s8974_s10 + $0x40] sm:$0xff] %v4948_v37  ;;  %v4951_v1 = vmax.f32 %v4919_v51, 0.0  ;;  %v4917_v16 = vadd.f32 %v8958_v27, %v4878_v36  ;;  %v4883_v8 = vadd.f32 %v6197_v32, %v4401_v54  ;;  %v4399_v19 = vadd.f32 %v4308_v0, %v3661_v47  ;;  %v4793_v61 = vpop.f32.mrf.mxu0  ;;  %v9389_v36 = vld [vmem:[#allocation9_spill] sm:$0xff] }
 0x20a   : > { %v6162_v35 = vpop.f32.mrf.mxu1  ;;  %v3671_v54 = vadd.f32 %v9389_v36, %v3297_v26  ;;  %v9401_v26 = vld [vmem:[#allocation31_spill] sm:$0xff] }
 0x20b   : > { %4983 = vst [vmem:[%s8974_s10 + $0x58] sm:$0xff] %v4951_v1  ;;  %v4949_v23 = vmax.f32 %v4917_v16, 0.0  ;;  %v4922_v39 = vadd.f32 %v8958_v27, %v4883_v8  ;;  %v4881_v50 = vadd.f32 %v4790_v9, %v4399_v19  ;;  %v4402_v17 = vadd.f32 %v6162_v35, %v3664_v59  ;;  %v9391_v59 = vld [vmem:[#allocation30_spill] sm:$0xff]  ;;  %v9393_v35 = vld [vmem:[#allocation7_spill] sm:$0xff] }
 0x20c   : > { %v6201_v60 = vpop.f32.mrf.mxu0  ;;  %v4311_v62 = vpop.f32.mrf.mxu1 }
 0x20d   : > { %4981 = vst [vmem:[%s8974_s10 + $0x48] sm:$0xff] %v4949_v23  ;;  %v4954_v20 = vmax.f32 %v4922_v39, 0.0  ;;  %v4920_v15 = vadd.f32 %v8958_v27, %v4881_v50  ;;  %v4884_v18 = vadd.f32 %v6198_v3, %v4402_v17  ;;  %v4400_v13 = vadd.f32 %v4311_v62, %v3662_v58  ;;  %v9390_v3 = vld [vmem:[#allocation23_spill] sm:$0xff]  ;;  %v9392_v58 = vld [vmem:[#allocation5_spill] sm:$0xff]  ;;  %v9394_v23 = vld [vmem:[#allocation32_spill] sm:$0xff] }
 0x20e   : > { %v4806_v44 = vpop.f32.mrf.mxu0  ;;  %v6165_v14 = vpop.f32.mrf.mxu1  ;;  %v3298_v43 = vadd.f32 %v9391_v59, %v9390_v3  ;;  %v3669_v38 = vadd.f32 %v9392_v58, %v3295_v53  ;;  %v3296_v39 = vadd.f32 %v9394_v23, %v9393_v35  ;;  %v9404_v53 = vld [vmem:[#allocation33_spill] sm:$0xff] }
 0x20f   : > { %4986 = vst [vmem:[%s8974_s10 + $0x70] sm:$0xff] %v4954_v20  ;;  %v4952_v31 = vmax.f32 %v4920_v15, 0.0  ;;  %v4923_v34 = vadd.f32 %v8958_v27, %v4884_v18  ;;  %v4882_v57 = vadd.f32 %v4793_v61, %v4400_v13  ;;  %v4405_v45 = vadd.f32 %v6165_v14, %v3667_v28  ;;  %v9396_v20 = vld [vmem:[#allocation10_spill] sm:$0xff] }
 0x210   : > { %v6202_v49 = vpop.f32.mrf.mxu0  ;;  %v4324_v6 = vpop.f32.mrf.mxu1  ;;  %v3672_v62 = vadd.f32 %v9395_v7, %v3298_v43  ;;  %v9397_v15 = vld [vmem:[#allocation34_spill] sm:$0xff]  ;;  %v3670_v14 = vadd.f32 %v9398_v25, %v3296_v39  ;;  %v9407_v43 = vld [vmem:[#allocation35_spill] sm:$0xff]  ;;  %v9410_v39 = vld [vmem:[#allocation37_spill] sm:$0xff] }
 0x211   : > { %4984 = vst [vmem:[%s8974_s10 + $0x60] sm:$0xff] %v4952_v31  ;;  %v4955_v41 = vmax.f32 %v4923_v34, 0.0  ;;  %v4921_v42 = vadd.f32 %v8958_v27, %v4882_v57  ;;  %v4887_v32 = vadd.f32 %v6201_v60, %v4405_v45  ;;  %v4403_v21 = vadd.f32 %v4324_v6, %v3665_v10  ;;  %v9399_v31 = vld [vmem:[#allocation8_spill] sm:$0xff] }
 0x212   : > { %v4809_v22 = vpop.f32.mrf.mxu0  ;;  %v6166_v9 = vpop.f32.mrf.mxu1  ;;  %v3301_v18 = vadd.f32 %v9397_v15, %v9396_v20  ;;  %v9400_v34 = vld [vmem:[#allocation36_spill] sm:$0xff] }
 0x213   : > { %4987 = vst [vmem:[%s8974_s10 + $0x78] sm:$0xff] %v4955_v41  ;;  %v4953_v47 = vmax.f32 %v4921_v42, 0.0  ;;  %v4926_v46 = vadd.f32 %v8958_v27, %v4887_v32  ;;  %v4885_v33 = vadd.f32 %v4806_v44, %v4403_v21  ;;  %v4406_v37 = vadd.f32 %v6166_v9, %v3668_v5  ;;  %v9402_v41 = vld [vmem:[#allocation13_spill] sm:$0xff]  ;;  %v9403_v42 = vld [vmem:[#allocation38_spill] sm:$0xff] }
 0x214   : > { %v6205_v51 = vpop.f32.mrf.mxu0  ;;  %v4327_v0 = vpop.f32.mrf.mxu1  ;;  %v3299_v57 = vadd.f32 %v9400_v34, %v9399_v31  ;;  %v3675_v6 = vadd.f32 %v9401_v26, %v3301_v18  ;;  %v3302_v32 = vadd.f32 %v9403_v42, %v9402_v41  ;;  %v9413_v18 = vld [vmem:[#allocation39_spill] sm:$0xff]  ;;  %v9415_v31 = vld [vmem:[#allocation41_spill] sm:$0xff] }
 0x215   : > { %4985 = vst [vmem:[%s8974_s10 + $0x68] sm:$0xff] %v4953_v47  ;;  %v4958_v1 = vmax.f32 %v4926_v46, 0.0  ;;  %v4924_v16 = vadd.f32 %v8958_v27, %v4885_v33  ;;  %v4888_v8 = vadd.f32 %v6202_v49, %v4406_v37  ;;  %v4404_v19 = vadd.f32 %v4327_v0, %v3666_v63  ;;  %v9405_v47 = vld [vmem:[#allocation14_spill] sm:$0xff]  ;;  %v9406_v46 = vld [vmem:[#allocation40_spill] sm:$0xff] }
 0x216   : > { %v4822_v61 = vpop.f32.mrf.mxu0  ;;  %v6169_v50 = vpop.f32.mrf.mxu1  ;;  %v3673_v9 = vadd.f32 %v9404_v53, %v3299_v57  ;;  %v3300_v33 = vadd.f32 %v9406_v46, %v9405_v47  ;;  %v3676_v0 = vadd.f32 %v9407_v43, %v3302_v32  ;;  %v9416_v57 = vld [vmem:[#allocation17_spill] sm:$0xff] }
 0x217   : > { %4990 = vst [vmem:[%s8974_s10 + $0x90] sm:$0xff] %v4958_v1  ;;  %v4956_v17 = vmax.f32 %v4924_v16, 0.0  ;;  %v4927_v60 = vadd.f32 %v8958_v27, %v4888_v8  ;;  %v4886_v28 = vadd.f32 %v4809_v22, %v4404_v19  ;;  %v4409_v55 = vadd.f32 %v6169_v50, %v3671_v54  ;;  %v9408_v1 = vld [vmem:[#allocation15_spill] sm:$0xff]  ;;  %v9409_v16 = vld [vmem:[#allocation42_spill] sm:$0xff] }
 0x218   : > { %v6206_v48 = vpop.f32.mrf.mxu0  ;;  %v4340_v13 = vpop.f32.mrf.mxu1  ;;  %v3305_v8 = vadd.f32 %v9409_v16, %v9408_v1  ;;  %v3674_v50 = vadd.f32 %v9410_v39, %v3300_v33 }
 0x219   : > { %4988 = vst [vmem:[%s8974_s10 + $0x80] sm:$0xff] %v4956_v17  ;;  %v4959_v44 = vmax.f32 %v4927_v60, 0.0  ;;  %v4925_v2 = vadd.f32 %v8958_v27, %v4886_v28  ;;  %v4891_v10 = vadd.f32 %v6205_v51, %v4409_v55  ;;  %v4407_v40 = vadd.f32 %v4340_v13, %v3669_v38  ;;  %v9411_v17 = vld [vmem:[#allocation6_spill] sm:$0xff]  ;;  %v9412_v60 = vld [vmem:[#allocation44_spill] sm:$0xff] }
 0x21a   : > { %v4825_v29 = vpop.f32.mrf.mxu0  ;;  %v6170_v45 = vpop.f32.mrf.mxu1  ;;  %v3303_v28 = vadd.f32 %v9412_v60, %v9411_v17  ;;  %v3679_v13 = vadd.f32 %v9413_v18, %v3305_v8 }
 0x21b   : > { %4991 = vst [vmem:[%s8974_s10 + $0x98] sm:$0xff] %v4959_v44  ;;  %v4957_v49 = vmax.f32 %v4925_v2, 0.0  ;;  %v4930_v56 = vadd.f32 %v8958_v27, %v4891_v10  ;;  %v4889_v5 = vadd.f32 %v4822_v61, %v4407_v40  ;;  %v4410_v12 = vadd.f32 %v6170_v45, %v3672_v62  ;;  %v9414_v44 = vld [vmem:[#allocation11_spill] sm:$0xff]  ;;  %v9417_v45 = vld [vmem:[#allocation46_spill] sm:$0xff] }
 0x21c   : > { %v6209_v4 = vpop.f32.mrf.mxu0  ;;  %v4343_v21 = vpop.f32.mrf.mxu1  ;;  %v3306_v2 = vadd.f32 %v8942_v30, %v9414_v44  ;;  %v3677_v34 = vadd.f32 %v9415_v31, %v3303_v28 }
 0x21d   : > { %4989 = vst [vmem:[%s8974_s10 + $0x88] sm:$0xff] %v4957_v49  ;;  %v4962_v22 = vmax.f32 %v4930_v56, 0.0  ;;  %v4928_v52 = vadd.f32 %v8958_v27, %v4889_v5  ;;  %v4892_v63 = vadd.f32 %v6206_v48, %v4410_v12  ;;  %v4408_v24 = vadd.f32 %v4343_v21, %v3670_v14 }
 0x21e   : > { %v4838_v11 = vpop.f32.mrf.mxu0  ;;  %v6173_v37 = vpop.f32.mrf.mxu1  ;;  %v3304_v49 = vadd.f32 %v9417_v45, %v9416_v57 }
 0x21f   : > { %4994 = vst [vmem:[%s8974_s10 + $0xb0] sm:$0xff] %v4962_v22  ;;  %v4960_v51 = vmax.f32 %v4928_v52, 0.0  ;;  %v4931_v36 = vadd.f32 %v8958_v27, %v4892_v63  ;;  %v4890_v54 = vadd.f32 %v4825_v29, %v4408_v24  ;;  %v4413_v3 = vadd.f32 %v6173_v37, %v3675_v6  ;;  %v9418_v6 = vld [vmem:[#allocation43_spill] sm:$0xff]  ;;  %v9419_v63 = vld [vmem:[#allocation45_spill] sm:$0xff] }
 0x220   : > { %v6210_v59 = vpop.f32.mrf.mxu0  ;;  %v4356_v19 = vpop.f32.mrf.mxu1  ;;  %v3680_v41 = vadd.f32 %v9418_v6, %v3306_v2  ;;  %v3678_v24 = vadd.f32 %v9419_v63, %v3304_v49 }
 0x221   : > { %4992 = vst [vmem:[%s8974_s10 + $0xa0] sm:$0xff] %v4960_v51  ;;  %v4963_v61 = vmax.f32 %v4931_v36, 0.0  ;;  %v4929_v58 = vadd.f32 %v8958_v27, %v4890_v54  ;;  %v4895_v38 = vadd.f32 %v6209_v4, %v4413_v3  ;;  %v4411_v35 = vadd.f32 %v4356_v19, %v3673_v9 }
 0x222   : > { %v4841_v23 = vpop.f32.mrf.mxu0  ;;  %v6174_v55 = vpop.f32.mrf.mxu1 }
 0x223   : > { %4995 = vst [vmem:[%s8974_s10 + $0xb8] sm:$0xff] %v4963_v61  ;;  %v4961_v48 = vmax.f32 %v4929_v58, 0.0  ;;  %v4934_v7 = vadd.f32 %v8958_v27, %v4895_v38  ;;  %v4893_v62 = vadd.f32 %v4838_v11, %v4411_v35  ;;  %v4414_v20 = vadd.f32 %v6174_v55, %v3676_v0 }
 0x224   : > { %v6213_v15 = vpop.f32.mrf.mxu0  ;;  %v4359_v10 = vpop.f32.mrf.mxu1 }
 0x225   : > { %4993 = vst [vmem:[%s8974_s10 + $0xa8] sm:$0xff] %v4961_v48  ;;  %v4966_v40 = vmax.f32 %v4934_v7, 0.0  ;;  %v4932_v29 = vadd.f32 %v8958_v27, %v4893_v62  ;;  %v4896_v25 = vadd.f32 %v6210_v59, %v4414_v20  ;;  %v4412_v14 = vadd.f32 %v4359_v10, %v3674_v50 }
 0x226   : > { %v6177_v56 = vpop.f32.mrf.mxu1  ;;  %v4854_v5 = vpop.f32.mrf.mxu0 }
 0x227   : > { %4998 = vst [vmem:[%s8974_s10 + $0xd0] sm:$0xff] %v4966_v40  ;;  %v4964_v12 = vmax.f32 %v4932_v29, 0.0  ;;  %v4935_v30 = vadd.f32 %v8958_v27, %v4896_v25  ;;  %v4894_v4 = vadd.f32 %v4841_v23, %v4412_v14  ;;  %v4417_v26 = vadd.f32 %v6177_v56, %v3679_v13 }
 0x228   : > { %v4372_v42 = vpop.f32.mrf.mxu1  ;;  %v6214_v53 = vpop.f32.mrf.mxu0 }
 0x229   : > { %4996 = vst [vmem:[%s8974_s10 + $0xc0] sm:$0xff] %v4964_v12  ;;  %v4967_v32 = vmax.f32 %v4935_v30, 0.0  ;;  %v4933_v21 = vadd.f32 %v8958_v27, %v4894_v4  ;;  %v4899_v22 = vadd.f32 %v6213_v15, %v4417_v26  ;;  %v4415_v52 = vadd.f32 %v4372_v42, %v3677_v34 }
 0x22a   : > { %v6178_v11 = vpop.f32.mrf.mxu1  ;;  %v4857_v59 = vpop.f32.mrf.mxu0 }
 0x22b   : > { %4999 = vst [vmem:[%s8974_s10 + $0xd8] sm:$0xff] %v4967_v32  ;;  %v4965_v9 = vmax.f32 %v4933_v21, 0.0  ;;  %v4938_v47 = vadd.f32 %v8958_v27, %v4899_v22  ;;  %v4897_v46 = vadd.f32 %v4854_v5, %v4415_v52  ;;  %v4418_v33 = vadd.f32 %v6178_v11, %v3680_v41 }
 0x22c   : > { %v4375_v37 = vpop.f32.mrf.mxu1 }
 0x22d   : > { %4997 = vst [vmem:[%s8974_s10 + $0xc8] sm:$0xff] %v4965_v9  ;;  %v4970_v51 = vmax.f32 %v4938_v47, 0.0  ;;  %v4936_v36 = vadd.f32 %v8958_v27, %v4897_v46  ;;  %v4900_v54 = vadd.f32 %v6214_v53, %v4418_v33  ;;  %v4416_v3 = vadd.f32 %v4375_v37, %v3678_v24 }
 0x22f   : > { %5002 = vst [vmem:[%s8974_s10 + $0xf0] sm:$0xff] %v4970_v51  ;;  %v4968_v43 = vmax.f32 %v4936_v36, 0.0  ;;  %v4939_v0 = vadd.f32 %v8958_v27, %v4900_v54  ;;  %v4898_v1 = vadd.f32 %v4857_v59, %v4416_v3 }
 0x231   : > { %5000 = vst [vmem:[%s8974_s10 + $0xe0] sm:$0xff] %v4968_v43  ;;  %v4971_v16 = vmax.f32 %v4939_v0, 0.0  ;;  %v4937_v8 = vadd.f32 %v8958_v27, %v4898_v1 }
 0x233   : > { %5003 = vst [vmem:[%s8974_s10 + $0xf8] sm:$0xff] %v4971_v16  ;;  %v4969_v19 = vmax.f32 %v4937_v8, 0.0 }
 0x235   : > { %5001 = vst [vmem:[%s8974_s10 + $0xe8] sm:$0xff] %v4969_v19 }
 0x236   : > { %6360 = shalt.err (!%p6357_p5)
}
 0x237   : > { %s6361_s4 = scalar_lea.hbm %s9115_s26, 4096  ;;  %s6365_s11 = scalar_lea.hbm %s9171_s3, 8192 }
 0x238   : > { %p6362_p6 = scmp.ne.s32.totalorder %s9115_s26, %s6361_s4  ;;  %p6366_p10 = scmp.lt.s32.totalorder %s9115_s26, %s9171_s3 }
 0x239   : > { %p6367_p11 = scmp.lt.s32.totalorder %s6365_s11, %s6361_s4 }
 0x23a   : > { %p6363_p7 = pnand %p6362_p6, %p6488_p4 }
 0x23b   : > { %p6368_p12 = por %p6367_p11, %p6366_p10 }
 0x23c   : > { %p6364_p9 = pneg %p6363_p7 }
 0x23e   : > { %p6369_p13 = pnand %p6368_p12, %p6364_p9 }
 0x240   : > { %6372 = shalt.err (!%p6369_p13)
}
 0x241   : > { %s6426_s9 = smov 128   ;;  %s6427_s10 = smov 8  }
 0x242   : > { %6220 = dma.vmem_to_hbm [thread:$0]  (%p6488_p4), %s9117_s19, 4096, %s9115_s26, %s9123_s15, %s6426_s9, %s6426_s9, %s6427_s10  }
 0x243 PF: > { %p6226_p0 = scmp.ge.s32.totalorder %s6423_s17, 2  ;;  %s5036_s18 = sand.u32 1, %s6403_s12  }
 0x244   : > { %s5037_s21 = scalar_lea.sflag [#allocation3], %s5036_s18 }
 0x245   : > { %p6223_p1 = pnand %p6226_p0, %p6495_p8 }
 0x247   : > { %p6224_p2 = pneg %p6223_p1 }
 0x249   : > { %6398 = dma.done.wait (%p6224_p2), %s5037_s21, 4096  }
 0x24a   : > { %6400 = vsyncadd (%p6224_p2), %s5037_s21, 4294963200  ;;  %s16_s17 = sadd.s32 1, %s6423_s17   ;;  %s9420_s12 = smov %s6407_s13 }
 0x24b   : > { %p13_p3 = scmp.ge.s32.totalorder %s16_s17, 4   ;;  %s9421_s13 = smov %s6411_s14 }
 0x24c   : > { %s9422_s14 = smov %s6501_s25  ;;  %s9423_s15 = smov %s6419_s16 }
 0x24d   : > { %s9424_s16 = smov %s9426_s20  ;;  %15 = sbr.rel (!%p13_p3) target bundleno = 4 (0x4), region = 84 }
 0x252   :  { %5042 = vsyncpa [#allocation3], 1 }
 0x253   :  { %5044 = vsyncpa [#allocation3 + $0x1], 1 }

</bundles_post_ra>
